<compile_context>
chip_gen: v7x
topology: tpu7x:2x2x1
jax: 0.10.0
libtpu: 0.0.40
codegen_flags: <defaults>
</compile_context>

<pallas_src>
import functools

import jax
import jax.numpy as jnp
from jax import lax
from jax.experimental import pallas as pl
from jax.experimental.pallas import tpu as pltpu

EPS = 1e-5  # nn.BatchNorm2d default eps


# ----------------------------- in-kernel helpers ----------------------------

def _bn_relu(y_f32, stats, gamma, beta):
    """Training-mode BN (precomputed batch stats) + ReLU.
    stats: (2, C) with row 0 = batch mean, row 1 = rsqrt(var + eps)."""
    mean = stats[0:1, :]
    inv_std = stats[1:2, :]
    return jnp.maximum((y_f32 - mean) * (inv_std * gamma) + beta, 0.0)


def _accumulate_stats(acc_ref, y):
    acc_ref[0:1, :] += jnp.sum(y, axis=0, keepdims=True)
    acc_ref[1:2, :] += jnp.sum(y * y, axis=0, keepdims=True)


def _finalize_stats(acc_ref, stats_ref, inv_rows):
    mean = acc_ref[0:1, :] * inv_rows
    var = acc_ref[1:2, :] * inv_rows - mean * mean      # biased batch variance
    stats_ref[0:1, :] = mean
    stats_ref[1:2, :] = lax.rsqrt(var + EPS)


# ------------------------------- kernels ------------------------------------

def _conv1x1_stats_kernel(x_ref, w_ref, y_ref, stats_ref, acc_ref, *, inv_rows):
    """conv1 (1x1): y = x @ w ; write pre-BN y (bf16) and global batch stats."""
    t = pl.program_id(0)

    @pl.when(t == 0)
    def _():
        acc_ref[...] = jnp.zeros_like(acc_ref)

    y = jnp.dot(x_ref[...], w_ref[...], preferred_element_type=jnp.float32)
    _accumulate_stats(acc_ref, y)
    y_ref[...] = y.astype(y_ref.dtype)

    @pl.when(t == pl.num_programs(0) - 1)
    def _():
        _finalize_stats(acc_ref, stats_ref, inv_rows)


def _bn_relu_conv3x3_stats_kernel(x_ref, sin_ref, g_ref, b_ref, w_ref,
                                  y_ref, stats_ref, acc_ref, hp_ref,
                                  *, stride, inv_rows):
    """Per image: bn1+relu (fused, in VMEM) -> 3x3 conv (9 shifted MXU matmuls
    on a zero-padded VMEM scratch; no HBM im2col) -> pre-BN y2 + batch stats."""
    n = pl.program_id(0)

    @pl.when(n == 0)
    def _():
        acc_ref[...] = jnp.zeros_like(acc_ref)
        hp_ref[...] = jnp.zeros_like(hp_ref)   # border stays zero forever

    _, H, W, Cin = x_ref.shape
    _, Ho, Wo, Cout = y_ref.shape

    h = _bn_relu(x_ref[0].astype(jnp.float32), sin_ref[...], g_ref[...], b_ref[...])
    # interior of the zero-padded buffer (Conv2d padding=1 applied AFTER bn+relu)
    hp_ref[1:H + 1, 1:W + 1, :] = h.astype(hp_ref.dtype)

    acc = jnp.zeros((Ho * Wo, Cout), jnp.float32)
    for ky in range(3):
        for kx in range(3):
            if stride == 1:
                patch = hp_ref[ky:ky + Ho, kx:kx + Wo, :]
            else:
                patch = hp_ref[pl.ds(ky, Ho, stride), pl.ds(kx, Wo, stride), :]
            acc = acc + jnp.dot(patch.reshape(Ho * Wo, Cin),
                                w_ref[ky * 3 + kx],
                                preferred_element_type=jnp.float32)

    _accumulate_stats(acc_ref, acc)
    y_ref[...] = acc.reshape(1, Ho, Wo, Cout).astype(y_ref.dtype)

    @pl.when(n == pl.num_programs(0) - 1)
    def _():
        _finalize_stats(acc_ref, stats_ref, inv_rows)


def _bn_relu_conv1x1_stats_kernel(x_ref, sin_ref, g_ref, b_ref, w_ref,
                                  y_ref, stats_ref, acc_ref, *, inv_rows):
    """Row tile: bn2+relu (fused) -> conv3 (1x1) -> pre-BN y3 + batch stats."""
    t = pl.program_id(0)

    @pl.when(t == 0)
    def _():
        acc_ref[...] = jnp.zeros_like(acc_ref)

    h = _bn_relu(x_ref[...].astype(jnp.float32), sin_ref[...], g_ref[...], b_ref[...])
    y = jnp.dot(h.astype(w_ref.dtype), w_ref[...], preferred_element_type=jnp.float32)
    _accumulate_stats(acc_ref, y)
    y_ref[...] = y.astype(y_ref.dtype)

    @pl.when(t == pl.num_programs(0) - 1)
    def _():
        _finalize_stats(acc_ref, stats_ref, inv_rows)


def _bn_add_relu_kernel(y_ref, s_ref, g_ref, b_ref, id_ref, o_ref):
    """Row tile: bn3 + residual add (first Cid channels only) + relu."""
    y = y_ref[...].astype(jnp.float32)
    ybn = (y - s_ref[0:1, :]) * (s_ref[1:2, :] * g_ref[...]) + b_ref[...]
    e = y_ref.shape[1]
    cid = id_ref.shape[1]
    idv = id_ref[...].astype(jnp.float32)
    if cid == e:
        o_ref[...] = jnp.maximum(ybn + idv, 0.0).astype(o_ref.dtype)
    else:
        # Shortcut's zero channel padding is never materialized in HBM: write the
        # full tile, then overwrite the first `cid` channels with the residual add.
        o_ref[...] = jnp.maximum(ybn, 0.0).astype(o_ref.dtype)
        o_ref[:, 0:cid] = jnp.maximum(ybn[:, 0:cid] + idv, 0.0).astype(o_ref.dtype)


# ------------------------------ pallas_call wrappers -------------------------

def _row_tile(n_rows, max_rows):
    """Largest multiple-of-8 divisor of n_rows that is <= max_rows
    (fallback: one whole-array block)."""
    for cand in range(min(max_rows, n_rows), 7, -1):
        if n_rows % cand == 0 and cand % 8 == 0:
            return cand
    return n_rows


def _conv1x1_stats(x2d, w, row_tile):
    n_rows, cin = x2d.shape
    cout = w.shape[1]
    kernel = functools.partial(_conv1x1_stats_kernel, inv_rows=1.0 / n_rows)
    return pl.pallas_call(
        kernel,
        grid=(n_rows // row_tile,),
        in_specs=[pl.BlockSpec((row_tile, cin), lambda t: (t, 0)),
                  pl.BlockSpec((cin, cout), lambda t: (0, 0))],
        out_specs=(pl.BlockSpec((row_tile, cout), lambda t: (t, 0)),
                   pl.BlockSpec((2, cout), lambda t: (0, 0))),
        out_shape=(jax.ShapeDtypeStruct((n_rows, cout), jnp.bfloat16),
                   jax.ShapeDtypeStruct((2, cout), jnp.float32)),
        scratch_shapes=[pltpu.VMEM((2, cout), jnp.float32)],
        compiler_params=pltpu.CompilerParams(dimension_semantics=("arbitrary",)),
        cost_estimate=pl.CostEstimate(
            flops=2 * n_rows * cin * cout, transcendentals=0,
            bytes_accessed=2 * n_rows * (cin + cout)),
    )(x2d, w)


def _bn_relu_conv3x3_stats(y_prev, stats_prev, gamma, beta, w2, stride, out_hw):
    n, h, w, cin = y_prev.shape
    cout = w2.shape[2]
    ho, wo = out_hw
    n_rows = n * ho * wo
    kernel = functools.partial(_bn_relu_conv3x3_stats_kernel,
                               stride=stride, inv_rows=1.0 / n_rows)
    return pl.pallas_call(
        kernel,
        grid=(n,),
        in_specs=[pl.BlockSpec((1, h, w, cin), lambda i: (i, 0, 0, 0)),
                  pl.BlockSpec((2, cin), lambda i: (0, 0)),
                  pl.BlockSpec((1, cin), lambda i: (0, 0)),
                  pl.BlockSpec((1, cin), lambda i: (0, 0)),
                  pl.BlockSpec((9, cin, cout), lambda i: (0, 0, 0))],
        out_specs=(pl.BlockSpec((1, ho, wo, cout), lambda i: (i, 0, 0, 0)),
                   pl.BlockSpec((2, cout), lambda i: (0, 0))),
        out_shape=(jax.ShapeDtypeStruct((n, ho, wo, cout), jnp.bfloat16),
                   jax.ShapeDtypeStruct((2, cout), jnp.float32)),
        scratch_shapes=[pltpu.VMEM((2, cout), jnp.float32),
                        pltpu.VMEM((h + 2, w + 2, cin), jnp.bfloat16)],
        compiler_params=pltpu.CompilerParams(dimension_semantics=("arbitrary",)),
        cost_estimate=pl.CostEstimate(
            flops=2 * n_rows * 9 * cin * cout, transcendentals=0,
            bytes_accessed=2 * (n * h * w * cin + n_rows * cout)),
    )(y_prev, stats_prev, gamma, beta, w2)


def _bn_relu_conv1x1_stats(y_prev2d, stats_prev, gamma, beta, w, row_tile):
    n_rows, cin = y_prev2d.shape
    cout = w.shape[1]
    kernel = functools.partial(_bn_relu_conv1x1_stats_kernel, inv_rows=1.0 / n_rows)
    return pl.pallas_call(
        kernel,
        grid=(n_rows // row_tile,),
        in_specs=[pl.BlockSpec((row_tile, cin), lambda t: (t, 0)),
                  pl.BlockSpec((2, cin), lambda t: (0, 0)),
                  pl.BlockSpec((1, cin), lambda t: (0, 0)),
                  pl.BlockSpec((1, cin), lambda t: (0, 0)),
                  pl.BlockSpec((cin, cout), lambda t: (0, 0))],
        out_specs=(pl.BlockSpec((row_tile, cout), lambda t: (t, 0)),
                   pl.BlockSpec((2, cout), lambda t: (0, 0))),
        out_shape=(jax.ShapeDtypeStruct((n_rows, cout), jnp.bfloat16),
                   jax.ShapeDtypeStruct((2, cout), jnp.float32)),
        scratch_shapes=[pltpu.VMEM((2, cout), jnp.float32)],
        compiler_params=pltpu.CompilerParams(dimension_semantics=("arbitrary",)),
        cost_estimate=pl.CostEstimate(
            flops=2 * n_rows * cin * cout, transcendentals=0,
            bytes_accessed=2 * n_rows * (cin + cout)),
    )(y_prev2d, stats_prev, gamma, beta, w)


def _bn_add_relu(y2d, stats, gamma, beta, id2d, row_tile):
    n_rows, e = y2d.shape
    cid = id2d.shape[1]
    return pl.pallas_call(
        _bn_add_relu_kernel,
        grid=(n_rows // row_tile,),
        in_specs=[pl.BlockSpec((row_tile, e), lambda t: (t, 0)),
                  pl.BlockSpec((2, e), lambda t: (0, 0)),
                  pl.BlockSpec((1, e), lambda t: (0, 0)),
                  pl.BlockSpec((1, e), lambda t: (0, 0)),
                  pl.BlockSpec((row_tile, cid), lambda t: (t, 0))],
        out_specs=pl.BlockSpec((row_tile, e), lambda t: (t, 0)),
        out_shape=jax.ShapeDtypeStruct((n_rows, e), jnp.float32),
        compiler_params=pltpu.CompilerParams(dimension_semantics=("parallel",)),
        cost_estimate=pl.CostEstimate(
            flops=4 * n_rows * e, transcendentals=0,
            bytes_accessed=n_rows * (6 * e + 4 * cid)),
    )(y2d, stats, gamma, beta, id2d)


# ------------------------------ JAX glue -------------------------------------

def identity_path(x_nhwc, stride):
    """Shortcut: avg_pool2d(2,2) when stride==2.  Zero channel padding is NOT
    materialized here; it is applied inside the final fused kernel."""
    if stride == 2:
        n, h, w, c = x_nhwc.shape
        x_nhwc = x_nhwc.reshape(n, h // 2, 2, w // 2, 2, c).mean(axis=(2, 4))
    return x_nhwc


def init_bottleneck_params(key, n_in_planes, n_out_planes):
    exp = n_out_planes * 4
    k = jax.random.split(key, 5)
    return {
        "w1": jax.random.normal(k[0], (n_out_planes, n_in_planes, 1, 1), jnp.float32) * 0.1,
        "b1": jax.random.normal(k[1], (n_out_planes,), jnp.float32) * 0.01,   # cancelled by BN1
        "w2": jax.random.normal(k[2], (n_out_planes, n_out_planes, 3, 3), jnp.float32) * 0.1,
        "w3": jax.random.normal(k[3], (exp, n_out_planes, 1, 1), jnp.float32) * 0.1,
        "b3": jax.random.normal(k[4], (exp,), jnp.float32) * 0.01,            # cancelled by BN3
        "g1": jnp.ones((n_out_planes,), jnp.float32),
        "be1": jnp.zeros((n_out_planes,), jnp.float32),
        "g2": jnp.ones((n_out_planes,), jnp.float32),
        "be2": jnp.zeros((n_out_planes,), jnp.float32),
        "g3": jnp.ones((exp,), jnp.float32),
        "be3": jnp.zeros((exp,), jnp.float32),
    }


@functools.partial(jax.jit, static_argnames=("n_out_planes", "stride", "row_block"))
def bottleneck_forward(params, x_nchw, n_out_planes, stride=1, row_block=1024):
    x = jnp.transpose(x_nchw, (0, 2, 3, 1)).astype(jnp.float32)    # NHWC
    n, h, w, cin = x.shape
    c1 = n_out_planes
    e = 4 * n_out_planes

    # Weights as (Cin, Cout) MXU operands in bf16 (f32 accumulation in-kernel).
    w1 = params["w1"].reshape(c1, cin).T.astype(jnp.bfloat16)
    # 3x3 weight as (tap=9, Cin, Cout) so each tap is a leading-axis load in-kernel.
    w2 = jnp.transpose(params["w2"], (2, 3, 1, 0)).reshape(9, c1, c1).astype(jnp.bfloat16)
    w3 = params["w3"].reshape(e, c1).T.astype(jnp.bfloat16)
    g1 = params["g1"].reshape(1, c1); be1 = params["be1"].reshape(1, c1)
    g2 = params["g2"].reshape(1, c1); be2 = params["be2"].reshape(1, c1)
    g3 = params["g3"].reshape(1, e);  be3 = params["be3"].reshape(1, e)
    # conv biases b1/b3 are intentionally unused: a per-channel constant added
    # before training-mode BN is exactly removed by the batch-mean subtraction.

    # Stage 1: conv1 (1x1) -> pre-BN y1 (bf16) + global batch stats.
    r0 = n * h * w
    tr0 = _row_tile(r0, row_block)
    y1, s1 = _conv1x1_stats(x.reshape(r0, cin).astype(jnp.bfloat16), w1, tr0)
    y1 = y1.reshape(n, h, w, c1)

    # Stage 2: [bn1+relu] fused with conv2 (3x3, stride, pad=1), per image.
    ho = (h + 2 - 3) // stride + 1
    wo = (w + 2 - 3) // stride + 1
    y2, s2 = _bn_relu_conv3x3_stats(y1, s1, g1, be1, w2, stride, (ho, wo))

    # Stage 3: [bn2+relu] fused with conv3 (1x1), row-tiled.
    r2 = n * ho * wo
    tr2 = _row_tile(r2, row_block)
    y3, s3 = _bn_relu_conv1x1_stats(y2.reshape(r2, c1), s2, g2, be2, w3, tr2)

    # Stage 4: bn3 + shortcut add (narrow shortcut, no HBM channel padding) + relu.
    idn = identity_path(x, stride).reshape(r2, cin)
    out = _bn_add_relu(y3, s3, g3, be3, idn, tr2)
    return jnp.transpose(out.reshape(n, ho, wo, e), (0, 3, 1, 2))   # back to NCHW


# ------------------------- pure-JAX reference (validation) -------------------

def _bn_stats_ref(y):
    mean = jnp.mean(y, axis=(0, 1, 2), keepdims=True)
    var = jnp.mean(y * y, axis=(0, 1, 2), keepdims=True) - mean * mean
    return mean, lax.rsqrt(var + EPS)


def reference_forward(params, x_nchw, n_out_planes, stride=1):
    """Pure-JAX reference with the same precision policy as the Pallas path
    (bf16 MXU operands / HBM storage, f32 accumulation and BN math)."""
    x = jnp.transpose(x_nchw, (0, 2, 3, 1)).astype(jnp.float32)
    n, h, w, cin = x.shape
    c1 = n_out_planes
    e = 4 * c1

    w1 = params["w1"].reshape(c1, cin).T.astype(jnp.bfloat16)
    w2 = jnp.transpose(params["w2"], (2, 3, 1, 0)).astype(jnp.bfloat16)   # HWIO
    w3 = params["w3"].reshape(e, c1).T.astype(jnp.bfloat16)

    def bnr(y_acc, gamma, beta):
        mean, inv = _bn_stats_ref(y_acc)
        y = y_acc.astype(jnp.bfloat16).astype(jnp.float32)   # mirrors bf16 HBM storage
        return jnp.maximum((y - mean) * inv * gamma.reshape(1, 1, 1, -1)
                           + beta.reshape(1, 1, 1, -1), 0.0)

    y1 = jnp.einsum("nhwc,cd->nhwd", x.astype(jnp.bfloat16), w1,
                    preferred_element_type=jnp.float32)
    h1 = bnr(y1, params["g1"], params["be1"])

    y2 = lax.conv_general_dilated(h1.astype(jnp.bfloat16), w2,
                                  window_strides=(stride, stride),
                                  padding=((1, 1), (1, 1)),
                                  dimension_numbers=("NHWC", "HWIO", "NHWC"),
                                  preferred_element_type=jnp.float32)
    h2 = bnr(y2, params["g2"], params["be2"])

    y3 = jnp.einsum("nhwc,cd->nhwd", h2.astype(jnp.bfloat16), w3,
                    preferred_element_type=jnp.float32)
    mean3, inv3 = _bn_stats_ref(y3)
    y3 = y3.astype(jnp.bfloat16).astype(jnp.float32)
    y3 = (y3 - mean3) * inv3 * params["g3"].reshape(1, 1, 1, -1) \
        + params["be3"].reshape(1, 1, 1, -1)

    idn = x
    if stride == 2:
        idn = idn.reshape(n, h // 2, 2, w // 2, 2, cin).mean(axis=(2, 4))
    if cin != e:
        idn = jnp.pad(idn, ((0, 0), (0, 0), (0, 0), (0, e - cin)))
    out = jnp.maximum(y3 + idn, 0.0)
    return jnp.transpose(out, (0, 3, 1, 2))


if __name__ == "__main__":
    key = jax.random.PRNGKey(0)
    k_x, k_p = jax.random.split(key)

    n_in_planes, n_out_planes, stride = 4, 4, 1
    x = jax.random.normal(k_x, (2, n_in_planes, 16, 16), jnp.float32)
    params = init_bottleneck_params(k_p, n_in_planes, n_out_planes)

    # row_block=128 -> 4 row tiles for the 1x1-conv stages and 2 image tiles
    # for the 3x3 stage, exercising the cross-tile BN accumulate/finalize path.
    out = bottleneck_forward(params, x, n_out_planes=n_out_planes,
                             stride=stride, row_block=128)
    out = jax.block_until_ready(out)

    assert out.shape == (2, n_out_planes * 4, 16, 16), out.shape
    assert bool(jnp.all(out >= 0.0))                    # final ReLU

    ref = reference_forward(params, x, n_out_planes, stride)
    assert bool(jnp.allclose(out, ref, atol=2e-2, rtol=2e-2)), (
        float(jnp.max(jnp.abs(out - ref))))

    # TODO(synk): stride=2 path (strided pl.ds loads in the 3x3 kernel) is
    # implemented but not exercised by this small demo.
    print("KERNEL_OK")
</pallas_src>

<mosaic_0001>
module attributes {stable_mosaic.version = 11 : i64} {
  func.func @_conv1x1_stats_kernel(%arg0: i32, %arg1: memref<128x4xbf16, #tpu.memory_space<vmem>>, %arg2: memref<4x4xbf16, #tpu.memory_space<vmem>>, %arg3: memref<128x4xbf16, #tpu.memory_space<vmem>>, %arg4: memref<2x4xf32, #tpu.memory_space<vmem>>, %arg5: memref<2x4xf32, #tpu.memory_space<vmem>>) attributes {dimension_semantics = [#tpu.dimension_semantics<arbitrary>], iteration_bounds = array<i64: 4>, scalar_prefetch = 0 : i64, scratch_operands = 1 : i64, tpu.core_type = #tpu.core_type<tc>, window_params = [{transform_indices = @transform_0, window_bounds = array<i64: 128, 4>}, {pipeline_mode = #tpu.pipeline_mode<synchronous>, transform_indices = @transform_1, window_bounds = array<i64: 4, 4>}, {transform_indices = @transform_2, window_bounds = array<i64: 128, 4>}, {pipeline_mode = #tpu.pipeline_mode<synchronous>, transform_indices = @transform_3, window_bounds = array<i64: 2, 4>}]} {
    %c0_i32 = arith.constant 0 : i32
    %0 = arith.cmpi eq, %arg0, %c0_i32 : i32
    %1 = arith.extui %0 : i1 to i32
    %c0_i32_0 = arith.constant 0 : i32
    %2 = arith.cmpi ne, %1, %c0_i32_0 : i32
    scf.if %2 {
      %cst_16 = arith.constant 0.000000e+00 : f32
      %22 = vector.broadcast %cst_16 : f32 to vector<2x4xf32>
      %c0_17 = arith.constant 0 : index
      %c0_18 = arith.constant 0 : index
      %23 = vector.load %arg5[%c0_17, %c0_18] : memref<2x4xf32, #tpu.memory_space<vmem>>, vector<2x4xf32>
      tpu.vector_store %arg5[%c0_17, %c0_18], %22 {strides = array<i32>} : memref<2x4xf32, #tpu.memory_space<vmem>>, vector<2x4xf32>,
    } else {
    }
    %c0 = arith.constant 0 : index
    %c0_1 = arith.constant 0 : index
    %3 = vector.load %arg1[%c0, %c0_1] : memref<128x4xbf16, #tpu.memory_space<vmem>>, vector<128x4xbf16>
    %c0_2 = arith.constant 0 : index
    %c0_3 = arith.constant 0 : index
    %4 = vector.load %arg2[%c0_2, %c0_3] : memref<4x4xbf16, #tpu.memory_space<vmem>>, vector<4x4xbf16>
    %cst = arith.constant dense<0.000000e+00> : vector<128x4xf32>
    %5 = tpu.matmul %3, %4, %cst {dimension_numbers = #tpu.dot_dimension_numbers<[1], [0], [0], [1], [0, 0, 1, 1], [], []>} : vector<128x4xbf16>, vector<4x4xbf16>, vector<128x4xf32> -> vector<128x4xf32>
    %c0_4 = arith.constant 0 : index
    %c0_5 = arith.constant 0 : index
    %6 = vector.load %arg5[%c0_4, %c0_5] : memref<2x4xf32, #tpu.memory_space<vmem>>, vector<1x4xf32>
    %cst_6 = arith.constant dense<0.000000e+00> : vector<4xf32>
    %7 = vector.multi_reduction <add>, %5, %cst_6 [0] : vector<128x4xf32> to vector<4xf32>
    %8 = vector.shape_cast %7 : vector<4xf32> to vector<1x4xf32>
    %9 = arith.addf %6, %8 : vector<1x4xf32>
    %c0_7 = arith.constant 0 : index
    %c0_8 = arith.constant 0 : index
    %10 = vector.load %arg5[%c0_7, %c0_8] : memref<2x4xf32, #tpu.memory_space<vmem>>, vector<1x4xf32>
    tpu.vector_store %arg5[%c0_7, %c0_8], %9 {strides = array<i32>} : memref<2x4xf32, #tpu.memory_space<vmem>>, vector<1x4xf32>,
    %c1 = arith.constant 1 : index
    %c0_9 = arith.constant 0 : index
    %11 = vector.load %arg5[%c1, %c0_9] : memref<2x4xf32, #tpu.memory_space<vmem>>, vector<1x4xf32>
    %12 = arith.mulf %5, %5 : vector<128x4xf32>
    %cst_10 = arith.constant dense<0.000000e+00> : vector<4xf32>
    %13 = vector.multi_reduction <add>, %12, %cst_10 [0] : vector<128x4xf32> to vector<4xf32>
    %14 = vector.shape_cast %13 : vector<4xf32> to vector<1x4xf32>
    %15 = arith.addf %11, %14 : vector<1x4xf32>
    %c1_11 = arith.constant 1 : index
    %c0_12 = arith.constant 0 : index
    %16 = vector.load %arg5[%c1_11, %c0_12] : memref<2x4xf32, #tpu.memory_space<vmem>>, vector<1x4xf32>
    tpu.vector_store %arg5[%c1_11, %c0_12], %15 {strides = array<i32>} : memref<2x4xf32, #tpu.memory_space<vmem>>, vector<1x4xf32>,
    %17 = arith.truncf %5 : vector<128x4xf32> to vector<128x4xbf16>
    %c0_13 = arith.constant 0 : index
    %c0_14 = arith.constant 0 : index
    %18 = vector.load %arg3[%c0_13, %c0_14] : memref<128x4xbf16, #tpu.memory_space<vmem>>, vector<128x4xbf16>
    tpu.vector_store %arg3[%c0_13, %c0_14], %17 {strides = array<i32>} : memref<128x4xbf16, #tpu.memory_space<vmem>>, vector<128x4xbf16>,
    %c3_i32 = arith.constant 3 : i32
    %19 = arith.cmpi eq, %arg0, %c3_i32 : i32
    %20 = arith.extui %19 : i1 to i32
    %c0_i32_15 = arith.constant 0 : i32
    %21 = arith.cmpi ne, %20, %c0_i32_15 : i32
    scf.if %21 {
      %c0_16 = arith.constant 0 : index
      %c0_17 = arith.constant 0 : index
      %22 = vector.load %arg5[%c0_16, %c0_17] : memref<2x4xf32, #tpu.memory_space<vmem>>, vector<1x4xf32>
      %cst_18 = arith.constant 0.001953125 : f32
      %23 = vector.broadcast %cst_18 : f32 to vector<1x4xf32>
      %24 = arith.mulf %22, %23 : vector<1x4xf32>
      %c1_19 = arith.constant 1 : index
      %c0_20 = arith.constant 0 : index
      %25 = vector.load %arg5[%c1_19, %c0_20] : memref<2x4xf32, #tpu.memory_space<vmem>>, vector<1x4xf32>
      %cst_21 = arith.constant 0.001953125 : f32
      %26 = vector.broadcast %cst_21 : f32 to vector<1x4xf32>
      %27 = arith.mulf %25, %26 : vector<1x4xf32>
      %28 = arith.mulf %24, %24 : vector<1x4xf32>
      %29 = arith.subf %27, %28 : vector<1x4xf32>
      %c0_22 = arith.constant 0 : index
      %c0_23 = arith.constant 0 : index
      %30 = vector.load %arg4[%c0_22, %c0_23] : memref<2x4xf32, #tpu.memory_space<vmem>>, vector<1x4xf32>
      tpu.vector_store %arg4[%c0_22, %c0_23], %24 {strides = array<i32>} : memref<2x4xf32, #tpu.memory_space<vmem>>, vector<1x4xf32>,
      %cst_24 = arith.constant 9.99999974E-6 : f32
      %31 = vector.broadcast %cst_24 : f32 to vector<1x4xf32>
      %32 = arith.addf %29, %31 : vector<1x4xf32>
      %33 = math.rsqrt %32 : vector<1x4xf32>
      %c1_25 = arith.constant 1 : index
      %c0_26 = arith.constant 0 : index
      %34 = vector.load %arg4[%c1_25, %c0_26] : memref<2x4xf32, #tpu.memory_space<vmem>>, vector<1x4xf32>
      tpu.vector_store %arg4[%c1_25, %c0_26], %33 {strides = array<i32>} : memref<2x4xf32, #tpu.memory_space<vmem>>, vector<1x4xf32>,
    } else {
    }
    return
  }
  func.func @transform_0(%arg0: i32) -> (i32, i32) {
    %c0_i32 = arith.constant 0 : i32
    %c0_i32_0 = arith.constant 0 : i32
    return %arg0, %c0_i32 : i32, i32
  }
  func.func @transform_1(%arg0: i32) -> (i32, i32) {
    %c0_i32 = arith.constant 0 : i32
    %c0_i32_0 = arith.constant 0 : i32
    %c0_i32_1 = arith.constant 0 : i32
    return %c0_i32, %c0_i32_0 : i32, i32
  }
  func.func @transform_2(%arg0: i32) -> (i32, i32) {
    %c0_i32 = arith.constant 0 : i32
    %c0_i32_0 = arith.constant 0 : i32
    return %arg0, %c0_i32 : i32, i32
  }
  func.func @transform_3(%arg0: i32) -> (i32, i32) {
    %c0_i32 = arith.constant 0 : i32
    %c0_i32_0 = arith.constant 0 : i32
    %c0_i32_1 = arith.constant 0 : i32
    return %c0_i32, %c0_i32_0 : i32, i32
  }
}

module attributes {stable_mosaic.version = 11 : i64} {
  func.func @_bn_relu_conv1x1_stats_kernel(%arg0: i32, %arg1: memref<128x4xbf16, #tpu.memory_space<vmem>>, %arg2: memref<2x4xf32, #tpu.memory_space<vmem>>, %arg3: memref<1x4xf32, #tpu.memory_space<vmem>>, %arg4: memref<1x4xf32, #tpu.memory_space<vmem>>, %arg5: memref<4x16xbf16, #tpu.memory_space<vmem>>, %arg6: memref<128x16xbf16, #tpu.memory_space<vmem>>, %arg7: memref<2x16xf32, #tpu.memory_space<vmem>>, %arg8: memref<2x16xf32, #tpu.memory_space<vmem>>) attributes {dimension_semantics = [#tpu.dimension_semantics<arbitrary>], iteration_bounds = array<i64: 4>, scalar_prefetch = 0 : i64, scratch_operands = 1 : i64, tpu.core_type = #tpu.core_type<tc>, window_params = [{transform_indices = @transform_0, window_bounds = array<i64: 128, 4>}, {pipeline_mode = #tpu.pipeline_mode<synchronous>, transform_indices = @transform_1, window_bounds = array<i64: 2, 4>}, {pipeline_mode = #tpu.pipeline_mode<synchronous>, transform_indices = @transform_2, window_bounds = array<i64: 1, 4>}, {pipeline_mode = #tpu.pipeline_mode<synchronous>, transform_indices = @transform_3, window_bounds = array<i64: 1, 4>}, {pipeline_mode = #tpu.pipeline_mode<synchronous>, transform_indices = @transform_4, window_bounds = array<i64: 4, 16>}, {transform_indices = @transform_5, window_bounds = array<i64: 128, 16>}, {pipeline_mode = #tpu.pipeline_mode<synchronous>, transform_indices = @transform_6, window_bounds = array<i64: 2, 16>}]} {
    %c0_i32 = arith.constant 0 : i32
    %0 = arith.cmpi eq, %arg0, %c0_i32 : i32
    %1 = arith.extui %0 : i1 to i32
    %c0_i32_0 = arith.constant 0 : i32
    %2 = arith.cmpi ne, %1, %c0_i32_0 : i32
    scf.if %2 {
      %cst_23 = arith.constant 0.000000e+00 : f32
      %38 = vector.broadcast %cst_23 : f32 to vector<2x16xf32>
      %c0_24 = arith.constant 0 : index
      %c0_25 = arith.constant 0 : index
      %39 = vector.load %arg8[%c0_24, %c0_25] : memref<2x16xf32, #tpu.memory_space<vmem>>, vector<2x16xf32>
      tpu.vector_store %arg8[%c0_24, %c0_25], %38 {strides = array<i32>} : memref<2x16xf32, #tpu.memory_space<vmem>>, vector<2x16xf32>,
    } else {
    }
    %c0 = arith.constant 0 : index
    %c0_1 = arith.constant 0 : index
    %3 = vector.load %arg1[%c0, %c0_1] : memref<128x4xbf16, #tpu.memory_space<vmem>>, vector<128x4xbf16>
    %4 = arith.extf %3 : vector<128x4xbf16> to vector<128x4xf32>
    %c0_2 = arith.constant 0 : index
    %c0_3 = arith.constant 0 : index
    %5 = vector.load %arg2[%c0_2, %c0_3] : memref<2x4xf32, #tpu.memory_space<vmem>>, vector<2x4xf32>
    %c0_4 = arith.constant 0 : index
    %c0_5 = arith.constant 0 : index
    %6 = vector.load %arg3[%c0_4, %c0_5] : memref<1x4xf32, #tpu.memory_space<vmem>>, vector<1x4xf32>
    %c0_6 = arith.constant 0 : index
    %c0_7 = arith.constant 0 : index
    %7 = vector.load %arg4[%c0_6, %c0_7] : memref<1x4xf32, #tpu.memory_space<vmem>>, vector<1x4xf32>
    %8 = vector.extract_strided_slice %5 {offsets = [0, 0], sizes = [1, 4], strides = [1, 1]} : vector<2x4xf32> to vector<1x4xf32>
    %9 = vector.extract_strided_slice %5 {offsets = [1, 0], sizes = [1, 4], strides = [1, 1]} : vector<2x4xf32> to vector<1x4xf32>
    %10 = vector.broadcast %8 : vector<1x4xf32> to vector<128x4xf32>
    %11 = arith.subf %4, %10 : vector<128x4xf32>
    %12 = arith.mulf %9, %6 : vector<1x4xf32>
    %13 = vector.broadcast %12 : vector<1x4xf32> to vector<128x4xf32>
    %14 = arith.mulf %11, %13 : vector<128x4xf32>
    %15 = vector.broadcast %7 : vector<1x4xf32> to vector<128x4xf32>
    %16 = arith.addf %14, %15 : vector<128x4xf32>
    %cst = arith.constant 0.000000e+00 : f32
    %17 = vector.broadcast %cst : f32 to vector<128x4xf32>
    %18 = arith.maximumf %16, %17 : vector<128x4xf32>
    %19 = arith.truncf %18 : vector<128x4xf32> to vector<128x4xbf16>
    %c0_8 = arith.constant 0 : index
    %c0_9 = arith.constant 0 : index
    %20 = vector.load %arg5[%c0_8, %c0_9] : memref<4x16xbf16, #tpu.memory_space<vmem>>, vector<4x16xbf16>
    %cst_10 = arith.constant dense<0.000000e+00> : vector<128x16xf32>
    %21 = tpu.matmul %19, %20, %cst_10 {dimension_numbers = #tpu.dot_dimension_numbers<[1], [0], [0], [1], [0, 0, 1, 1], [], []>} : vector<128x4xbf16>, vector<4x16xbf16>, vector<128x16xf32> -> vector<128x16xf32>
    %c0_11 = arith.constant 0 : index
    %c0_12 = arith.constant 0 : index
    %22 = vector.load %arg8[%c0_11, %c0_12] : memref<2x16xf32, #tpu.memory_space<vmem>>, vector<1x16xf32>
    %cst_13 = arith.constant dense<0.000000e+00> : vector<16xf32>
    %23 = vector.multi_reduction <add>, %21, %cst_13 [0] : vector<128x16xf32> to vector<16xf32>
    %24 = vector.shape_cast %23 : vector<16xf32> to vector<1x16xf32>
    %25 = arith.addf %22, %24 : vector<1x16xf32>
    %c0_14 = arith.constant 0 : index
    %c0_15 = arith.constant 0 : index
    %26 = vector.load %arg8[%c0_14, %c0_15] : memref<2x16xf32, #tpu.memory_space<vmem>>, vector<1x16xf32>
    tpu.vector_store %arg8[%c0_14, %c0_15], %25 {strides = array<i32>} : memref<2x16xf32, #tpu.memory_space<vmem>>, vector<1x16xf32>,
    %c1 = arith.constant 1 : index
    %c0_16 = arith.constant 0 : index
    %27 = vector.load %arg8[%c1, %c0_16] : memref<2x16xf32, #tpu.memory_space<vmem>>, vector<1x16xf32>
    %28 = arith.mulf %21, %21 : vector<128x16xf32>
    %cst_17 = arith.constant dense<0.000000e+00> : vector<16xf32>
    %29 = vector.multi_reduction <add>, %28, %cst_17 [0] : vector<128x16xf32> to vector<16xf32>
    %30 = vector.shape_cast %29 : vector<16xf32> to vector<1x16xf32>
    %31 = arith.addf %27, %30 : vector<1x16xf32>
    %c1_18 = arith.constant 1 : index
    %c0_19 = arith.constant 0 : index
    %32 = vector.load %arg8[%c1_18, %c0_19] : memref<2x16xf32, #tpu.memory_space<vmem>>, vector<1x16xf32>
    tpu.vector_store %arg8[%c1_18, %c0_19], %31 {strides = array<i32>} : memref<2x16xf32, #tpu.memory_space<vmem>>, vector<1x16xf32>,
    %33 = arith.truncf %21 : vector<128x16xf32> to vector<128x16xbf16>
    %c0_20 = arith.constant 0 : index
    %c0_21 = arith.constant 0 : index
    %34 = vector.load %arg6[%c0_20, %c0_21] : memref<128x16xbf16, #tpu.memory_space<vmem>>, vector<128x16xbf16>
    tpu.vector_store %arg6[%c0_20, %c0_21], %33 {strides = array<i32>} : memref<128x16xbf16, #tpu.memory_space<vmem>>, vector<128x16xbf16>,
    %c3_i32 = arith.constant 3 : i32
    %35 = arith.cmpi eq, %arg0, %c3_i32 : i32
    %36 = arith.extui %35 : i1 to i32
    %c0_i32_22 = arith.constant 0 : i32
    %37 = arith.cmpi ne, %36, %c0_i32_22 : i32
    scf.if %37 {
      %c0_23 = arith.constant 0 : index
      %c0_24 = arith.constant 0 : index
      %38 = vector.load %arg8[%c0_23, %c0_24] : memref<2x16xf32, #tpu.memory_space<vmem>>, vector<1x16xf32>
      %cst_25 = arith.constant 0.001953125 : f32
      %39 = vector.broadcast %cst_25 : f32 to vector<1x16xf32>
      %40 = arith.mulf %38, %39 : vector<1x16xf32>
      %c1_26 = arith.constant 1 : index
      %c0_27 = arith.constant 0 : index
      %41 = vector.load %arg8[%c1_26, %c0_27] : memref<2x16xf32, #tpu.memory_space<vmem>>, vector<1x16xf32>
      %cst_28 = arith.constant 0.001953125 : f32
      %42 = vector.broadcast %cst_28 : f32 to vector<1x16xf32>
      %43 = arith.mulf %41, %42 : vector<1x16xf32>
      %44 = arith.mulf %40, %40 : vector<1x16xf32>
      %45 = arith.subf %43, %44 : vector<1x16xf32>
      %c0_29 = arith.constant 0 : index
      %c0_30 = arith.constant 0 : index
      %46 = vector.load %arg7[%c0_29, %c0_30] : memref<2x16xf32, #tpu.memory_space<vmem>>, vector<1x16xf32>
      tpu.vector_store %arg7[%c0_29, %c0_30], %40 {strides = array<i32>} : memref<2x16xf32, #tpu.memory_space<vmem>>, vector<1x16xf32>,
      %cst_31 = arith.constant 9.99999974E-6 : f32
      %47 = vector.broadcast %cst_31 : f32 to vector<1x16xf32>
      %48 = arith.addf %45, %47 : vector<1x16xf32>
      %49 = math.rsqrt %48 : vector<1x16xf32>
      %c1_32 = arith.constant 1 : index
      %c0_33 = arith.constant 0 : index
      %50 = vector.load %arg7[%c1_32, %c0_33] : memref<2x16xf32, #tpu.memory_space<vmem>>, vector<1x16xf32>
      tpu.vector_store %arg7[%c1_32, %c0_33], %49 {strides = array<i32>} : memref<2x16xf32, #tpu.memory_space<vmem>>, vector<1x16xf32>,
    } else {
    }
    return
  }
  func.func @transform_0(%arg0: i32) -> (i32, i32) {
    %c0_i32 = arith.constant 0 : i32
    %c0_i32_0 = arith.constant 0 : i32
    return %arg0, %c0_i32 : i32, i32
  }
  func.func @transform_1(%arg0: i32) -> (i32, i32) {
    %c0_i32 = arith.constant 0 : i32
    %c0_i32_0 = arith.constant 0 : i32
    %c0_i32_1 = arith.constant 0 : i32
    return %c0_i32, %c0_i32_0 : i32, i32
  }
  func.func @transform_2(%arg0: i32) -> (i32, i32) {
    %c0_i32 = arith.constant 0 : i32
    %c0_i32_0 = arith.constant 0 : i32
    %c0_i32_1 = arith.constant 0 : i32
    return %c0_i32, %c0_i32_0 : i32, i32
  }
  func.func @transform_3(%arg0: i32) -> (i32, i32) {
    %c0_i32 = arith.constant 0 : i32
    %c0_i32_0 = arith.constant 0 : i32
    %c0_i32_1 = arith.constant 0 : i32
    return %c0_i32, %c0_i32_0 : i32, i32
  }
  func.func @transform_4(%arg0: i32) -> (i32, i32) {
    %c0_i32 = arith.constant 0 : i32
    %c0_i32_0 = arith.constant 0 : i32
    %c0_i32_1 = arith.constant 0 : i32
    return %c0_i32, %c0_i32_0 : i32, i32
  }
  func.func @transform_5(%arg0: i32) -> (i32, i32) {
    %c0_i32 = arith.constant 0 : i32
    %c0_i32_0 = arith.constant 0 : i32
    return %arg0, %c0_i32 : i32, i32
  }
  func.func @transform_6(%arg0: i32) -> (i32, i32) {
    %c0_i32 = arith.constant 0 : i32
    %c0_i32_0 = arith.constant 0 : i32
    %c0_i32_1 = arith.constant 0 : i32
    return %c0_i32, %c0_i32_0 : i32, i32
  }
}

module attributes {stable_mosaic.version = 11 : i64} {
  func.func @_bn_relu_conv3x3_stats_kernel(%arg0: i32, %arg1: memref<1x16x16x4xbf16, #tpu.memory_space<vmem>>, %arg2: memref<2x4xf32, #tpu.memory_space<vmem>>, %arg3: memref<1x4xf32, #tpu.memory_space<vmem>>, %arg4: memref<1x4xf32, #tpu.memory_space<vmem>>, %arg5: memref<9x4x4xbf16, #tpu.memory_space<vmem>>, %arg6: memref<1x16x16x4xbf16, #tpu.memory_space<vmem>>, %arg7: memref<2x4xf32, #tpu.memory_space<vmem>>, %arg8: memref<2x4xf32, #tpu.memory_space<vmem>>, %arg9: memref<18x18x4xbf16, #tpu.memory_space<vmem>>) attributes {dimension_semantics = [#tpu.dimension_semantics<arbitrary>], iteration_bounds = array<i64: 2>, scalar_prefetch = 0 : i64, scratch_operands = 2 : i64, tpu.core_type = #tpu.core_type<tc>, window_params = [{transform_indices = @transform_0, window_bounds = array<i64: 1, 16, 16, 4>}, {pipeline_mode = #tpu.pipeline_mode<synchronous>, transform_indices = @transform_1, window_bounds = array<i64: 2, 4>}, {pipeline_mode = #tpu.pipeline_mode<synchronous>, transform_indices = @transform_2, window_bounds = array<i64: 1, 4>}, {pipeline_mode = #tpu.pipeline_mode<synchronous>, transform_indices = @transform_3, window_bounds = array<i64: 1, 4>}, {pipeline_mode = #tpu.pipeline_mode<synchronous>, transform_indices = @transform_4, window_bounds = array<i64: 9, 4, 4>}, {transform_indices = @transform_5, window_bounds = array<i64: 1, 16, 16, 4>}, {pipeline_mode = #tpu.pipeline_mode<synchronous>, transform_indices = @transform_6, window_bounds = array<i64: 2, 4>}]} {
    %c0_i32 = arith.constant 0 : i32
    %0 = arith.cmpi eq, %arg0, %c0_i32 : i32
    %1 = arith.extui %0 : i1 to i32
    %c0_i32_0 = arith.constant 0 : i32
    %2 = arith.cmpi ne, %1, %c0_i32_0 : i32
    scf.if %2 {
      %cst_84 = arith.constant 0.000000e+00 : f32
      %97 = vector.broadcast %cst_84 : f32 to vector<2x4xf32>
      %c0_85 = arith.constant 0 : index
      %c0_86 = arith.constant 0 : index
      %98 = vector.load %arg8[%c0_85, %c0_86] : memref<2x4xf32, #tpu.memory_space<vmem>>, vector<2x4xf32>
      tpu.vector_store %arg8[%c0_85, %c0_86], %97 {strides = array<i32>} : memref<2x4xf32, #tpu.memory_space<vmem>>, vector<2x4xf32>,
      %cst_87 = arith.constant 0.000000e+00 : bf16
      %99 = vector.broadcast %cst_87 : bf16 to vector<18x18x4xbf16>
      %c0_88 = arith.constant 0 : index
      %c0_89 = arith.constant 0 : index
      %c0_90 = arith.constant 0 : index
      %100 = vector.load %arg9[%c0_88, %c0_89, %c0_90] : memref<18x18x4xbf16, #tpu.memory_space<vmem>>, vector<18x18x4xbf16>
      tpu.vector_store %arg9[%c0_88, %c0_89, %c0_90], %99 {strides = array<i32>} : memref<18x18x4xbf16, #tpu.memory_space<vmem>>, vector<18x18x4xbf16>,
    } else {
    }
    %c0 = arith.constant 0 : index
    %c0_1 = arith.constant 0 : index
    %c0_2 = arith.constant 0 : index
    %c0_3 = arith.constant 0 : index
    %3 = vector.load %arg1[%c0, %c0_1, %c0_2, %c0_3] : memref<1x16x16x4xbf16, #tpu.memory_space<vmem>>, vector<1x16x16x4xbf16>
    %4 = vector.shape_cast %3 : vector<1x16x16x4xbf16> to vector<16x16x4xbf16>
    %5 = arith.extf %4 : vector<16x16x4xbf16> to vector<16x16x4xf32>
    %c0_4 = arith.constant 0 : index
    %c0_5 = arith.constant 0 : index
    %6 = vector.load %arg2[%c0_4, %c0_5] : memref<2x4xf32, #tpu.memory_space<vmem>>, vector<2x4xf32>
    %c0_6 = arith.constant 0 : index
    %c0_7 = arith.constant 0 : index
    %7 = vector.load %arg3[%c0_6, %c0_7] : memref<1x4xf32, #tpu.memory_space<vmem>>, vector<1x4xf32>
    %c0_8 = arith.constant 0 : index
    %c0_9 = arith.constant 0 : index
    %8 = vector.load %arg4[%c0_8, %c0_9] : memref<1x4xf32, #tpu.memory_space<vmem>>, vector<1x4xf32>
    %9 = vector.extract_strided_slice %6 {offsets = [0, 0], sizes = [1, 4], strides = [1, 1]} : vector<2x4xf32> to vector<1x4xf32>
    %10 = vector.extract_strided_slice %6 {offsets = [1, 0], sizes = [1, 4], strides = [1, 1]} : vector<2x4xf32> to vector<1x4xf32>
    %11 = vector.shape_cast %9 : vector<1x4xf32> to vector<1x1x4xf32>
    %12 = vector.broadcast %11 : vector<1x1x4xf32> to vector<16x16x4xf32>
    %13 = arith.subf %5, %12 : vector<16x16x4xf32>
    %14 = arith.mulf %10, %7 : vector<1x4xf32>
    %15 = vector.shape_cast %14 : vector<1x4xf32> to vector<1x1x4xf32>
    %16 = vector.broadcast %15 : vector<1x1x4xf32> to vector<16x16x4xf32>
    %17 = arith.mulf %13, %16 : vector<16x16x4xf32>
    %18 = vector.shape_cast %8 : vector<1x4xf32> to vector<1x1x4xf32>
    %19 = vector.broadcast %18 : vector<1x1x4xf32> to vector<16x16x4xf32>
    %20 = arith.addf %17, %19 : vector<16x16x4xf32>
    %cst = arith.constant 0.000000e+00 : f32
    %21 = vector.broadcast %cst : f32 to vector<16x16x4xf32>
    %22 = arith.maximumf %20, %21 : vector<16x16x4xf32>
    %23 = arith.truncf %22 : vector<16x16x4xf32> to vector<16x16x4xbf16>
    %c1 = arith.constant 1 : index
    %c1_10 = arith.constant 1 : index
    %c0_11 = arith.constant 0 : index
    %24 = vector.load %arg9[%c1, %c1_10, %c0_11] : memref<18x18x4xbf16, #tpu.memory_space<vmem>>, vector<16x16x4xbf16>
    tpu.vector_store %arg9[%c1, %c1_10, %c0_11], %23 {strides = array<i32>} : memref<18x18x4xbf16, #tpu.memory_space<vmem>>, vector<16x16x4xbf16>,
    %cst_12 = arith.constant 0.000000e+00 : f32
    %25 = vector.broadcast %cst_12 : f32 to vector<256x4xf32>
    %c0_13 = arith.constant 0 : index
    %c0_14 = arith.constant 0 : index
    %c0_15 = arith.constant 0 : index
    %26 = vector.load %arg9[%c0_13, %c0_14, %c0_15] : memref<18x18x4xbf16, #tpu.memory_space<vmem>>, vector<16x16x4xbf16>
    %27 = vector.shape_cast %26 : vector<16x16x4xbf16> to vector<256x4xbf16>
    %c0_16 = arith.constant 0 : index
    %c0_17 = arith.constant 0 : index
    %c0_18 = arith.constant 0 : index
    %28 = vector.load %arg5[%c0_16, %c0_17, %c0_18] : memref<9x4x4xbf16, #tpu.memory_space<vmem>>, vector<1x4x4xbf16>
    %29 = vector.shape_cast %28 : vector<1x4x4xbf16> to vector<4x4xbf16>
    %cst_19 = arith.constant dense<0.000000e+00> : vector<256x4xf32>
    %30 = tpu.matmul %27, %29, %cst_19 {dimension_numbers = #tpu.dot_dimension_numbers<[1], [0], [0], [1], [0, 0, 1, 1], [], []>} : vector<256x4xbf16>, vector<4x4xbf16>, vector<256x4xf32> -> vector<256x4xf32>
    %31 = arith.addf %25, %30 : vector<256x4xf32>
    %c0_20 = arith.constant 0 : index
    %c1_21 = arith.constant 1 : index
    %c0_22 = arith.constant 0 : index
    %32 = vector.load %arg9[%c0_20, %c1_21, %c0_22] : memref<18x18x4xbf16, #tpu.memory_space<vmem>>, vector<16x16x4xbf16>
    %33 = vector.shape_cast %32 : vector<16x16x4xbf16> to vector<256x4xbf16>
    %c1_23 = arith.constant 1 : index
    %c0_24 = arith.constant 0 : index
    %c0_25 = arith.constant 0 : index
    %34 = vector.load %arg5[%c1_23, %c0_24, %c0_25] : memref<9x4x4xbf16, #tpu.memory_space<vmem>>, vector<1x4x4xbf16>
    %35 = vector.shape_cast %34 : vector<1x4x4xbf16> to vector<4x4xbf16>
    %cst_26 = arith.constant dense<0.000000e+00> : vector<256x4xf32>
    %36 = tpu.matmul %33, %35, %cst_26 {dimension_numbers = #tpu.dot_dimension_numbers<[1], [0], [0], [1], [0, 0, 1, 1], [], []>} : vector<256x4xbf16>, vector<4x4xbf16>, vector<256x4xf32> -> vector<256x4xf32>
    %37 = arith.addf %31, %36 : vector<256x4xf32>
    %c0_27 = arith.constant 0 : index
    %c2 = arith.constant 2 : index
    %c0_28 = arith.constant 0 : index
    %38 = vector.load %arg9[%c0_27, %c2, %c0_28] : memref<18x18x4xbf16, #tpu.memory_space<vmem>>, vector<16x16x4xbf16>
    %39 = vector.shape_cast %38 : vector<16x16x4xbf16> to vector<256x4xbf16>
    %c2_29 = arith.constant 2 : index
    %c0_30 = arith.constant 0 : index
    %c0_31 = arith.constant 0 : index
    %40 = vector.load %arg5[%c2_29, %c0_30, %c0_31] : memref<9x4x4xbf16, #tpu.memory_space<vmem>>, vector<1x4x4xbf16>
    %41 = vector.shape_cast %40 : vector<1x4x4xbf16> to vector<4x4xbf16>
    %cst_32 = arith.constant dense<0.000000e+00> : vector<256x4xf32>
    %42 = tpu.matmul %39, %41, %cst_32 {dimension_numbers = #tpu.dot_dimension_numbers<[1], [0], [0], [1], [0, 0, 1, 1], [], []>} : vector<256x4xbf16>, vector<4x4xbf16>, vector<256x4xf32> -> vector<256x4xf32>
    %43 = arith.addf %37, %42 : vector<256x4xf32>
    %c1_33 = arith.constant 1 : index
    %c0_34 = arith.constant 0 : index
    %c0_35 = arith.constant 0 : index
    %44 = vector.load %arg9[%c1_33, %c0_34, %c0_35] : memref<18x18x4xbf16, #tpu.memory_space<vmem>>, vector<16x16x4xbf16>
    %45 = vector.shape_cast %44 : vector<16x16x4xbf16> to vector<256x4xbf16>
    %c3 = arith.constant 3 : index
    %c0_36 = arith.constant 0 : index
    %c0_37 = arith.constant 0 : index
    %46 = vector.load %arg5[%c3, %c0_36, %c0_37] : memref<9x4x4xbf16, #tpu.memory_space<vmem>>, vector<1x4x4xbf16>
    %47 = vector.shape_cast %46 : vector<1x4x4xbf16> to vector<4x4xbf16>
    %cst_38 = arith.constant dense<0.000000e+00> : vector<256x4xf32>
    %48 = tpu.matmul %45, %47, %cst_38 {dimension_numbers = #tpu.dot_dimension_numbers<[1], [0], [0], [1], [0, 0, 1, 1], [], []>} : vector<256x4xbf16>, vector<4x4xbf16>, vector<256x4xf32> -> vector<256x4xf32>
    %49 = arith.addf %43, %48 : vector<256x4xf32>
    %c1_39 = arith.constant 1 : index
    %c1_40 = arith.constant 1 : index
    %c0_41 = arith.constant 0 : index
    %50 = vector.load %arg9[%c1_39, %c1_40, %c0_41] : memref<18x18x4xbf16, #tpu.memory_space<vmem>>, vector<16x16x4xbf16>
    %51 = vector.shape_cast %50 : vector<16x16x4xbf16> to vector<256x4xbf16>
    %c4 = arith.constant 4 : index
    %c0_42 = arith.constant 0 : index
    %c0_43 = arith.constant 0 : index
    %52 = vector.load %arg5[%c4, %c0_42, %c0_43] : memref<9x4x4xbf16, #tpu.memory_space<vmem>>, vector<1x4x4xbf16>
    %53 = vector.shape_cast %52 : vector<1x4x4xbf16> to vector<4x4xbf16>
    %cst_44 = arith.constant dense<0.000000e+00> : vector<256x4xf32>
    %54 = tpu.matmul %51, %53, %cst_44 {dimension_numbers = #tpu.dot_dimension_numbers<[1], [0], [0], [1], [0, 0, 1, 1], [], []>} : vector<256x4xbf16>, vector<4x4xbf16>, vector<256x4xf32> -> vector<256x4xf32>
    %55 = arith.addf %49, %54 : vector<256x4xf32>
    %c1_45 = arith.constant 1 : index
    %c2_46 = arith.constant 2 : index
    %c0_47 = arith.constant 0 : index
    %56 = vector.load %arg9[%c1_45, %c2_46, %c0_47] : memref<18x18x4xbf16, #tpu.memory_space<vmem>>, vector<16x16x4xbf16>
    %57 = vector.shape_cast %56 : vector<16x16x4xbf16> to vector<256x4xbf16>
    %c5 = arith.constant 5 : index
    %c0_48 = arith.constant 0 : index
    %c0_49 = arith.constant 0 : index
    %58 = vector.load %arg5[%c5, %c0_48, %c0_49] : memref<9x4x4xbf16, #tpu.memory_space<vmem>>, vector<1x4x4xbf16>
    %59 = vector.shape_cast %58 : vector<1x4x4xbf16> to vector<4x4xbf16>
    %cst_50 = arith.constant dense<0.000000e+00> : vector<256x4xf32>
    %60 = tpu.matmul %57, %59, %cst_50 {dimension_numbers = #tpu.dot_dimension_numbers<[1], [0], [0], [1], [0, 0, 1, 1], [], []>} : vector<256x4xbf16>, vector<4x4xbf16>, vector<256x4xf32> -> vector<256x4xf32>
    %61 = arith.addf %55, %60 : vector<256x4xf32>
    %c2_51 = arith.constant 2 : index
    %c0_52 = arith.constant 0 : index
    %c0_53 = arith.constant 0 : index
    %62 = vector.load %arg9[%c2_51, %c0_52, %c0_53] : memref<18x18x4xbf16, #tpu.memory_space<vmem>>, vector<16x16x4xbf16>
    %63 = vector.shape_cast %62 : vector<16x16x4xbf16> to vector<256x4xbf16>
    %c6 = arith.constant 6 : index
    %c0_54 = arith.constant 0 : index
    %c0_55 = arith.constant 0 : index
    %64 = vector.load %arg5[%c6, %c0_54, %c0_55] : memref<9x4x4xbf16, #tpu.memory_space<vmem>>, vector<1x4x4xbf16>
    %65 = vector.shape_cast %64 : vector<1x4x4xbf16> to vector<4x4xbf16>
    %cst_56 = arith.constant dense<0.000000e+00> : vector<256x4xf32>
    %66 = tpu.matmul %63, %65, %cst_56 {dimension_numbers = #tpu.dot_dimension_numbers<[1], [0], [0], [1], [0, 0, 1, 1], [], []>} : vector<256x4xbf16>, vector<4x4xbf16>, vector<256x4xf32> -> vector<256x4xf32>
    %67 = arith.addf %61, %66 : vector<256x4xf32>
    %c2_57 = arith.constant 2 : index
    %c1_58 = arith.constant 1 : index
    %c0_59 = arith.constant 0 : index
    %68 = vector.load %arg9[%c2_57, %c1_58, %c0_59] : memref<18x18x4xbf16, #tpu.memory_space<vmem>>, vector<16x16x4xbf16>
    %69 = vector.shape_cast %68 : vector<16x16x4xbf16> to vector<256x4xbf16>
    %c7 = arith.constant 7 : index
    %c0_60 = arith.constant 0 : index
    %c0_61 = arith.constant 0 : index
    %70 = vector.load %arg5[%c7, %c0_60, %c0_61] : memref<9x4x4xbf16, #tpu.memory_space<vmem>>, vector<1x4x4xbf16>
    %71 = vector.shape_cast %70 : vector<1x4x4xbf16> to vector<4x4xbf16>
    %cst_62 = arith.constant dense<0.000000e+00> : vector<256x4xf32>
    %72 = tpu.matmul %69, %71, %cst_62 {dimension_numbers = #tpu.dot_dimension_numbers<[1], [0], [0], [1], [0, 0, 1, 1], [], []>} : vector<256x4xbf16>, vector<4x4xbf16>, vector<256x4xf32> -> vector<256x4xf32>
    %73 = arith.addf %67, %72 : vector<256x4xf32>
    %c2_63 = arith.constant 2 : index
    %c2_64 = arith.constant 2 : index
    %c0_65 = arith.constant 0 : index
    %74 = vector.load %arg9[%c2_63, %c2_64, %c0_65] : memref<18x18x4xbf16, #tpu.memory_space<vmem>>, vector<16x16x4xbf16>
    %75 = vector.shape_cast %74 : vector<16x16x4xbf16> to vector<256x4xbf16>
    %c8 = arith.constant 8 : index
    %c0_66 = arith.constant 0 : index
    %c0_67 = arith.constant 0 : index
    %76 = vector.load %arg5[%c8, %c0_66, %c0_67] : memref<9x4x4xbf16, #tpu.memory_space<vmem>>, vector<1x4x4xbf16>
    %77 = vector.shape_cast %76 : vector<1x4x4xbf16> to vector<4x4xbf16>
    %cst_68 = arith.constant dense<0.000000e+00> : vector<256x4xf32>
    %78 = tpu.matmul %75, %77, %cst_68 {dimension_numbers = #tpu.dot_dimension_numbers<[1], [0], [0], [1], [0, 0, 1, 1], [], []>} : vector<256x4xbf16>, vector<4x4xbf16>, vector<256x4xf32> -> vector<256x4xf32>
    %79 = arith.addf %73, %78 : vector<256x4xf32>
    %c0_69 = arith.constant 0 : index
    %c0_70 = arith.constant 0 : index
    %80 = vector.load %arg8[%c0_69, %c0_70] : memref<2x4xf32, #tpu.memory_space<vmem>>, vector<1x4xf32>
    %cst_71 = arith.constant dense<0.000000e+00> : vector<4xf32>
    %81 = vector.multi_reduction <add>, %79, %cst_71 [0] : vector<256x4xf32> to vector<4xf32>
    %82 = vector.shape_cast %81 : vector<4xf32> to vector<1x4xf32>
    %83 = arith.addf %80, %82 : vector<1x4xf32>
    %c0_72 = arith.constant 0 : index
    %c0_73 = arith.constant 0 : index
    %84 = vector.load %arg8[%c0_72, %c0_73] : memref<2x4xf32, #tpu.memory_space<vmem>>, vector<1x4xf32>
    tpu.vector_store %arg8[%c0_72, %c0_73], %83 {strides = array<i32>} : memref<2x4xf32, #tpu.memory_space<vmem>>, vector<1x4xf32>,
    %c1_74 = arith.constant 1 : index
    %c0_75 = arith.constant 0 : index
    %85 = vector.load %arg8[%c1_74, %c0_75] : memref<2x4xf32, #tpu.memory_space<vmem>>, vector<1x4xf32>
    %86 = arith.mulf %79, %79 : vector<256x4xf32>
    %cst_76 = arith.constant dense<0.000000e+00> : vector<4xf32>
    %87 = vector.multi_reduction <add>, %86, %cst_76 [0] : vector<256x4xf32> to vector<4xf32>
    %88 = vector.shape_cast %87 : vector<4xf32> to vector<1x4xf32>
    %89 = arith.addf %85, %88 : vector<1x4xf32>
    %c1_77 = arith.constant 1 : index
    %c0_78 = arith.constant 0 : index
    %90 = vector.load %arg8[%c1_77, %c0_78] : memref<2x4xf32, #tpu.memory_space<vmem>>, vector<1x4xf32>
    tpu.vector_store %arg8[%c1_77, %c0_78], %89 {strides = array<i32>} : memref<2x4xf32, #tpu.memory_space<vmem>>, vector<1x4xf32>,
    %91 = vector.shape_cast %79 : vector<256x4xf32> to vector<1x16x16x4xf32>
    %92 = arith.truncf %91 : vector<1x16x16x4xf32> to vector<1x16x16x4xbf16>
    %c0_79 = arith.constant 0 : index
    %c0_80 = arith.constant 0 : index
    %c0_81 = arith.constant 0 : index
    %c0_82 = arith.constant 0 : index
    %93 = vector.load %arg6[%c0_79, %c0_80, %c0_81, %c0_82] : memref<1x16x16x4xbf16, #tpu.memory_space<vmem>>, vector<1x16x16x4xbf16>
    tpu.vector_store %arg6[%c0_79, %c0_80, %c0_81, %c0_82], %92 {strides = array<i32>} : memref<1x16x16x4xbf16, #tpu.memory_space<vmem>>, vector<1x16x16x4xbf16>,
    %c1_i32 = arith.constant 1 : i32
    %94 = arith.cmpi eq, %arg0, %c1_i32 : i32
    %95 = arith.extui %94 : i1 to i32
    %c0_i32_83 = arith.constant 0 : i32
    %96 = arith.cmpi ne, %95, %c0_i32_83 : i32
    scf.if %96 {
      %c0_84 = arith.constant 0 : index
      %c0_85 = arith.constant 0 : index
      %97 = vector.load %arg8[%c0_84, %c0_85] : memref<2x4xf32, #tpu.memory_space<vmem>>, vector<1x4xf32>
      %cst_86 = arith.constant 0.001953125 : f32
      %98 = vector.broadcast %cst_86 : f32 to vector<1x4xf32>
      %99 = arith.mulf %97, %98 : vector<1x4xf32>
      %c1_87 = arith.constant 1 : index
      %c0_88 = arith.constant 0 : index
      %100 = vector.load %arg8[%c1_87, %c0_88] : memref<2x4xf32, #tpu.memory_space<vmem>>, vector<1x4xf32>
      %cst_89 = arith.constant 0.001953125 : f32
      %101 = vector.broadcast %cst_89 : f32 to vector<1x4xf32>
      %102 = arith.mulf %100, %101 : vector<1x4xf32>
      %103 = arith.mulf %99, %99 : vector<1x4xf32>
      %104 = arith.subf %102, %103 : vector<1x4xf32>
      %c0_90 = arith.constant 0 : index
      %c0_91 = arith.constant 0 : index
      %105 = vector.load %arg7[%c0_90, %c0_91] : memref<2x4xf32, #tpu.memory_space<vmem>>, vector<1x4xf32>
      tpu.vector_store %arg7[%c0_90, %c0_91], %99 {strides = array<i32>} : memref<2x4xf32, #tpu.memory_space<vmem>>, vector<1x4xf32>,
      %cst_92 = arith.constant 9.99999974E-6 : f32
      %106 = vector.broadcast %cst_92 : f32 to vector<1x4xf32>
      %107 = arith.addf %104, %106 : vector<1x4xf32>
      %108 = math.rsqrt %107 : vector<1x4xf32>
      %c1_93 = arith.constant 1 : index
      %c0_94 = arith.constant 0 : index
      %109 = vector.load %arg7[%c1_93, %c0_94] : memref<2x4xf32, #tpu.memory_space<vmem>>, vector<1x4xf32>
      tpu.vector_store %arg7[%c1_93, %c0_94], %108 {strides = array<i32>} : memref<2x4xf32, #tpu.memory_space<vmem>>, vector<1x4xf32>,
    } else {
    }
    return
  }
  func.func @transform_0(%arg0: i32) -> (i32, i32, i32, i32) {
    %c0_i32 = arith.constant 0 : i32
    %c0_i32_0 = arith.constant 0 : i32
    %c0_i32_1 = arith.constant 0 : i32
    %c0_i32_2 = arith.constant 0 : i32
    return %arg0, %c0_i32, %c0_i32_0, %c0_i32_1 : i32, i32, i32, i32
  }
  func.func @transform_1(%arg0: i32) -> (i32, i32) {
    %c0_i32 = arith.constant 0 : i32
    %c0_i32_0 = arith.constant 0 : i32
    %c0_i32_1 = arith.constant 0 : i32
    return %c0_i32, %c0_i32_0 : i32, i32
  }
  func.func @transform_2(%arg0: i32) -> (i32, i32) {
    %c0_i32 = arith.constant 0 : i32
    %c0_i32_0 = arith.constant 0 : i32
    %c0_i32_1 = arith.constant 0 : i32
    return %c0_i32, %c0_i32_0 : i32, i32
  }
  func.func @transform_3(%arg0: i32) -> (i32, i32) {
    %c0_i32 = arith.constant 0 : i32
    %c0_i32_0 = arith.constant 0 : i32
    %c0_i32_1 = arith.constant 0 : i32
    return %c0_i32, %c0_i32_0 : i32, i32
  }
  func.func @transform_4(%arg0: i32) -> (i32, i32, i32) {
    %c0_i32 = arith.constant 0 : i32
    %c0_i32_0 = arith.constant 0 : i32
    %c0_i32_1 = arith.constant 0 : i32
    %c0_i32_2 = arith.constant 0 : i32
    return %c0_i32, %c0_i32_0, %c0_i32_1 : i32, i32, i32
  }
  func.func @transform_5(%arg0: i32) -> (i32, i32, i32, i32) {
    %c0_i32 = arith.constant 0 : i32
    %c0_i32_0 = arith.constant 0 : i32
    %c0_i32_1 = arith.constant 0 : i32
    %c0_i32_2 = arith.constant 0 : i32
    return %arg0, %c0_i32, %c0_i32_0, %c0_i32_1 : i32, i32, i32, i32
  }
  func.func @transform_6(%arg0: i32) -> (i32, i32) {
    %c0_i32 = arith.constant 0 : i32
    %c0_i32_0 = arith.constant 0 : i32
    %c0_i32_1 = arith.constant 0 : i32
    return %c0_i32, %c0_i32_0 : i32, i32
  }
}

module attributes {stable_mosaic.version = 11 : i64} {
  func.func @_bn_add_relu_kernel(%arg0: i32, %arg1: memref<128x16xbf16, #tpu.memory_space<vmem>>, %arg2: memref<2x16xf32, #tpu.memory_space<vmem>>, %arg3: memref<1x16xf32, #tpu.memory_space<vmem>>, %arg4: memref<1x16xf32, #tpu.memory_space<vmem>>, %arg5: memref<128x4xf32, #tpu.memory_space<vmem>>, %arg6: memref<128x16xf32, #tpu.memory_space<vmem>>) attributes {dimension_semantics = [#tpu.dimension_semantics<parallel>], iteration_bounds = array<i64: 4>, scalar_prefetch = 0 : i64, scratch_operands = 0 : i64, tpu.core_type = #tpu.core_type<tc>, window_params = [{transform_indices = @transform_0, window_bounds = array<i64: 128, 16>}, {pipeline_mode = #tpu.pipeline_mode<synchronous>, transform_indices = @transform_1, window_bounds = array<i64: 2, 16>}, {pipeline_mode = #tpu.pipeline_mode<synchronous>, transform_indices = @transform_2, window_bounds = array<i64: 1, 16>}, {pipeline_mode = #tpu.pipeline_mode<synchronous>, transform_indices = @transform_3, window_bounds = array<i64: 1, 16>}, {transform_indices = @transform_4, window_bounds = array<i64: 128, 4>}, {transform_indices = @transform_5, window_bounds = array<i64: 128, 16>}]} {
    %c0 = arith.constant 0 : index
    %c0_0 = arith.constant 0 : index
    %0 = vector.load %arg1[%c0, %c0_0] : memref<128x16xbf16, #tpu.memory_space<vmem>>, vector<128x16xbf16>
    %1 = arith.extf %0 : vector<128x16xbf16> to vector<128x16xf32>
    %c0_1 = arith.constant 0 : index
    %c0_2 = arith.constant 0 : index
    %2 = vector.load %arg2[%c0_1, %c0_2] : memref<2x16xf32, #tpu.memory_space<vmem>>, vector<1x16xf32>
    %3 = vector.broadcast %2 : vector<1x16xf32> to vector<128x16xf32>
    %4 = arith.subf %1, %3 : vector<128x16xf32>
    %c1 = arith.constant 1 : index
    %c0_3 = arith.constant 0 : index
    %5 = vector.load %arg2[%c1, %c0_3] : memref<2x16xf32, #tpu.memory_space<vmem>>, vector<1x16xf32>
    %c0_4 = arith.constant 0 : index
    %c0_5 = arith.constant 0 : index
    %6 = vector.load %arg3[%c0_4, %c0_5] : memref<1x16xf32, #tpu.memory_space<vmem>>, vector<1x16xf32>
    %7 = arith.mulf %5, %6 : vector<1x16xf32>
    %8 = vector.broadcast %7 : vector<1x16xf32> to vector<128x16xf32>
    %9 = arith.mulf %4, %8 : vector<128x16xf32>
    %c0_6 = arith.constant 0 : index
    %c0_7 = arith.constant 0 : index
    %10 = vector.load %arg4[%c0_6, %c0_7] : memref<1x16xf32, #tpu.memory_space<vmem>>, vector<1x16xf32>
    %11 = vector.broadcast %10 : vector<1x16xf32> to vector<128x16xf32>
    %12 = arith.addf %9, %11 : vector<128x16xf32>
    %c0_8 = arith.constant 0 : index
    %c0_9 = arith.constant 0 : index
    %13 = vector.load %arg5[%c0_8, %c0_9] : memref<128x4xf32, #tpu.memory_space<vmem>>, vector<128x4xf32>
    %cst = arith.constant 0.000000e+00 : f32
    %14 = vector.broadcast %cst : f32 to vector<128x16xf32>
    %15 = arith.maximumf %12, %14 : vector<128x16xf32>
    %c0_10 = arith.constant 0 : index
    %c0_11 = arith.constant 0 : index
    %16 = vector.load %arg6[%c0_10, %c0_11] : memref<128x16xf32, #tpu.memory_space<vmem>>, vector<128x16xf32>
    tpu.vector_store %arg6[%c0_10, %c0_11], %15 {strides = array<i32>} : memref<128x16xf32, #tpu.memory_space<vmem>>, vector<128x16xf32>,
    %17 = vector.extract_strided_slice %12 {offsets = [0, 0], sizes = [128, 4], strides = [1, 1]} : vector<128x16xf32> to vector<128x4xf32>
    %18 = arith.addf %17, %13 : vector<128x4xf32>
    %cst_12 = arith.constant 0.000000e+00 : f32
    %19 = vector.broadcast %cst_12 : f32 to vector<128x4xf32>
    %20 = arith.maximumf %18, %19 : vector<128x4xf32>
    %c0_13 = arith.constant 0 : index
    %c0_14 = arith.constant 0 : index
    %21 = vector.load %arg6[%c0_13, %c0_14] : memref<128x16xf32, #tpu.memory_space<vmem>>, vector<128x4xf32>
    tpu.vector_store %arg6[%c0_13, %c0_14], %20 {strides = array<i32>} : memref<128x16xf32, #tpu.memory_space<vmem>>, vector<128x4xf32>,
    return
  }
  func.func @transform_0(%arg0: i32) -> (i32, i32) {
    %c0_i32 = arith.constant 0 : i32
    %c0_i32_0 = arith.constant 0 : i32
    return %arg0, %c0_i32 : i32, i32
  }
  func.func @transform_1(%arg0: i32) -> (i32, i32) {
    %c0_i32 = arith.constant 0 : i32
    %c0_i32_0 = arith.constant 0 : i32
    %c0_i32_1 = arith.constant 0 : i32
    return %c0_i32, %c0_i32_0 : i32, i32
  }
  func.func @transform_2(%arg0: i32) -> (i32, i32) {
    %c0_i32 = arith.constant 0 : i32
    %c0_i32_0 = arith.constant 0 : i32
    %c0_i32_1 = arith.constant 0 : i32
    return %c0_i32, %c0_i32_0 : i32, i32
  }
  func.func @transform_3(%arg0: i32) -> (i32, i32) {
    %c0_i32 = arith.constant 0 : i32
    %c0_i32_0 = arith.constant 0 : i32
    %c0_i32_1 = arith.constant 0 : i32
    return %c0_i32, %c0_i32_0 : i32, i32
  }
  func.func @transform_4(%arg0: i32) -> (i32, i32) {
    %c0_i32 = arith.constant 0 : i32
    %c0_i32_0 = arith.constant 0 : i32
    return %arg0, %c0_i32 : i32, i32
  }
  func.func @transform_5(%arg0: i32) -> (i32, i32) {
    %c0_i32 = arith.constant 0 : i32
    %c0_i32_0 = arith.constant 0 : i32
    return %arg0, %c0_i32 : i32, i32
  }
}

</mosaic_0001>

<bundles_post_ra>
// kernel: bottleneck_forward.7
= control target key start
LH: loop header
LB: loop body
LE: loop exit
PB: predicated region body
PF: predicated region fallthrough
CT: control target
= control target key end

     0   :  { %s615_s18 = smov 0   ;;  %s835_s0 = inlined_call_operand.vmem [shape: bf16[512,16], index: 0, kind: input, shape index: {}]   ;;  %s836_s1 = inlined_call_operand.vmem [shape: f32[2,16], index: 1, kind: input, shape index: {}]   ;;  %s837_s2 = inlined_call_operand.vmem [shape: f32[1,16], index: 2, kind: input, shape index: {}]   ;;  %s838_s3 = inlined_call_operand.vmem [shape: f32[1,16], index: 3, kind: input, shape index: {}]   ;;  %s839_s4 = inlined_call_operand.vmem [shape: f32[512,4], index: 4, kind: input, shape index: {}]   ;;  %s840_s5 = inlined_call_operand.vmem [shape: f32[512,16], index: 5, kind: output, shape index: {}]  }
   0x1 LB: > { %s515_s19 = sadd.s32 4294967295, %s583_s18   ;;  %p519_p0 = scmp.ge.s32.totalorder %s583_s18, 1  ;;  %s583_s18 = sphi %s615_s18, %s15_s18  }
   0x2   : > { %p199_p1 = scmp.lt.s32.totalorder %s583_s18, 5 }
   0x4   : > { %p200_p2 = pnand %p519_p0, %p199_p1 }
   0x5   : > { %s520_s20 = sshll.u32 (!%p200_p2), %s515_s19, 4  ;;  %v303_v0 = vld [vmem:[%s836_s1 + $0x1] sm:$0x1] (!%p200_p2)  ;;  %v306_v1 = vlaneseq (!%p200_p2)  ;;  %v304_v2 = vld [vmem:[%s837_s2] sm:$0x1] (!%p200_p2)  ;;  %vm381_vm0 = vcmask (!%p200_p2), 130048  }
   0x6   : > { %203 = sbr.rel (%p200_p2) target bundleno = 50 (0x32), region = 40  ;;  %p233_p3 = scmp.lt.s32.totalorder (!%p200_p2), %s520_s20, 63  ;;  %v305_v4 = vmul.f32 (!%p200_p2), %v304_v2, %v303_v0  ;;  %v640_v6 = vld [vmem:[%s836_s1] ss:$0 sm:$0xff] (!%p200_p2)  ;;  %vm430_vm1 = vcmask (!%p200_p2), 31744  }
   0x7   : > { %v307_v3 = vshrl.u32 (!%p200_p2), %v306_v1, 7  ;;  %v655_v24 = vld [vmem:[%s838_s3] ss:$0 sm:$0xff] (!%p200_p2) }
   0x9   : > { %v308_v5 = vsub.s32 (!%p200_p2), 0, %v307_v3 }
   0xb   : > { %v643_v8 = vrot.slane (!%p200_p2), %v305_v4, %v308_v5 }
   0xd   : > { %s842_s20 = smov (!%p233_p3, %s520_s20), 63 }
   0xe   : > { %s521_s25 = sshll.u32 %s842_s20, 2  ;;  %s523_s8 = sshll.u32 %s842_s20, 3 }
   0xf   : > { %s635_s28 = scalar_lea.vmem %s835_s0, %s521_s25  ;;  %s687_s11 = scalar_lea.vmem %s840_s5, %s523_s8 }
  0x10   : > { %v531_v7 = vld [vmem:[%s635_s28] sm:$0xff]   ;;  %v562_v9 = vld [vmem:[%s635_s28 + $0x8] sm:$0xff]   ;;  %v563_v10 = vld [vmem:[%s635_s28 + $0x10] sm:$0xff]   ;;  %s738_s14 = scalar_lea.vmem %s839_s4, %s523_s8 }
  0x11   : > { %v532_v11 = vunpack.c.l.bf16 %v531_v7  ;;  %v533_v12 = vunpack.c.h.bf16 %v531_v7  ;;  %v536_v13 = vunpack.c.l.bf16 %v562_v9  ;;  %v537_v14 = vunpack.c.h.bf16 %v562_v9  ;;  %v564_v15 = vld [vmem:[%s635_s28 + $0x18] sm:$0xff]   ;;  %v565_v45 = vld [vmem:[%s635_s28 + $0x20] sm:$0xff]   ;;  %v566_v46 = vld [vmem:[%s635_s28 + $0x28] sm:$0xff]  }
  0x12   : > { %v540_v16 = vunpack.c.l.bf16 %v563_v10  ;;  %v541_v17 = vunpack.c.h.bf16 %v563_v10  ;;  %v544_v18 = vunpack.c.l.bf16 %v564_v15  ;;  %v545_v19 = vunpack.c.h.bf16 %v564_v15  ;;  %v567_v51 = vld [vmem:[%s635_s28 + $0x30] sm:$0xff]   ;;  %v568_v52 = vld [vmem:[%s635_s28 + $0x38] sm:$0xff]  }
  0x13   : > { %v287_v20 = vsub.f32 %v532_v11, %v640_v6  ;;  %v288_v21 = vsub.f32 %v533_v12, %v640_v6  ;;  %v289_v22 = vsub.f32 %v536_v13, %v640_v6  ;;  %v290_v23 = vsub.f32 %v537_v14, %v640_v6 }
  0x14   : > { %v291_v25 = vsub.f32 %v540_v16, %v640_v6  ;;  %v292_v26 = vsub.f32 %v541_v17, %v640_v6  ;;  %v293_v27 = vsub.f32 %v544_v18, %v640_v6  ;;  %v294_v28 = vsub.f32 %v545_v19, %v640_v6 }
  0x15   : > { %v310_v29 = vmul.f32 %v643_v8, %v287_v20  ;;  %v311_v30 = vmul.f32 %v643_v8, %v288_v21  ;;  %v312_v31 = vmul.f32 %v643_v8, %v289_v22  ;;  %v313_v32 = vmul.f32 %v643_v8, %v290_v23  ;;  %v349_v22 = vld [vmem:[%s738_s14] sm:$0xff]  ;;  %v350_v23 = vld [vmem:[%s738_s14 + $0x8] sm:$0xff] }
  0x16   : > { %v314_v33 = vmul.f32 %v643_v8, %v291_v25  ;;  %v315_v34 = vmul.f32 %v643_v8, %v292_v26  ;;  %v316_v35 = vmul.f32 %v643_v8, %v293_v27  ;;  %v317_v36 = vmul.f32 %v643_v8, %v294_v28  ;;  %v351_v25 = vld [vmem:[%s738_s14 + $0x10] sm:$0xff] }
  0x17   : > { %v671_v37 = vadd.f32 %v655_v24, %v310_v29  ;;  %v674_v38 = vadd.f32 %v655_v24, %v311_v30  ;;  %v677_v39 = vadd.f32 %v655_v24, %v312_v31  ;;  %v680_v40 = vadd.f32 %v655_v24, %v313_v32  ;;  %v352_v29 = vld [vmem:[%s738_s14 + $0x18] sm:$0xff]  ;;  %v353_v30 = vld [vmem:[%s738_s14 + $0x20] sm:$0xff]  ;;  %v354_v31 = vld [vmem:[%s738_s14 + $0x28] sm:$0xff] }
  0x18   : > { %v690_v41 = vadd.f32 %v655_v24, %v314_v33  ;;  %v693_v42 = vadd.f32 %v655_v24, %v315_v34  ;;  %v696_v43 = vadd.f32 %v655_v24, %v316_v35  ;;  %v699_v44 = vadd.f32 %v655_v24, %v317_v36  ;;  %v355_v36 = vld [vmem:[%s738_s14 + $0x30] sm:$0xff] }
  0x19   : > { %v365_v47 = vmax.f32 %v671_v37, 0.0  ;;  %v366_v48 = vmax.f32 %v674_v38, 0.0  ;;  %v367_v49 = vmax.f32 %v677_v39, 0.0  ;;  %v368_v50 = vmax.f32 %v680_v40, 0.0 }
  0x1a   : > { %v369_v53 = vmax.f32 %v690_v41, 0.0  ;;  %v370_v54 = vmax.f32 %v693_v42, 0.0  ;;  %v371_v55 = vmax.f32 %v696_v43, 0.0  ;;  %v372_v56 = vmax.f32 %v699_v44, 0.0 }
  0x1b   : > { %382 = vst.msk [vmem:[%s687_s11] sm:$0xff] %vm381_vm0, %v365_v47  ;;  %383 = vst.msk [vmem:[%s687_s11 + $0x8] sm:$0xff] %vm381_vm0, %v366_v48  ;;  %v548_v57 = vunpack.c.l.bf16 %v565_v45  ;;  %v549_v58 = vunpack.c.h.bf16 %v565_v45  ;;  %v552_v59 = vunpack.c.l.bf16 %v566_v46  ;;  %v553_v60 = vunpack.c.h.bf16 %v566_v46  ;;  %v356_v45 = vld [vmem:[%s738_s14 + $0x38] sm:$0xff] }
  0x1c   : > { %384 = vst.msk [vmem:[%s687_s11 + $0x10] sm:$0xff] %vm381_vm0, %v367_v49  ;;  %385 = vst.msk [vmem:[%s687_s11 + $0x18] sm:$0xff] %vm381_vm0, %v368_v50  ;;  %v556_v61 = vunpack.c.l.bf16 %v567_v51  ;;  %v557_v62 = vunpack.c.h.bf16 %v567_v51  ;;  %v560_v63 = vunpack.c.l.bf16 %v568_v52  ;;  %v561_v0 = vunpack.c.h.bf16 %v568_v52 }
  0x1d   : > { %386 = vst.msk [vmem:[%s687_s11 + $0x20] sm:$0xff] %vm381_vm0, %v369_v53  ;;  %387 = vst.msk [vmem:[%s687_s11 + $0x28] sm:$0xff] %vm381_vm0, %v370_v54  ;;  %v295_v1 = vsub.f32 %v548_v57, %v640_v6  ;;  %v296_v2 = vsub.f32 %v549_v58, %v640_v6  ;;  %v297_v3 = vsub.f32 %v552_v59, %v640_v6  ;;  %v357_v53 = vld [vmem:[%s738_s14 + $0x40] sm:$0xff]  ;;  %v358_v54 = vld [vmem:[%s738_s14 + $0x48] sm:$0xff] }
  0x1e   : > { %388 = vst.msk [vmem:[%s687_s11 + $0x30] sm:$0xff] %vm381_vm0, %v371_v55  ;;  %389 = vst.msk [vmem:[%s687_s11 + $0x38] sm:$0xff] %vm381_vm0, %v372_v56  ;;  %v298_v4 = vsub.f32 %v553_v60, %v640_v6  ;;  %v299_v5 = vsub.f32 %v556_v61, %v640_v6  ;;  %v300_v7 = vsub.f32 %v557_v62, %v640_v6  ;;  %v359_v55 = vld [vmem:[%s738_s14 + $0x50] sm:$0xff]  ;;  %v360_v56 = vld [vmem:[%s738_s14 + $0x58] sm:$0xff] }
  0x1f   : > { %v301_v9 = vsub.f32 %v560_v63, %v640_v6  ;;  %v302_v10 = vsub.f32 %v561_v0, %v640_v6  ;;  %v318_v11 = vmul.f32 %v643_v8, %v295_v1  ;;  %v319_v12 = vmul.f32 %v643_v8, %v296_v2  ;;  %v361_v57 = vld [vmem:[%s738_s14 + $0x60] sm:$0xff]  ;;  %v362_v58 = vld [vmem:[%s738_s14 + $0x68] sm:$0xff] }
  0x20   : > { %v320_v13 = vmul.f32 %v643_v8, %v297_v3  ;;  %v321_v14 = vmul.f32 %v643_v8, %v298_v4  ;;  %v322_v15 = vmul.f32 %v643_v8, %v299_v5  ;;  %v323_v16 = vmul.f32 %v643_v8, %v300_v7 }
  0x21   : > { %v324_v17 = vmul.f32 %v643_v8, %v301_v9  ;;  %v325_v6 = vmul.f32 %v643_v8, %v302_v10  ;;  %v341_v18 = vadd.f32 %v655_v24, %v318_v11  ;;  %v342_v19 = vadd.f32 %v655_v24, %v319_v12 }
  0x22   : > { %v343_v20 = vadd.f32 %v655_v24, %v320_v13  ;;  %v344_v21 = vadd.f32 %v655_v24, %v321_v14  ;;  %v345_v26 = vadd.f32 %v655_v24, %v322_v15  ;;  %v346_v27 = vadd.f32 %v655_v24, %v323_v16 }
  0x23   : > { %v347_v8 = vadd.f32 %v655_v24, %v324_v17  ;;  %v348_v28 = vadd.f32 %v655_v24, %v325_v6  ;;  %v373_v32 = vmax.f32 %v341_v18, 0.0  ;;  %v374_v33 = vmax.f32 %v342_v19, 0.0 }
  0x24   : > { %v375_v34 = vmax.f32 %v343_v20, 0.0  ;;  %v376_v35 = vmax.f32 %v344_v21, 0.0  ;;  %v377_v46 = vmax.f32 %v345_v26, 0.0  ;;  %v378_v47 = vmax.f32 %v346_v27, 0.0 }
  0x25   : > { %v379_v24 = vmax.f32 %v347_v8, 0.0  ;;  %v380_v48 = vmax.f32 %v348_v28, 0.0  ;;  %390 = vst.msk [vmem:[%s687_s11 + $0x40] sm:$0xff] %vm381_vm0, %v373_v32  ;;  %391 = vst.msk [vmem:[%s687_s11 + $0x48] sm:$0xff] %vm381_vm0, %v374_v33  ;;  %v398_v49 = vadd.f32 %v349_v22, %v671_v37  ;;  %v399_v50 = vadd.f32 %v350_v23, %v674_v38 }
  0x26   : > { %392 = vst.msk [vmem:[%s687_s11 + $0x50] sm:$0xff] %vm381_vm0, %v375_v34  ;;  %393 = vst.msk [vmem:[%s687_s11 + $0x58] sm:$0xff] %vm381_vm0, %v376_v35  ;;  %v400_v51 = vadd.f32 %v351_v25, %v677_v39  ;;  %v401_v52 = vadd.f32 %v352_v29, %v680_v40  ;;  %v402_v37 = vadd.f32 %v353_v30, %v690_v41  ;;  %v363_v41 = vld [vmem:[%s738_s14 + $0x70] sm:$0xff] }
  0x27   : > { %394 = vst.msk [vmem:[%s687_s11 + $0x60] sm:$0xff] %vm381_vm0, %v377_v46  ;;  %395 = vst.msk [vmem:[%s687_s11 + $0x68] sm:$0xff] %vm381_vm0, %v378_v47  ;;  %v403_v38 = vadd.f32 %v354_v31, %v693_v42  ;;  %v404_v39 = vadd.f32 %v355_v36, %v696_v43  ;;  %v405_v40 = vadd.f32 %v356_v45, %v699_v44  ;;  %v414_v59 = vmax.f32 %v398_v49, 0.0  ;;  %v364_v42 = vld [vmem:[%s738_s14 + $0x78] sm:$0xff] }
  0x28   : > { %396 = vst.msk [vmem:[%s687_s11 + $0x70] sm:$0xff] %vm381_vm0, %v379_v24  ;;  %397 = vst.msk [vmem:[%s687_s11 + $0x78] sm:$0xff] %vm381_vm0, %v380_v48  ;;  %v415_v60 = vmax.f32 %v399_v50, 0.0  ;;  %v416_v61 = vmax.f32 %v400_v51, 0.0  ;;  %v417_v62 = vmax.f32 %v401_v52, 0.0  ;;  %v418_v63 = vmax.f32 %v402_v37, 0.0 }
  0x29   : > { %v419_v43 = vmax.f32 %v403_v38, 0.0  ;;  %v420_v0 = vmax.f32 %v404_v39, 0.0  ;;  %v421_v1 = vmax.f32 %v405_v40, 0.0  ;;  %431 = vst.msk [vmem:[%s687_s11] sm:$0xff] %vm430_vm1, %v414_v59  ;;  %v406_v44 = vadd.f32 %v357_v53, %v341_v18 }
  0x2a   : > { %432 = vst.msk [vmem:[%s687_s11 + $0x8] sm:$0xff] %vm430_vm1, %v415_v60  ;;  %433 = vst.msk [vmem:[%s687_s11 + $0x10] sm:$0xff] %vm430_vm1, %v416_v61  ;;  %v407_v2 = vadd.f32 %v358_v54, %v342_v19  ;;  %v408_v3 = vadd.f32 %v359_v55, %v343_v20  ;;  %v409_v4 = vadd.f32 %v360_v56, %v344_v21 }
  0x2b   : > { %434 = vst.msk [vmem:[%s687_s11 + $0x18] sm:$0xff] %vm430_vm1, %v417_v62  ;;  %435 = vst.msk [vmem:[%s687_s11 + $0x20] sm:$0xff] %vm430_vm1, %v418_v63  ;;  %v410_v5 = vadd.f32 %v361_v57, %v345_v26  ;;  %v411_v7 = vadd.f32 %v362_v58, %v346_v27  ;;  %v412_v9 = vadd.f32 %v363_v41, %v347_v8  ;;  %v422_v11 = vmax.f32 %v406_v44, 0.0 }
  0x2c   : > { %436 = vst.msk [vmem:[%s687_s11 + $0x28] sm:$0xff] %vm430_vm1, %v419_v43  ;;  %437 = vst.msk [vmem:[%s687_s11 + $0x30] sm:$0xff] %vm430_vm1, %v420_v0  ;;  %v413_v10 = vadd.f32 %v364_v42, %v348_v28  ;;  %v423_v12 = vmax.f32 %v407_v2, 0.0  ;;  %v424_v13 = vmax.f32 %v408_v3, 0.0  ;;  %v425_v14 = vmax.f32 %v409_v4, 0.0 }
  0x2d   : > { %438 = vst.msk [vmem:[%s687_s11 + $0x38] sm:$0xff] %vm430_vm1, %v421_v1  ;;  %v426_v15 = vmax.f32 %v410_v5, 0.0  ;;  %v427_v16 = vmax.f32 %v411_v7, 0.0  ;;  %v428_v17 = vmax.f32 %v412_v9, 0.0  ;;  %439 = vst.msk [vmem:[%s687_s11 + $0x40] sm:$0xff] %vm430_vm1, %v422_v11 }
  0x2e   : > { %v429_v6 = vmax.f32 %v413_v10, 0.0  ;;  %440 = vst.msk [vmem:[%s687_s11 + $0x48] sm:$0xff] %vm430_vm1, %v423_v12  ;;  %441 = vst.msk [vmem:[%s687_s11 + $0x50] sm:$0xff] %vm430_vm1, %v424_v13 }
  0x2f   : > { %442 = vst.msk [vmem:[%s687_s11 + $0x58] sm:$0xff] %vm430_vm1, %v425_v14  ;;  %443 = vst.msk [vmem:[%s687_s11 + $0x60] sm:$0xff] %vm430_vm1, %v426_v15 }
  0x30   : > { %444 = vst.msk [vmem:[%s687_s11 + $0x68] sm:$0xff] %vm430_vm1, %v427_v16  ;;  %445 = vst.msk [vmem:[%s687_s11 + $0x70] sm:$0xff] %vm430_vm1, %v428_v17 }
  0x31   : > { %446 = vst.msk [vmem:[%s687_s11 + $0x78] sm:$0xff] %vm430_vm1, %v429_v6 }
  0x32 PF: > { %s15_s18 = sadd.s32 1, %s583_s18  }
  0x33   : > { %p12_p4 = scmp.ge.s32.totalorder %s15_s18, 6  }
  0x35   :  { %14 = sbr.rel (!%p12_p4) target bundleno = 1 (0x1), region = 73 }

// kernel: bottleneck_forward.4
= control target key start
LH: loop header
LB: loop body
LE: loop exit
PB: predicated region body
PF: predicated region fallthrough
CT: control target
= control target key end

     0   :  { %s756_s12 = smov 0   ;;  %s893_s0 = inlined_call_operand.vmem [shape: bf16[512,4], index: 0, kind: input, shape index: {}]   ;;  %s894_s1 = inlined_call_operand.vmem [shape: bf16[4,4], index: 1, kind: input, shape index: {}]   ;;  %s895_s2 = inlined_call_operand.vmem [shape: bf16[512,4], index: 2, kind: output, shape index: {0}]   ;;  %s896_s3 = inlined_call_operand.vmem [shape: f32[2,4], index: 3, kind: output, shape index: {1}]  }
   0x1 LB: > { %s762_s13 = sadd.s32 4294967295, %s733_s12   ;;  %p620_p0 = scmp.ge.s32.totalorder %s733_s12, 1  ;;  %s733_s12 = sphi %s756_s12, %s14_s12  }
   0x2   : > { %p136_p1 = scmp.lt.s32.totalorder %s733_s12, 5 }
   0x4   : > { %p137_p2 = pnand %p620_p0, %p136_p1 }
   0x5   : > { %s621_s14 = sshll.u32 (!%p137_p2), %s762_s13, 4  ;;  %p625_p4 = scmp.ne.s32.totalorder (!%p137_p2), %s762_s13, 0 }
   0x6   : > { %140 = sbr.rel (%p137_p2) target bundleno = 313 (0x139), region = 28  ;;  %p161_p3 = scmp.lt.s32.totalorder (!%p137_p2), %s621_s14, 63 }
   0xd   : > { %s898_s14 = smov (!%p161_p3, %s621_s14), 63  ;;  %176 = sbr.rel (%p625_p4) target bundleno = 20 (0x14), region = 32 }
   0xe   : > { %s622_s15 = sshll.u32 %s898_s14, 2  ;;  %vm177_vm0 = vcmask (!%p625_p4), 25600   ;;  %v735_v0 = vmov (!%p625_p4), 0.0  }
   0xf   : > { %s164_s18 = scalar_lea.vmem %s893_s0, %s622_s15  ;;  %s773_s21 = scalar_lea.vmem %s895_s2, %s622_s15  ;;  %178 = vst.msk [vmem:[#allocation2] sm:$0x3] (!%p625_p4), %vm177_vm0, %v735_v0 }
  0x14 PF: > { %v195_v1 = vld [vmem:[%s894_s1] sm:$0x3]  ;;  %vm261_vm1 = vcmask 1041408   ;;  %vm236_vm2 = vcmask 31744   ;;  %v718_v4 = vld [vmem:[%s164_s18 + $0x8] sm:$0xff]   ;;  %v719_v5 = vld [vmem:[%s164_s18 + $0x10] sm:$0xff]  }
  0x15   : > { %v717_v2 = vld [vmem:[%s164_s18] sm:$0xff]   ;;  %706 = vmatprep.subr.msk.bf16.mxu0 %vm261_vm1, %v195_v1  ;;  %v263_v3 = vsel %vm261_vm1, %v195_v1, 0  ;;  %707 = vmatprep.subr.msk.bf16.mxu1 %vm261_vm1, %v195_v1  ;;  %v722_v7 = vld [vmem:[%s164_s18 + $0x28] sm:$0xff]   ;;  %v723_v8 = vld [vmem:[%s164_s18 + $0x30] sm:$0xff]   ;;  %vm523_vm3 = vcmask 27648   ;;  %vm401_vm4 = vcmask 24576  }
  0x16   : > { %687 = vmatpush3.bf16.msra.mxu0 %v263_v3  ;;  %688 = vmatprep.mubr.msk.bf16.mxu0 %vm236_vm2, %v717_v2  ;;  %v721_v6 = vld [vmem:[%s164_s18 + $0x20] sm:$0xff]   ;;  %v720_v9 = vld [vmem:[%s164_s18 + $0x18] sm:$0xff]   ;;  %p658_p5 = scmp.ne.s32.totalorder %s762_s13, 3 }
  0x17   : > { %705 = vmatpush3.bf16.msra.mxu1 %v263_v3  ;;  %696 = vmatprep.mubr.msk.bf16.mxu1 %vm236_vm2, %v721_v6  ;;  %v724_v10 = vld [vmem:[%s164_s18 + $0x38] sm:$0xff]  }
  0x19   : > { %689 = vmatmul.mubr.msk.bf16.vlgmr.msra.gmra.mrb[0].mxu0 %vm236_vm2, %v718_v4 }
  0x1a   : > { %692 = vmatprep.mubr.msk.bf16.mxu0 %vm236_vm2, %v719_v5  ;;  %697 = vmatmul.mubr.msk.bf16.vlgmr.msra.gmra.mrb[0].mxu1 %vm236_vm2, %v722_v7 }
  0x1b   : > { %700 = vmatprep.mubr.msk.bf16.mxu1 %vm236_vm2, %v723_v8 }
  0x21   : > { %693 = vmatmul.mubr.msk.bf16.gmra.mrb[4].mxu0 %vm236_vm2, %v720_v9 }
  0x22   : > { %701 = vmatmul.mubr.msk.bf16.gmra.mrb[4].mxu1 %vm236_vm2, %v724_v10 }
  0xec   : > { %v690_v11 = vpop.f32.mrb[0].mxu0 }
  0xed   : > { %v663_v12 = vpack.c.bf16 %v690_v11, %v690_v11  ;;  %v299_v13 = vpop.f32.mrb[1].mxu0  ;;  %v406_v17 = vmul.f32 %v690_v11, %v690_v11  ;;  %v789_v20 = vpop.f32.mrb[0].mxu1  ;;  %v366_v29 = vsel %vm236_vm2, %v690_v11, 0.0 }
  0xee   : > { %v404_v14 = vmul.f32 %v299_v13, %v299_v13  ;;  %v661_v15 = vpack.c.bf16 %v299_v13, %v299_v13  ;;  %v691_v16 = vpop.f32.mrb[2].mxu0  ;;  %v363_v21 = vsel %vm236_vm2, %v299_v13, 0.0  ;;  %v331_v25 = vpop.f32.mrb[1].mxu1  ;;  %v671_v32 = vpack.c.bf16 %v789_v20, %v789_v20 }
  0xef   : > { %526 = vst.msk [vmem:[%s773_s21 + $0x8] sm:$0xf] %vm523_vm3, %v663_v12  ;;  %v664_v18 = vpack.c.bf16 %v691_v16, %v691_v16  ;;  %v302_v19 = vpop.f32.mrb[3].mxu0  ;;  %v407_v26 = vmul.f32 %v691_v16, %v691_v16  ;;  %v797_v28 = vpop.f32.mrb[2].mxu1  ;;  %v669_v36 = vpack.c.bf16 %v331_v25, %v331_v25  ;;  %v423_v37 = vsel %vm236_vm2, %v406_v17, 0.0 }
  0xf0   : > { %524 = vst.msk [vmem:[%s773_s21] sm:$0xf] %vm523_vm3, %v661_v15  ;;  %v364_v22 = vsel %vm236_vm2, %v302_v19, 0.0  ;;  %v405_v23 = vmul.f32 %v302_v19, %v302_v19  ;;  %v662_v24 = vpack.c.bf16 %v302_v19, %v302_v19  ;;  %v420_v30 = vsel %vm236_vm2, %v404_v14, 0.0  ;;  %v806_v33 = vpop.f32.mrb[3].mxu1 }
  0xf1   : > { %527 = vst.msk [vmem:[%s773_s21 + $0xc] sm:$0xf] %vm523_vm3, %v664_v18  ;;  %v365_v27 = vadd.f32 %v364_v22, %v363_v21  ;;  %534 = vst.msk [vmem:[%s773_s21 + $0x28] sm:$0xf] %vm523_vm3, %v671_v32  ;;  %v672_v39 = vpack.c.bf16 %v797_v28, %v797_v28  ;;  %v368_v40 = vsel %vm236_vm2, %v691_v16, 0.0  ;;  %v425_v41 = vsel %vm236_vm2, %v407_v26, 0.0 }
  0xf2   : > { %v421_v31 = vsel %vm236_vm2, %v405_v23, 0.0  ;;  %525 = vst.msk [vmem:[%s773_s21 + $0x4] sm:$0xf] %vm523_vm3, %v662_v24  ;;  %532 = vst.msk [vmem:[%s773_s21 + $0x20] sm:$0xf] %vm523_vm3, %v669_v36  ;;  %v412_v0 = vmul.f32 %v331_v25, %v331_v25  ;;  %v670_v5 = vpack.c.bf16 %v806_v33, %v806_v33  ;;  %v378_v11 = vsel %vm236_vm2, %v331_v25, 0.0 }
  0xf3   : > { %v367_v34 = vadd.f32 %v366_v29, %v365_v27  ;;  %v422_v35 = vadd.f32 %v421_v31, %v420_v30  ;;  %535 = vst.msk [vmem:[%s773_s21 + $0x2c] sm:$0xf] %vm523_vm3, %v672_v39  ;;  %v413_v17 = vmul.f32 %v806_v33, %v806_v33  ;;  %v414_v23 = vmul.f32 %v789_v20, %v789_v20 }
  0xf4   : > { %v694_v38 = vpop.f32.mrb[4].mxu0  ;;  %533 = vst.msk [vmem:[%s773_s21 + $0x24] sm:$0xf] %vm523_vm3, %v670_v5  ;;  %v435_v16 = vsel %vm236_vm2, %v412_v0, 0.0  ;;  %v380_v24 = vsel %vm236_vm2, %v806_v33, 0.0  ;;  %v382_v27 = vsel %vm236_vm2, %v789_v20, 0.0  ;;  %v415_v29 = vmul.f32 %v797_v28, %v797_v28 }
  0xf5   : > { %v424_v42 = vadd.f32 %v423_v37, %v422_v35  ;;  %v667_v43 = vpack.c.bf16 %v694_v38, %v694_v38  ;;  %v315_v44 = vpop.f32.mrb[5].mxu0  ;;  %v369_v45 = vadd.f32 %v368_v40, %v367_v34  ;;  %v822_v52 = vpop.f32.mrb[4].mxu1  ;;  %v410_v58 = vmul.f32 %v694_v38, %v694_v38 }
  0xf6   : > { %v370_v46 = vsel %vm236_vm2, %v315_v44, 0.0  ;;  %v408_v47 = vmul.f32 %v315_v44, %v315_v44  ;;  %v665_v48 = vpack.c.bf16 %v315_v44, %v315_v44  ;;  %v695_v49 = vpop.f32.mrb[6].mxu0  ;;  %v347_v57 = vpop.f32.mrb[5].mxu1  ;;  %v374_v2 = vsel %vm236_vm2, %v694_v38, 0.0 }
  0xf7   : > { %530 = vst.msk [vmem:[%s773_s21 + $0x18] sm:$0xf] %vm523_vm3, %v667_v43  ;;  %v426_v50 = vadd.f32 %v425_v41, %v424_v42  ;;  %v318_v51 = vpop.f32.mrb[7].mxu0  ;;  %v371_v53 = vadd.f32 %v370_v46, %v369_v45  ;;  %v668_v55 = vpack.c.bf16 %v695_v49, %v695_v49  ;;  %v703_v62 = vpop.f32.mrb[6].mxu1  ;;  %v411_v3 = vmul.f32 %v695_v49, %v695_v49 }
  0xf8   : > { %v427_v54 = vsel %vm236_vm2, %v408_v47, 0.0  ;;  %528 = vst.msk [vmem:[%s773_s21 + $0x10] sm:$0xf] %vm523_vm3, %v665_v48  ;;  %v372_v56 = vsel %vm236_vm2, %v318_v51, 0.0  ;;  %v409_v60 = vmul.f32 %v318_v51, %v318_v51  ;;  %v666_v61 = vpack.c.bf16 %v318_v51, %v318_v51  ;;  %v350_v1 = vpop.f32.mrb[7].mxu1 }
  0xf9   : > { %v428_v59 = vadd.f32 %v427_v54, %v426_v50  ;;  %531 = vst.msk [vmem:[%s773_s21 + $0x1c] sm:$0xf] %vm523_vm3, %v668_v55  ;;  %v373_v63 = vadd.f32 %v372_v56, %v371_v53  ;;  %v675_v8 = vpack.c.bf16 %v822_v52, %v822_v52  ;;  %v431_v9 = vsel %vm236_vm2, %v410_v58, 0.0 }
  0xfa   : > { %v429_v4 = vsel %vm236_vm2, %v409_v60, 0.0  ;;  %529 = vst.msk [vmem:[%s773_s21 + $0x14] sm:$0xf] %vm523_vm3, %v666_v61  ;;  %v376_v10 = vsel %vm236_vm2, %v695_v49, 0.0  ;;  %v673_v12 = vpack.c.bf16 %v347_v57, %v347_v57  ;;  %v433_v15 = vsel %vm236_vm2, %v411_v3, 0.0 }
  0xfb   : > { %v375_v6 = vadd.f32 %v374_v2, %v373_v63  ;;  %v430_v7 = vadd.f32 %v429_v4, %v428_v59  ;;  %538 = vst.msk [vmem:[%s773_s21 + $0x38] sm:$0xf] %vm523_vm3, %v675_v8  ;;  %v676_v18 = vpack.c.bf16 %v703_v62, %v703_v62  ;;  %v674_v22 = vpack.c.bf16 %v350_v1, %v350_v1  ;;  %v362_v3 = vld [vmem:[#allocation2] sm:$0x1] }
  0xfc   : > { %536 = vst.msk [vmem:[%s773_s21 + $0x30] sm:$0xf] %vm523_vm3, %v673_v12  ;;  %v437_v30 = vsel %vm236_vm2, %v413_v17, 0.0  ;;  %v416_v31 = vmul.f32 %v347_v57, %v347_v57  ;;  %v439_v35 = vsel %vm236_vm2, %v414_v23, 0.0  ;;  %v384_v33 = vsel %vm236_vm2, %v797_v28, 0.0 }
  0xfd   : > { %v432_v13 = vadd.f32 %v431_v9, %v430_v7  ;;  %v377_v14 = vadd.f32 %v376_v10, %v375_v6  ;;  %539 = vst.msk [vmem:[%s773_s21 + $0x3c] sm:$0xf] %vm523_vm3, %v676_v18  ;;  %537 = vst.msk [vmem:[%s773_s21 + $0x34] sm:$0xf] %vm523_vm3, %v674_v22  ;;  %v386_v36 = vsel %vm236_vm2, %v347_v57, 0.0  ;;  %v441_v39 = vsel %vm236_vm2, %v415_v29, 0.0 }
  0xfe   : > { %v443_v20 = vsel %vm236_vm2, %v416_v31, 0.0  ;;  %v417_v40 = vmul.f32 %v350_v1, %v350_v1  ;;  %v418_v43 = vmul.f32 %v822_v52, %v822_v52  ;;  %v388_v44 = vsel %vm236_vm2, %v350_v1, 0.0  ;;  %v403_v6 = vld [vmem:[#allocation2 + $0x1] sm:$0x1] }
  0xff   : > { %v379_v19 = vadd.f32 %v378_v11, %v377_v14  ;;  %v434_v21 = vadd.f32 %v433_v15, %v432_v13  ;;  %v390_v28 = vsel %vm236_vm2, %v822_v52, 0.0  ;;  %v419_v47 = vmul.f32 %v703_v62, %v703_v62 }
 0x100   : > { %v445_v48 = vsel %vm236_vm2, %v417_v40, 0.0  ;;  %v447_v51 = vsel %vm236_vm2, %v418_v43, 0.0  ;;  %v392_v53 = vsel %vm236_vm2, %v703_v62, 0.0 }
 0x101   : > { %v436_v25 = vadd.f32 %v435_v16, %v434_v21  ;;  %v381_v26 = vadd.f32 %v380_v24, %v379_v19  ;;  %v449_v56 = vsel %vm236_vm2, %v419_v47, 0.0 }
 0x103   : > { %v383_v32 = vadd.f32 %v382_v27, %v381_v26  ;;  %v438_v34 = vadd.f32 %v437_v30, %v436_v25 }
 0x105   : > { %v440_v37 = vadd.f32 %v439_v35, %v438_v34  ;;  %v385_v38 = vadd.f32 %v384_v33, %v383_v32 }
 0x107   : > { %v387_v41 = vadd.f32 %v386_v36, %v385_v38  ;;  %v442_v42 = vadd.f32 %v441_v39, %v440_v37 }
 0x109   : > { %v444_v45 = vadd.f32 %v443_v20, %v442_v42  ;;  %v389_v46 = vadd.f32 %v388_v44, %v387_v41 }
 0x10b   : > { %v391_v49 = vadd.f32 %v390_v28, %v389_v46  ;;  %v446_v50 = vadd.f32 %v445_v48, %v444_v45 }
 0x10d   : > { %v393_v54 = vadd.f32 %v392_v53, %v391_v49  ;;  %v448_v55 = vadd.f32 %v447_v51, %v446_v50 }
 0x10f   : > { %v394_v57 = vrot.slane %v393_v54, 4  ;;  %v450_v58 = vadd.f32 %v449_v56, %v448_v55 }
 0x111   : > { %v395_v59 = vadd.f32 %v394_v57, %v393_v54  ;;  %v451_v60 = vrot.slane %v450_v58, 4 }
 0x113   : > { %v396_v61 = vrot.slane %v395_v59, 2  ;;  %v452_v63 = vadd.f32 %v451_v60, %v450_v58 }
 0x115   : > { %v397_v52 = vadd.f32 %v396_v61, %v395_v59  ;;  %v453_v0 = vrot.slane %v452_v63, 2 }
 0x117   : > { %v398_v1 = vrot.slane %v397_v52, 1  ;;  %v454_v2 = vadd.f32 %v453_v0, %v452_v63 }
 0x119   : > { %v399_v4 = vadd.f32 %v398_v1, %v397_v52  ;;  %v455_v5 = vrot.slane %v454_v2, 1  ;;  %543 = sbr.rel (%p658_p5) target bundleno = 313 (0x139), region = 36 }
 0x11b   : > { %v400_v62 = vadd.f32 %v399_v4, %v362_v3  ;;  %v456_v7 = vadd.f32 %v455_v5, %v454_v2 }
 0x11d   : > { %402 = vst.msk [vmem:[#allocation2] sm:$0x1] %vm401_vm4, %v400_v62  ;;  %v457_v8 = vadd.f32 %v456_v7, %v403_v6 }
 0x11f   : > { %458 = vst.msk [vmem:[#allocation2 + $0x1] sm:$0x1] %vm401_vm4, %v457_v8 }
 0x124   : > { %v544_v9 = vld [vmem:[#allocation2] sm:$0x1] }
 0x125   : > { %v545_v11 = vmul.f32 0.001953125, %v544_v9 }
 0x126   : > { %v546_v10 = vld [vmem:[#allocation2 + $0x1] sm:$0x1] }
 0x127   : > { %v547_v12 = vmul.f32 0.001953125, %v546_v10  ;;  %v548_v13 = vmul.f32 %v545_v11, %v545_v11  ;;  %550 = vst.msk [vmem:[%s896_s3] sm:$0x1] %vm401_vm4, %v545_v11 }
 0x129   : > { %v549_v14 = vsub.f32 %v547_v12, %v548_v13 }
 0x12b   : > { %v551_v15 = vadd.f32 1e-05, %v549_v14 }
 0x12d   : > { %725 = vrsqrt.f32 %v551_v15 }
 0x137   : > { %v726_v16 = vpop.eup %725 }
 0x138   : > { %553 = vst.msk [vmem:[%s896_s3 + $0x1] sm:$0x1] %vm401_vm4, %v726_v16 }
 0x139 PF: > { %s14_s12 = sadd.s32 1, %s733_s12  }
 0x13a   : > { %p11_p6 = scmp.ge.s32.totalorder %s14_s12, 6  }
 0x13c   :  { %13 = sbr.rel (!%p11_p6) target bundleno = 1 (0x1), region = 74 }

// kernel: bottleneck_forward.6
= control target key start
LH: loop header
LB: loop body
LE: loop exit
PB: predicated region body
PF: predicated region fallthrough
CT: control target
= control target key end

     0   :  { %s950_s21 = smov 0   ;;  %s1125_s0 = inlined_call_operand.vmem [shape: bf16[512,4], index: 0, kind: input, shape index: {}]   ;;  %s1126_s1 = inlined_call_operand.vmem [shape: f32[2,4], index: 1, kind: input, shape index: {}]   ;;  %s1127_s2 = inlined_call_operand.vmem [shape: f32[1,4], index: 2, kind: input, shape index: {}]   ;;  %s1128_s3 = inlined_call_operand.vmem [shape: f32[1,4], index: 3, kind: input, shape index: {}]   ;;  %s1129_s4 = inlined_call_operand.vmem [shape: bf16[4,16], index: 4, kind: input, shape index: {}]   ;;  %s1130_s5 = inlined_call_operand.vmem [shape: bf16[512,16], index: 5, kind: output, shape index: {0}]   ;;  %s1131_s6 = inlined_call_operand.vmem [shape: f32[2,16], index: 6, kind: output, shape index: {1}]  }
   0x1 LB: > { %s956_s22 = sadd.s32 4294967295, %s912_s21   ;;  %p774_p0 = scmp.ge.s32.totalorder %s912_s21, 1  ;;  %s912_s21 = sphi %s950_s21, %s17_s21  }
   0x2   : > { %p211_p1 = scmp.lt.s32.totalorder %s912_s21, 5 }
   0x4   : > { %p212_p2 = pnand %p774_p0, %p211_p1 }
   0x5   : > { %s775_s23 = sshll.u32 (!%p212_p2), %s956_s22, 4  ;;  %p779_p4 = scmp.ne.s32.totalorder (!%p212_p2), %s956_s22, 0 }
   0x6   : > { %215 = sbr.rel (%p212_p2) target bundleno = 327 (0x147), region = 40  ;;  %p242_p3 = scmp.lt.s32.totalorder (!%p212_p2), %s775_s23, 63 }
   0xd   : > { %s1133_s23 = smov (!%p242_p3, %s775_s23), 63  ;;  %257 = sbr.rel (%p779_p4) target bundleno = 20 (0x14), region = 44 }
   0xe   : > { %s776_s24 = sshll.u32 %s1133_s23, 2  ;;  %vm258_vm0 = vcmask (!%p779_p4), 123904   ;;  %v914_v0 = vmov (!%p779_p4), 0.0  }
   0xf   : > { %s964_s27 = scalar_lea.vmem %s1125_s0, %s776_s24  ;;  %s969_s30 = scalar_lea.vmem %s1130_s5, %s776_s24  ;;  %259 = vst.msk [vmem:[#allocation2] sm:$0x3] (!%p779_p4), %vm258_vm0, %v914_v0 }
  0x14 PF: > { %v388_v1 = vld [vmem:[%s1129_s4] sm:$0x3]  ;;  %vm414_vm1 = vcmask 1041408   ;;  %v295_v4 = vlaneseq  ;;  %v857_v9 = vld [vmem:[%s964_s27 + $0x8] sm:$0xff]   ;;  %v858_v10 = vld [vmem:[%s964_s27 + $0x10] sm:$0xff]   ;;  %vm389_vm2 = vcmask 31744  }
  0x15   : > { %v826_v2 = vld [vmem:[%s964_s27] sm:$0xff]   ;;  %893 = vmatprep.subr.msk.bf16.mxu0 %vm414_vm1, %v388_v1  ;;  %v416_v5 = vsel %vm414_vm1, %v388_v1, 0  ;;  %894 = vmatprep.subr.msk.bf16.mxu1 %vm414_vm1, %v388_v1  ;;  %v859_v11 = vld [vmem:[%s964_s27 + $0x18] sm:$0xff]   ;;  %v831_v14 = vunpack.c.l.bf16 %v857_v9  ;;  %v832_v15 = vunpack.c.h.bf16 %v857_v9  ;;  %v861_v17 = vld [vmem:[%s964_s27 + $0x28] sm:$0xff]   ;;  %v835_v20 = vunpack.c.l.bf16 %v858_v10  ;;  %p806_p5 = scmp.ne.s32.totalorder %s956_s22, 3 }
  0x16   : > { %v292_v3 = vld [vmem:[%s1126_s1] sm:$0x3]  ;;  %874 = vmatpush3.bf16.msra.mxu0 %v416_v5  ;;  %v296_v7 = vshrl.u32 %v295_v4, 7  ;;  %892 = vmatpush3.bf16.msra.mxu1 %v416_v5  ;;  %v827_v12 = vunpack.c.l.bf16 %v826_v2  ;;  %v828_v13 = vunpack.c.h.bf16 %v826_v2  ;;  %v836_v21 = vunpack.c.h.bf16 %v858_v10  ;;  %v862_v22 = vld [vmem:[%s964_s27 + $0x30] sm:$0xff]   ;;  %v989_v23 = vld [vmem:[%s964_s27 + $0x38] sm:$0xff]  }
  0x17   : > { %v780_v6 = vld [vmem:[%s1127_s2] ss:$0 sm:$0xff]  ;;  %v839_v24 = vunpack.c.l.bf16 %v859_v11  ;;  %v840_v25 = vunpack.c.h.bf16 %v859_v11  ;;  %v847_v30 = vunpack.c.l.bf16 %v861_v17  ;;  %v848_v31 = vunpack.c.h.bf16 %v861_v17 }
  0x18   : > { %v321_v8 = vmul.f32 %v780_v6, %v292_v3  ;;  %v860_v16 = vld [vmem:[%s964_s27 + $0x20] sm:$0xff]   ;;  %v297_v18 = vsub.s32 0, %v296_v7  ;;  %v324_v19 = vsub.s32 1, %v296_v7  ;;  %v851_v32 = vunpack.c.l.bf16 %v862_v22 }
  0x19   : > { %v843_v26 = vunpack.c.l.bf16 %v860_v16  ;;  %v844_v27 = vunpack.c.h.bf16 %v860_v16  ;;  %v852_v33 = vunpack.c.h.bf16 %v862_v22  ;;  %v855_v34 = vunpack.c.l.bf16 %v989_v23  ;;  %v998_v40 = vld [vmem:[%s1128_s3] ss:$0 sm:$0xff] }
  0x1a   : > { %v298_v28 = vrot.slane %v292_v3, %v297_v18  ;;  %v991_v29 = vrot.slane %v321_v8, %v324_v19  ;;  %v856_v35 = vunpack.c.h.bf16 %v989_v23  ;;  %vm677_vm3 = vcmask 125952  }
  0x1b   : > { %vm516_vm4 = vcmask 130048   ;;  %vm555_vm5 = vcmask 122880  }
  0x1c   : > { %v299_v36 = vsub.f32 %v827_v12, %v298_v28  ;;  %v300_v37 = vsub.f32 %v828_v13, %v298_v28  ;;  %v301_v38 = vsub.f32 %v831_v14, %v298_v28  ;;  %v302_v39 = vsub.f32 %v832_v15, %v298_v28 }
  0x1d   : > { %v303_v41 = vsub.f32 %v835_v20, %v298_v28  ;;  %v304_v42 = vsub.f32 %v836_v21, %v298_v28  ;;  %v305_v43 = vsub.f32 %v839_v24, %v298_v28  ;;  %v306_v44 = vsub.f32 %v840_v25, %v298_v28 }
  0x1e   : > { %v326_v45 = vmul.f32 %v991_v29, %v299_v36  ;;  %v327_v46 = vmul.f32 %v991_v29, %v300_v37  ;;  %v328_v47 = vmul.f32 %v991_v29, %v301_v38  ;;  %v329_v48 = vmul.f32 %v991_v29, %v302_v39 }
  0x1f   : > { %v330_v49 = vmul.f32 %v991_v29, %v303_v41  ;;  %v331_v50 = vmul.f32 %v991_v29, %v304_v42  ;;  %v332_v51 = vmul.f32 %v991_v29, %v305_v43  ;;  %v333_v52 = vmul.f32 %v991_v29, %v306_v44 }
  0x20   : > { %v348_v53 = vadd.f32 %v998_v40, %v326_v45  ;;  %v349_v54 = vadd.f32 %v998_v40, %v327_v46  ;;  %v350_v55 = vadd.f32 %v998_v40, %v328_v47  ;;  %v351_v56 = vadd.f32 %v998_v40, %v329_v48 }
  0x21   : > { %v352_v57 = vadd.f32 %v998_v40, %v330_v49  ;;  %v353_v58 = vadd.f32 %v998_v40, %v331_v50  ;;  %v354_v59 = vadd.f32 %v998_v40, %v332_v51  ;;  %v355_v60 = vadd.f32 %v998_v40, %v333_v52 }
  0x22   : > { %v364_v61 = vmax.f32 %v348_v53, 0.0  ;;  %v365_v62 = vmax.f32 %v349_v54, 0.0  ;;  %v366_v63 = vmax.f32 %v350_v55, 0.0  ;;  %v367_v0 = vmax.f32 %v351_v56, 0.0 }
  0x23   : > { %v368_v1 = vmax.f32 %v352_v57, 0.0  ;;  %v369_v2 = vmax.f32 %v353_v58, 0.0  ;;  %v370_v3 = vmax.f32 %v354_v59, 0.0  ;;  %v371_v4 = vmax.f32 %v355_v60, 0.0 }
  0x24   : > { %v380_v5 = vpack.c.bf16 %v365_v62, %v364_v61  ;;  %v381_v6 = vpack.c.bf16 %v367_v0, %v366_v63  ;;  %v307_v7 = vsub.f32 %v843_v26, %v298_v28  ;;  %v308_v8 = vsub.f32 %v844_v27, %v298_v28 }
  0x25   : > { %v382_v9 = vpack.c.bf16 %v369_v2, %v368_v1  ;;  %v383_v10 = vpack.c.bf16 %v371_v4, %v370_v3  ;;  %v309_v11 = vsub.f32 %v847_v30, %v298_v28  ;;  %v310_v12 = vsub.f32 %v848_v31, %v298_v28 }
  0x26   : > { %875 = vmatprep.mubr.msk.bf16.mxu0 %vm389_vm2, %v380_v5  ;;  %v334_v13 = vmul.f32 %v991_v29, %v307_v7  ;;  %v335_v14 = vmul.f32 %v991_v29, %v308_v8  ;;  %v311_v15 = vsub.f32 %v851_v32, %v298_v28  ;;  %v312_v16 = vsub.f32 %v852_v33, %v298_v28 }
  0x27   : > { %876 = vmatmul.mubr.msk.bf16.vlgmr.msra.gmra.mrb[0].mxu0 %vm389_vm2, %v381_v6  ;;  %v336_v17 = vmul.f32 %v991_v29, %v309_v11  ;;  %v337_v18 = vmul.f32 %v991_v29, %v310_v12  ;;  %v313_v19 = vsub.f32 %v855_v34, %v298_v28  ;;  %v314_v20 = vsub.f32 %v856_v35, %v298_v28 }
  0x28   : > { %879 = vmatprep.mubr.msk.bf16.mxu0 %vm389_vm2, %v382_v9  ;;  %v356_v21 = vadd.f32 %v998_v40, %v334_v13  ;;  %v357_v22 = vadd.f32 %v998_v40, %v335_v14  ;;  %v338_v23 = vmul.f32 %v991_v29, %v311_v15  ;;  %v339_v24 = vmul.f32 %v991_v29, %v312_v16 }
  0x29   : > { %v358_v25 = vadd.f32 %v998_v40, %v336_v17  ;;  %v359_v26 = vadd.f32 %v998_v40, %v337_v18  ;;  %v340_v27 = vmul.f32 %v991_v29, %v313_v19  ;;  %v341_v30 = vmul.f32 %v991_v29, %v314_v20 }
  0x2a   : > { %v372_v31 = vmax.f32 %v356_v21, 0.0  ;;  %v373_v28 = vmax.f32 %v357_v22, 0.0  ;;  %v360_v32 = vadd.f32 %v998_v40, %v338_v23  ;;  %v361_v33 = vadd.f32 %v998_v40, %v339_v24 }
  0x2b   : > { %v374_v34 = vmax.f32 %v358_v25, 0.0  ;;  %v375_v35 = vmax.f32 %v359_v26, 0.0  ;;  %v362_v36 = vadd.f32 %v998_v40, %v340_v27  ;;  %v363_v37 = vadd.f32 %v998_v40, %v341_v30 }
  0x2c   : > { %v384_v38 = vpack.c.bf16 %v373_v28, %v372_v31  ;;  %v376_v39 = vmax.f32 %v360_v32, 0.0  ;;  %v377_v41 = vmax.f32 %v361_v33, 0.0 }
  0x2d   : > { %v385_v42 = vpack.c.bf16 %v375_v35, %v374_v34  ;;  %v378_v29 = vmax.f32 %v362_v36, 0.0  ;;  %v379_v44 = vmax.f32 %v363_v37, 0.0 }
  0x2e   : > { %883 = vmatprep.mubr.msk.bf16.mxu1 %vm389_vm2, %v384_v38  ;;  %v386_v43 = vpack.c.bf16 %v377_v41, %v376_v39 }
  0x2f   : > { %880 = vmatmul.mubr.msk.bf16.gmra.mrb[4].mxu0 %vm389_vm2, %v383_v10  ;;  %884 = vmatmul.mubr.msk.bf16.vlgmr.msra.gmra.mrb[0].mxu1 %vm389_vm2, %v385_v42  ;;  %v387_v45 = vpack.c.bf16 %v379_v44, %v378_v29 }
  0x30   : > { %887 = vmatprep.mubr.msk.bf16.mxu1 %vm389_vm2, %v386_v43 }
  0x37   : > { %888 = vmatmul.mubr.msk.bf16.gmra.mrb[4].mxu1 %vm389_vm2, %v387_v45 }
  0xfa   : > { %v877_v40 = vpop.f32.mrb[0].mxu0 }
  0xfb   : > { %v811_v46 = vpack.c.bf16 %v877_v40, %v877_v40  ;;  %v452_v47 = vpop.f32.mrb[1].mxu0  ;;  %v560_v51 = vmul.f32 %v877_v40, %v877_v40  ;;  %v520_v60 = vsel %vm516_vm4, %v877_v40, 0.0 }
  0xfc   : > { %v558_v48 = vmul.f32 %v452_v47, %v452_v47  ;;  %v809_v49 = vpack.c.bf16 %v452_v47, %v452_v47  ;;  %v878_v50 = vpop.f32.mrb[2].mxu0  ;;  %v517_v54 = vsel %vm516_vm4, %v452_v47, 0.0 }
  0xfd   : > { %680 = vst.msk [vmem:[%s969_s30 + $0x8] sm:$0xf] %vm677_vm3, %v811_v46  ;;  %v812_v52 = vpack.c.bf16 %v878_v50, %v878_v50  ;;  %v455_v53 = vpop.f32.mrb[3].mxu0  ;;  %v561_v58 = vmul.f32 %v878_v50, %v878_v50  ;;  %v577_v1 = vsel %vm516_vm4, %v560_v51, 0.0  ;;  %v522_v4 = vsel %vm516_vm4, %v878_v50, 0.0 }
  0xfe   : > { %678 = vst.msk [vmem:[%s969_s30] sm:$0xf] %vm677_vm3, %v809_v49  ;;  %v518_v55 = vsel %vm516_vm4, %v455_v53, 0.0  ;;  %v559_v56 = vmul.f32 %v455_v53, %v455_v53  ;;  %v810_v57 = vpack.c.bf16 %v455_v53, %v455_v53  ;;  %v574_v61 = vsel %vm516_vm4, %v558_v48, 0.0 }
  0xff   : > { %681 = vst.msk [vmem:[%s969_s30 + $0xc] sm:$0xf] %vm677_vm3, %v812_v52  ;;  %v519_v59 = vadd.f32 %v518_v55, %v517_v54  ;;  %v579_v5 = vsel %vm516_vm4, %v561_v58, 0.0 }
 0x100   : > { %v575_v62 = vsel %vm516_vm4, %v559_v56, 0.0  ;;  %679 = vst.msk [vmem:[%s969_s30 + $0x4] sm:$0xf] %vm677_vm3, %v810_v57 }
 0x101   : > { %v521_v63 = vadd.f32 %v520_v60, %v519_v59  ;;  %v576_v0 = vadd.f32 %v575_v62, %v574_v61 }
 0x102   : > { %v881_v2 = vpop.f32.mrb[4].mxu0  ;;  %v885_v3 = vpop.f32.mrb[0].mxu1 }
 0x103   : > { %v578_v6 = vadd.f32 %v577_v1, %v576_v0  ;;  %v815_v7 = vpack.c.bf16 %v881_v2, %v881_v2  ;;  %v468_v8 = vpop.f32.mrb[5].mxu0  ;;  %v484_v9 = vpop.f32.mrb[1].mxu1  ;;  %v523_v10 = vadd.f32 %v522_v4, %v521_v63  ;;  %v564_v23 = vmul.f32 %v881_v2, %v881_v2 }
 0x104   : > { %v524_v11 = vsel %vm516_vm4, %v468_v8, 0.0  ;;  %v562_v12 = vmul.f32 %v468_v8, %v468_v8  ;;  %v813_v13 = vpack.c.bf16 %v468_v8, %v468_v8  ;;  %v882_v14 = vpop.f32.mrb[6].mxu0  ;;  %v1057_v15 = vpop.f32.mrb[2].mxu1  ;;  %v528_v27 = vsel %vm516_vm4, %v881_v2, 0.0 }
 0x105   : > { %684 = vst.msk [vmem:[%s969_s30 + $0x18] sm:$0xf] %vm677_vm3, %v815_v7  ;;  %v580_v16 = vadd.f32 %v579_v5, %v578_v6  ;;  %v471_v17 = vpop.f32.mrb[7].mxu0  ;;  %v487_v18 = vpop.f32.mrb[3].mxu1  ;;  %v525_v19 = vadd.f32 %v524_v11, %v523_v10  ;;  %v816_v21 = vpack.c.bf16 %v882_v14, %v882_v14  ;;  %v819_v31 = vpack.c.bf16 %v885_v3, %v885_v3 }
 0x106   : > { %v581_v20 = vsel %vm516_vm4, %v562_v12, 0.0  ;;  %682 = vst.msk [vmem:[%s969_s30 + $0x10] sm:$0xf] %vm677_vm3, %v813_v13  ;;  %v526_v22 = vsel %vm516_vm4, %v471_v17, 0.0  ;;  %v563_v25 = vmul.f32 %v471_v17, %v471_v17  ;;  %v814_v26 = vpack.c.bf16 %v471_v17, %v471_v17 }
 0x107   : > { %v582_v24 = vadd.f32 %v581_v20, %v580_v16  ;;  %685 = vst.msk [vmem:[%s969_s30 + $0x1c] sm:$0xf] %vm677_vm3, %v816_v21  ;;  %v527_v30 = vadd.f32 %v526_v22, %v525_v19  ;;  %v565_v28 = vmul.f32 %v882_v14, %v882_v14  ;;  %v566_v33 = vmul.f32 %v484_v9, %v484_v9 }
 0x108   : > { %v583_v32 = vsel %vm516_vm4, %v563_v25, 0.0  ;;  %683 = vst.msk [vmem:[%s969_s30 + $0x14] sm:$0xf] %vm677_vm3, %v814_v26  ;;  %v817_v34 = vpack.c.bf16 %v484_v9, %v484_v9  ;;  %688 = vst.msk [vmem:[%s969_s30 + $0x28] sm:$0xf] %vm677_vm3, %v819_v31  ;;  %v585_v38 = vsel %vm516_vm4, %v564_v23, 0.0  ;;  %v820_v42 = vpack.c.bf16 %v1057_v15, %v1057_v15 }
 0x109   : > { %v529_v35 = vadd.f32 %v528_v27, %v527_v30  ;;  %v584_v36 = vadd.f32 %v583_v32, %v582_v24  ;;  %v530_v39 = vsel %vm516_vm4, %v882_v14, 0.0  ;;  %v532_v41 = vsel %vm516_vm4, %v484_v9, 0.0 }
 0x10a   : > { %v889_v37 = vpop.f32.mrb[4].mxu1  ;;  %686 = vst.msk [vmem:[%s969_s30 + $0x20] sm:$0xf] %vm677_vm3, %v817_v34  ;;  %v818_v45 = vpack.c.bf16 %v487_v18, %v487_v18  ;;  %v587_v46 = vsel %vm516_vm4, %v565_v28, 0.0  ;;  %v589_v47 = vsel %vm516_vm4, %v566_v33, 0.0  ;;  %v567_v48 = vmul.f32 %v487_v18, %v487_v18 }
 0x10b   : > { %v500_v43 = vpop.f32.mrb[5].mxu1  ;;  %v586_v29 = vadd.f32 %v585_v38, %v584_v36  ;;  %v531_v44 = vadd.f32 %v530_v39, %v529_v35  ;;  %689 = vst.msk [vmem:[%s969_s30 + $0x2c] sm:$0xf] %vm677_vm3, %v820_v42  ;;  %v823_v49 = vpack.c.bf16 %v889_v37, %v889_v37  ;;  %v568_v53 = vmul.f32 %v885_v3, %v885_v3 }
 0x10c   : > { %v890_v40 = vpop.f32.mrb[6].mxu1  ;;  %687 = vst.msk [vmem:[%s969_s30 + $0x24] sm:$0xf] %vm677_vm3, %v818_v45  ;;  %v534_v54 = vsel %vm516_vm4, %v487_v18, 0.0  ;;  %v821_v55 = vpack.c.bf16 %v500_v43, %v500_v43  ;;  %v536_v56 = vsel %vm516_vm4, %v885_v3, 0.0  ;;  %v569_v60 = vmul.f32 %v1057_v15, %v1057_v15 }
 0x10d   : > { %v503_v50 = vpop.f32.mrb[7].mxu1  ;;  %v533_v51 = vadd.f32 %v532_v41, %v531_v44  ;;  %v588_v52 = vadd.f32 %v587_v46, %v586_v29  ;;  %692 = vst.msk [vmem:[%s969_s30 + $0x38] sm:$0xf] %vm677_vm3, %v823_v49  ;;  %v824_v59 = vpack.c.bf16 %v890_v40, %v890_v40  ;;  %v591_v61 = vsel %vm516_vm4, %v567_v48, 0.0  ;;  %v557_v41 = vld [vmem:[#allocation2 + $0x1] sm:$0x1] }
 0x10e   : > { %v570_v62 = vmul.f32 %v500_v43, %v500_v43  ;;  %690 = vst.msk [vmem:[%s969_s30 + $0x30] sm:$0xf] %vm677_vm3, %v821_v55  ;;  %v822_v63 = vpack.c.bf16 %v503_v50, %v503_v50  ;;  %v593_v2 = vsel %vm516_vm4, %v568_v53, 0.0  ;;  %v538_v3 = vsel %vm516_vm4, %v1057_v15, 0.0 }
 0x10f   : > { %v590_v57 = vadd.f32 %v589_v47, %v588_v52  ;;  %v535_v58 = vadd.f32 %v534_v54, %v533_v51  ;;  %693 = vst.msk [vmem:[%s969_s30 + $0x3c] sm:$0xf] %vm677_vm3, %v824_v59  ;;  %v540_v4 = vsel %vm516_vm4, %v500_v43, 0.0  ;;  %v595_v7 = vsel %vm516_vm4, %v569_v60, 0.0 }
 0x110   : > { %691 = vst.msk [vmem:[%s969_s30 + $0x34] sm:$0xf] %vm677_vm3, %v822_v63  ;;  %v597_v8 = vsel %vm516_vm4, %v570_v62, 0.0  ;;  %v571_v9 = vmul.f32 %v503_v50, %v503_v50  ;;  %v572_v12 = vmul.f32 %v889_v37, %v889_v37  ;;  %v542_v13 = vsel %vm516_vm4, %v503_v50, 0.0 }
 0x111   : > { %v537_v0 = vadd.f32 %v536_v56, %v535_v58  ;;  %v592_v1 = vadd.f32 %v591_v61, %v590_v57  ;;  %v544_v15 = vsel %vm516_vm4, %v889_v37, 0.0  ;;  %v573_v17 = vmul.f32 %v890_v40, %v890_v40  ;;  %v515_v37 = vld [vmem:[#allocation2] sm:$0x1] }
 0x112   : > { %v599_v18 = vsel %vm516_vm4, %v571_v9, 0.0  ;;  %v601_v21 = vsel %vm516_vm4, %v572_v12, 0.0  ;;  %v546_v22 = vsel %vm516_vm4, %v890_v40, 0.0 }
 0x113   : > { %v594_v5 = vadd.f32 %v593_v2, %v592_v1  ;;  %v539_v6 = vadd.f32 %v538_v3, %v537_v0  ;;  %v603_v25 = vsel %vm516_vm4, %v573_v17, 0.0 }
 0x115   : > { %v541_v10 = vadd.f32 %v540_v4, %v539_v6  ;;  %v596_v11 = vadd.f32 %v595_v7, %v594_v5 }
 0x117   : > { %v598_v14 = vadd.f32 %v597_v8, %v596_v11  ;;  %v543_v16 = vadd.f32 %v542_v13, %v541_v10 }
 0x119   : > { %v545_v19 = vadd.f32 %v544_v15, %v543_v16  ;;  %v600_v20 = vadd.f32 %v599_v18, %v598_v14 }
 0x11b   : > { %v547_v23 = vadd.f32 %v546_v22, %v545_v19  ;;  %v602_v24 = vadd.f32 %v601_v21, %v600_v20 }
 0x11d   : > { %v548_v26 = vrot.slane %v547_v23, 4  ;;  %v604_v27 = vadd.f32 %v603_v25, %v602_v24 }
 0x11f   : > { %v549_v30 = vadd.f32 %v548_v26, %v547_v23  ;;  %v605_v31 = vrot.slane %v604_v27, 4 }
 0x121   : > { %v550_v28 = vrot.slane %v549_v30, 2  ;;  %v606_v32 = vadd.f32 %v605_v31, %v604_v27 }
 0x123   : > { %v551_v33 = vadd.f32 %v550_v28, %v549_v30  ;;  %v607_v34 = vrot.slane %v606_v32, 2 }
 0x125   : > { %v552_v35 = vrot.slane %v551_v33, 1  ;;  %v608_v36 = vadd.f32 %v607_v34, %v606_v32 }
 0x127   : > { %v553_v38 = vadd.f32 %v552_v35, %v551_v33  ;;  %v609_v39 = vrot.slane %v608_v36, 1  ;;  %697 = sbr.rel (%p806_p5) target bundleno = 327 (0x147), region = 48 }
 0x129   : > { %v554_v42 = vadd.f32 %v553_v38, %v515_v37  ;;  %v610_v43 = vadd.f32 %v609_v39, %v608_v36 }
 0x12b   : > { %556 = vst.msk [vmem:[#allocation2] sm:$0x1] %vm555_vm5, %v554_v42  ;;  %v611_v29 = vadd.f32 %v610_v43, %v557_v41 }
 0x12d   : > { %612 = vst.msk [vmem:[#allocation2 + $0x1] sm:$0x1] %vm555_vm5, %v611_v29 }
 0x132   : > { %v698_v44 = vld [vmem:[#allocation2] sm:$0x1] }
 0x133   : > { %v699_v40 = vmul.f32 0.001953125, %v698_v44 }
 0x134   : > { %v700_v45 = vld [vmem:[#allocation2 + $0x1] sm:$0x1] }
 0x135   : > { %v701_v46 = vmul.f32 0.001953125, %v700_v45  ;;  %v702_v47 = vmul.f32 %v699_v40, %v699_v40  ;;  %704 = vst.msk [vmem:[%s1131_s6] sm:$0x1] %vm555_vm5, %v699_v40 }
 0x137   : > { %v703_v48 = vsub.f32 %v701_v46, %v702_v47 }
 0x139   : > { %v705_v49 = vadd.f32 1e-05, %v703_v48 }
 0x13b   : > { %904 = vrsqrt.f32 %v705_v49 }
 0x145   : > { %v905_v50 = vpop.eup %904 }
 0x146   : > { %707 = vst.msk [vmem:[%s1131_s6 + $0x1] sm:$0x1] %vm555_vm5, %v905_v50 }
 0x147 PF: > { %s17_s21 = sadd.s32 1, %s912_s21  }
 0x148   : > { %p14_p6 = scmp.ge.s32.totalorder %s17_s21, 6  }
 0x14a   :  { %16 = sbr.rel (!%p14_p6) target bundleno = 1 (0x1), region = 86 }

// kernel: bottleneck_forward.5
= control target key start
LH: loop header
LB: loop body
LE: loop exit
PB: predicated region body
PF: predicated region fallthrough
CT: control target
= control target key end

     0   :  { %s7483_s21 = smov 0   ;;  %s9560_s0 = inlined_call_operand.vmem [shape: bf16[2,16,16,4], index: 0, kind: input, shape index: {}]   ;;  %s9561_s1 = inlined_call_operand.vmem [shape: f32[2,4], index: 1, kind: input, shape index: {}]   ;;  %s9562_s2 = inlined_call_operand.vmem [shape: f32[1,4], index: 2, kind: input, shape index: {}]   ;;  %s9563_s3 = inlined_call_operand.vmem [shape: f32[1,4], index: 3, kind: input, shape index: {}]   ;;  %s9564_s4 = inlined_call_operand.vmem [shape: bf16[9,4,4], index: 4, kind: input, shape index: {}]   ;;  %s9565_s5 = inlined_call_operand.vmem [shape: bf16[2,16,16,4], index: 5, kind: output, shape index: {0}]   ;;  %s9566_s6 = inlined_call_operand.vmem [shape: f32[2,4], index: 6, kind: output, shape index: {1}]  }
   0x1 LB: > { %s7489_s22 = sadd.s32 4294967295, %s7444_s21   ;;  %p6041_p0 = scmp.ge.s32.totalorder %s7444_s21, 1  ;;  %s7444_s21 = sphi %s7483_s21, %s17_s21  }
   0x2   : > { %p210_p1 = scmp.lt.s32.totalorder %s7444_s21, 3 }
   0x4   : > { %p211_p2 = pnand %p6041_p0, %p210_p1 }
   0x6   : > { %214 = sbr.rel (%p211_p2) target bundleno = 767 (0x2ff), region = 40 }
   0xd   : > { %p240_p3 = scmp.lt.s32.totalorder %s7489_s22, 1  ;;  %p6046_p4 = scmp.ne.s32.totalorder %s7489_s22, 0 }
   0xe   : > { %vm255_vm0 = vcmask (!%p6046_p4), 25600   ;;  %vm257_vm1 = vcmask (!%p6046_p4), 27648   ;;  %v7446_v0 = vmov (!%p6046_p4), 0.0   ;;  %v7447_v1 = vmov (!%p6046_p4), 0  }
   0xf   : > { %s241_s23 = scalar_select %p240_p3, %s7489_s22, 1 }
  0x10   : > { %254 = sbr.rel (%p6046_p4) target bundleno = 44 (0x2c), region = 44  ;;  %256 = vst.msk [vmem:[#allocation2] sm:$0x3] (!%p6046_p4), %vm255_vm0, %v7446_v0  ;;  %vm260_vm2 = vcmask (!%p6046_p4), 24576  }
  0x11   : > { %s6460_s24 = sshll.u32 %s241_s23, 7  ;;  %258 = vst.msk [vmem:[#allocation3] sm:$0xf] (!%p6046_p4), %vm257_vm1, %v7447_v1  ;;  %259 = vst.msk [vmem:[#allocation3 + $0x4] sm:$0xf] (!%p6046_p4), %vm257_vm1, %v7447_v1 }
  0x12   : > { %s7498_s27 = scalar_lea.vmem %s9560_s0, %s6460_s24  ;;  %s7503_s30 = scalar_lea.vmem %s9565_s5, %s6460_s24  ;;  %262 = vst.msk [vmem:[#allocation3 + $0xc] sm:$0xf] (!%p6046_p4), %vm257_vm1, %v7447_v1  ;;  %263 = vst.msk [vmem:[#allocation3 + $0x10] sm:$0xf] (!%p6046_p4), %vm257_vm1, %v7447_v1 }
  0x13   : > { %265 = vst.msk [vmem:[#allocation3 + $0x18] sm:$0xf] (!%p6046_p4), %vm257_vm1, %v7447_v1  ;;  %266 = vst.msk [vmem:[#allocation3 + $0x1c] sm:$0xf] (!%p6046_p4), %vm257_vm1, %v7447_v1 }
  0x14   : > { %268 = vst.msk [vmem:[#allocation3 + $0x24] sm:$0xf] (!%p6046_p4), %vm257_vm1, %v7447_v1  ;;  %269 = vst.msk [vmem:[#allocation3 + $0x28] sm:$0xf] (!%p6046_p4), %vm257_vm1, %v7447_v1 }
  0x15   : > { %271 = vst.msk [vmem:[#allocation3 + $0x30] sm:$0xf] (!%p6046_p4), %vm257_vm1, %v7447_v1  ;;  %272 = vst.msk [vmem:[#allocation3 + $0x34] sm:$0xf] (!%p6046_p4), %vm257_vm1, %v7447_v1 }
  0x16   : > { %274 = vst.msk [vmem:[#allocation3 + $0x3c] sm:$0xf] (!%p6046_p4), %vm257_vm1, %v7447_v1  ;;  %275 = vst.msk [vmem:[#allocation3 + $0x40] sm:$0xf] (!%p6046_p4), %vm257_vm1, %v7447_v1 }
  0x17   : > { %277 = vst.msk [vmem:[#allocation3 + $0x48] sm:$0xf] %vm257_vm1, %v7447_v1  ;;  %278 = vst.msk [vmem:[#allocation3 + $0x4c] sm:$0xf] %vm257_vm1, %v7447_v1 }
  0x18   : > { %280 = vst.msk [vmem:[#allocation3 + $0x54] sm:$0xf] %vm257_vm1, %v7447_v1  ;;  %281 = vst.msk [vmem:[#allocation3 + $0x58] sm:$0xf] %vm257_vm1, %v7447_v1 }
  0x19   : > { %283 = vst.msk [vmem:[#allocation3 + $0x60] sm:$0xf] %vm257_vm1, %v7447_v1  ;;  %284 = vst.msk [vmem:[#allocation3 + $0x64] sm:$0xf] %vm257_vm1, %v7447_v1 }
  0x1a   : > { %286 = vst.msk [vmem:[#allocation3 + $0x6c] sm:$0xf] %vm257_vm1, %v7447_v1  ;;  %287 = vst.msk [vmem:[#allocation3 + $0x70] sm:$0xf] %vm257_vm1, %v7447_v1 }
  0x1b   : > { %289 = vst.msk [vmem:[#allocation3 + $0x78] sm:$0xf] %vm257_vm1, %v7447_v1  ;;  %290 = vst.msk [vmem:[#allocation3 + $0x7c] sm:$0xf] %vm257_vm1, %v7447_v1 }
  0x1c   : > { %292 = vst.msk [vmem:[#allocation3 + $0x84] sm:$0xf] %vm257_vm1, %v7447_v1  ;;  %293 = vst.msk [vmem:[#allocation3 + $0x88] sm:$0xf] %vm257_vm1, %v7447_v1 }
  0x1d   : > { %295 = vst.msk [vmem:[#allocation3 + $0x90] sm:$0xf] %vm257_vm1, %v7447_v1  ;;  %296 = vst.msk [vmem:[#allocation3 + $0x94] sm:$0xf] %vm257_vm1, %v7447_v1 }
  0x1e   : > { %298 = vst.msk [vmem:[#allocation3 + $0x9c] sm:$0xf] %vm257_vm1, %v7447_v1  ;;  %299 = vst.msk [vmem:[#allocation3 + $0xa0] sm:$0xf] %vm257_vm1, %v7447_v1 }
  0x1f   : > { %301 = vst.msk [vmem:[#allocation3 + $0xa8] sm:$0xf] %vm257_vm1, %v7447_v1  ;;  %302 = vst.msk [vmem:[#allocation3 + $0xac] sm:$0xf] %vm257_vm1, %v7447_v1 }
  0x20   : > { %304 = vst.msk [vmem:[#allocation3 + $0xb4] sm:$0xf] %vm257_vm1, %v7447_v1  ;;  %305 = vst.msk [vmem:[#allocation3 + $0xb8] sm:$0xf] %vm257_vm1, %v7447_v1 }
  0x21   : > { %307 = vst.msk [vmem:[#allocation3 + $0xc0] sm:$0xf] %vm257_vm1, %v7447_v1  ;;  %308 = vst.msk [vmem:[#allocation3 + $0xc4] sm:$0xf] %vm257_vm1, %v7447_v1 }
  0x22   : > { %310 = vst.msk [vmem:[#allocation3 + $0xcc] sm:$0xf] %vm257_vm1, %v7447_v1  ;;  %311 = vst.msk [vmem:[#allocation3 + $0xd0] sm:$0xf] %vm257_vm1, %v7447_v1 }
  0x23   : > { %261 = vst.msk [vmem:[#allocation3 + $0x8] sm:$0x1] %vm260_vm2, %v7447_v1  ;;  %264 = vst.msk [vmem:[#allocation3 + $0x14] sm:$0x1] %vm260_vm2, %v7447_v1 }
  0x24   : > { %267 = vst.msk [vmem:[#allocation3 + $0x20] sm:$0x1] %vm260_vm2, %v7447_v1  ;;  %270 = vst.msk [vmem:[#allocation3 + $0x2c] sm:$0x1] %vm260_vm2, %v7447_v1 }
  0x25   : > { %273 = vst.msk [vmem:[#allocation3 + $0x38] sm:$0x1] %vm260_vm2, %v7447_v1  ;;  %276 = vst.msk [vmem:[#allocation3 + $0x44] sm:$0x1] %vm260_vm2, %v7447_v1 }
  0x26   : > { %279 = vst.msk [vmem:[#allocation3 + $0x50] sm:$0x1] %vm260_vm2, %v7447_v1  ;;  %282 = vst.msk [vmem:[#allocation3 + $0x5c] sm:$0x1] %vm260_vm2, %v7447_v1 }
  0x27   : > { %285 = vst.msk [vmem:[#allocation3 + $0x68] sm:$0x1] %vm260_vm2, %v7447_v1  ;;  %288 = vst.msk [vmem:[#allocation3 + $0x74] sm:$0x1] %vm260_vm2, %v7447_v1 }
  0x28   : > { %291 = vst.msk [vmem:[#allocation3 + $0x80] sm:$0x1] %vm260_vm2, %v7447_v1  ;;  %294 = vst.msk [vmem:[#allocation3 + $0x8c] sm:$0x1] %vm260_vm2, %v7447_v1 }
  0x29   : > { %297 = vst.msk [vmem:[#allocation3 + $0x98] sm:$0x1] %vm260_vm2, %v7447_v1  ;;  %300 = vst.msk [vmem:[#allocation3 + $0xa4] sm:$0x1] %vm260_vm2, %v7447_v1 }
  0x2a   : > { %303 = vst.msk [vmem:[#allocation3 + $0xb0] sm:$0x1] %vm260_vm2, %v7447_v1  ;;  %306 = vst.msk [vmem:[#allocation3 + $0xbc] sm:$0x1] %vm260_vm2, %v7447_v1 }
  0x2b   : > { %309 = vst.msk [vmem:[#allocation3 + $0xc8] sm:$0x1] %vm260_vm2, %v7447_v1  ;;  %312 = vst.msk [vmem:[#allocation3 + $0xd4] sm:$0x1] %vm260_vm2, %v7447_v1 }
  0x2c PF: > { %v6081_v2 = vld [vmem:[%s9564_s4 + $0x2] sm:$0x3]  ;;  %vm1602_vm3 = vcmask 1041408   ;;  %v6228_v3 = vld [vmem:[%s9564_s4 + $0x8] sm:$0x3]  ;;  %v380_v9 = vlaneseq  ;;  %v6591_v33 = vld [vmem:[%s7498_s27 + $0x10] sm:$0xff]  }
  0x2d   : > { %7322 = vmatprep.subr.msk.bf16.mxu1 %vm1602_vm3, %v6081_v2  ;;  %7326 = vmatprep.subr.msk.bf16.mxu0 %vm1602_vm3, %v6228_v3  ;;  %v1604_v4 = vsel %vm1602_vm3, %v6081_v2, 0  ;;  %v7570_v5 = vsel %vm1602_vm3, %v6228_v3, 0  ;;  %v1067_v6 = vld [vmem:[#allocation3] sm:$0xf]  ;;  %v1068_v7 = vld [vmem:[#allocation3 + $0x4] sm:$0xf]  ;;  %v6536_v45 = vunpack.c.l.bf16 %v6591_v33  ;;  %v6537_v46 = vunpack.c.h.bf16 %v6591_v33 }
  0x2e   : > { %9581 = vst [vmem:[#allocation4_spill] sm:$0xff] %v7570_v5  ;;  %6759 = vmatpush3.bf16.msra.mxu1 %v1604_v4  ;;  %6895 = vmatpush3.bf16.msra.mxu0 %v7570_v5  ;;  %v1100_v8 = vld [vmem:[#allocation3 + $0x8] sm:$0x1]  ;;  %vm1116_vm4 = vsmask.f32 3328  ;;  %v1120_v10 = vshrl.u32 %v1067_v6, 16 }
  0x2f   : > { %vm1117_vm5 = vsmask.f32 7440  ;;  %v1123_v11 = vshll.u32 %v1067_v6, 16  ;;  %v1129_v12 = vshll.u32 %v1068_v7, 16  ;;  %v1133_v13 = vshrl.u32 %v1068_v7, 16  ;;  %v6527_v21 = vld [vmem:[%s7498_s27] sm:$0xff]  }
  0x30   : > { %v1139_v14 = vshll.u32 %v1100_v8, 16  ;;  %v377_v15 = vld [vmem:[%s9561_s1] sm:$0x3]  ;;  %v1122_v17 = vrot.slane %v1120_v10, 4  ;;  %v381_v22 = vshrl.u32 %v380_v9, 7  ;;  %v6590_v24 = vld [vmem:[%s7498_s27 + $0x8] sm:$0xff]   ;;  %vm7583_vm6 = vmor %vm1116_vm4, %vm1117_vm5  ;;  %v6528_v29 = vunpack.c.l.bf16 %v6527_v21 }
  0x31   : > { %v6047_v16 = vld [vmem:[%s9562_s2] ss:$0 sm:$0xff]  ;;  %v1125_v18 = vrot.slane %v1123_v11, 5  ;;  %v1131_v19 = vrot.slane %v1129_v12, 5  ;;  %v1135_v20 = vrot.slane %v1133_v13, 4  ;;  %v6529_v30 = vunpack.c.h.bf16 %v6527_v21  ;;  %v6592_v42 = vld [vmem:[%s7498_s27 + $0x18] sm:$0xff]  }
  0x32   : > { %v422_v23 = vmul.f32 %v6047_v16, %v377_v15  ;;  %v1141_v27 = vrot.slane %v1139_v14, 5  ;;  %v382_v31 = vsub.s32 0, %v381_v22  ;;  %v425_v32 = vsub.s32 1, %v381_v22  ;;  %v7591_v36 = vld [vmem:[%s9564_s4] sm:$0x3]  ;;  %p6457_p5 = scmp.ne.s32.totalorder %s7489_s22, 1 }
  0x33   : > { %v1126_v25 = vor.u32 %v1125_v18, %v1122_v17  ;;  %v1136_v26 = vor.u32 %v1135_v20, %v1131_v19  ;;  %v7596_v37 = vld [vmem:[%s9564_s4 + $0xa] sm:$0x3]  ;;  %v6532_v38 = vunpack.c.l.bf16 %v6590_v24  ;;  %v6533_v39 = vunpack.c.h.bf16 %v6590_v24  ;;  %7323 = vmatprep.subr.msk.bf16.mxu1 %vm1602_vm3, %v7591_v36  ;;  %v7617_v51 = vld [vmem:[%s9563_s3] ss:$0 sm:$0xff] }
  0x34   : > { %vm1553_vm7 = vcmask 31744   ;;  %v7598_v40 = vrot.slane %v377_v15, %v382_v31  ;;  %v7600_v41 = vrot.slane %v422_v23, %v425_v32  ;;  %7328 = vmatprep.subr.msk.bf16.mxu0 %vm1602_vm3, %v7596_v37  ;;  %vm625_vm8 = vsmask.f32 256 }
  0x35   : > { %v1127_v34 = vrot.slane %v1126_v25, 4  ;;  %v1137_v35 = vrot.slane %v1136_v26, 4  ;;  %vm626_vm9 = vsmask.f32 4368  ;;  %vm949_vm10 = vcmask 27648  }
  0x36   : > { %v384_v48 = vsub.f32 %v6528_v29, %v7598_v40  ;;  %v385_v49 = vsub.f32 %v6529_v30, %v7598_v40  ;;  %v386_v50 = vsub.f32 %v6532_v38, %v7598_v40  ;;  %vm950_vm11 = vsmask.f32 7938  ;;  %vm7645_vm13 = vmor %vm625_vm8, %vm626_vm9 }
  0x37   : > { %v1132_v43 = vsel %vm7583_vm6, %v1127_v34, %v1131_v19  ;;  %v1142_v44 = vsel %vm7583_vm6, %v1137_v35, %v1141_v27  ;;  %v387_v52 = vsub.f32 %v6533_v39, %v7598_v40  ;;  %v388_v53 = vsub.f32 %v6536_v45, %v7598_v40  ;;  %vm7651_vm14 = vmand %vm949_vm10, %vm950_vm11 }
  0x38   : > { %v6082_v47 = vcombine.low %v1132_v43, %v1142_v44  ;;  %v389_v54 = vsub.f32 %v6537_v46, %v7598_v40  ;;  %v6540_v55 = vunpack.c.l.bf16 %v6592_v42  ;;  %v427_v56 = vmul.f32 %v7600_v41, %v384_v48  ;;  %v959_v46 = vld [vmem:[#allocation3 + $0x14] sm:$0x1] }
  0x39   : > { %v428_v57 = vmul.f32 %v7600_v41, %v385_v49  ;;  %vm957_vm12 = vcmask 24576   ;;  %v429_v58 = vmul.f32 %v7600_v41, %v386_v50  ;;  %v6541_v59 = vunpack.c.h.bf16 %v6592_v42  ;;  %v952_v42 = vld [vmem:[#allocation3 + $0xc] sm:$0xf] }
  0x3a   : > { %6760 = vmatprep.mubr.msk.bf16.mxu1 %vm1553_vm7, %v6082_v47  ;;  %v430_v60 = vmul.f32 %v7600_v41, %v387_v52  ;;  %v431_v61 = vmul.f32 %v7600_v41, %v388_v53  ;;  %v432_v62 = vmul.f32 %v7600_v41, %v389_v54  ;;  %v390_v63 = vsub.f32 %v6540_v55, %v7598_v40  ;;  %vm7657_vm15 = vmand %vm957_vm12, %vm625_vm8 }
  0x3b   : > { %v465_v0 = vadd.f32 %v7617_v51, %v427_v56  ;;  %v466_v1 = vadd.f32 %v7617_v51, %v428_v57  ;;  %v467_v2 = vadd.f32 %v7617_v51, %v429_v58  ;;  %v391_v3 = vsub.f32 %v6541_v59, %v7598_v40  ;;  %v962_v56 = vld [vmem:[#allocation3 + $0x18] sm:$0xf]  ;;  %v966_v57 = vld [vmem:[#allocation3 + $0x20] sm:$0x1] }
  0x3c   : > { %v468_v4 = vadd.f32 %v7617_v51, %v430_v60  ;;  %v469_v6 = vadd.f32 %v7617_v51, %v431_v61  ;;  %v470_v7 = vadd.f32 %v7617_v51, %v432_v62  ;;  %v433_v8 = vmul.f32 %v7600_v41, %v390_v63 }
  0x3d   : > { %v497_v9 = vmax.f32 %v465_v0, 0.0  ;;  %v498_v10 = vmax.f32 %v466_v1, 0.0  ;;  %v499_v11 = vmax.f32 %v467_v2, 0.0  ;;  %v434_v12 = vmul.f32 %v7600_v41, %v391_v3  ;;  %v6593_v2 = vld [vmem:[%s7498_s27 + $0x20] sm:$0xff]  }
  0x3e   : > { %v500_v13 = vmax.f32 %v468_v4, 0.0  ;;  %v501_v14 = vmax.f32 %v469_v6, 0.0  ;;  %v502_v15 = vmax.f32 %v470_v7, 0.0  ;;  %v471_v16 = vadd.f32 %v7617_v51, %v433_v8  ;;  %v969_v8 = vld [vmem:[#allocation3 + $0x24] sm:$0xf] }
  0x3f   : > { %v6462_v17 = vpack.c.bf16 %v497_v9, %v497_v9  ;;  %v6463_v18 = vpack.c.bf16 %v498_v10, %v498_v10  ;;  %v6464_v19 = vpack.c.bf16 %v499_v11, %v499_v11  ;;  %v7641_v20 = vadd.f32 %v7617_v51, %v434_v12  ;;  %v973_v11 = vld [vmem:[#allocation3 + $0x2c] sm:$0x1] }
  0x40   : > { %v6465_v21 = vpack.c.bf16 %v500_v13, %v500_v13  ;;  %v6466_v22 = vpack.c.bf16 %v501_v14, %v501_v14  ;;  %v6467_v23 = vpack.c.bf16 %v502_v15, %v502_v15  ;;  %v503_v24 = vmax.f32 %v471_v16, 0.0 }
  0x41   : > { %v629_v25 = vshrl.u32 %v6462_v17, 16  ;;  %v632_v26 = vshll.u32 %v6462_v17, 16  ;;  %v637_v27 = vshrl.u32 %v6463_v18, 16  ;;  %v640_v29 = vshll.u32 %v6463_v18, 16  ;;  %v7678_v18 = vld [vmem:[%s7498_s27 + $0x28] sm:$0xff]  }
  0x42   : > { %v646_v31 = vshrl.u32 %v6464_v19, 16  ;;  %v649_v32 = vshll.u32 %v6464_v19, 16  ;;  %v654_v33 = vshrl.u32 %v6465_v21, 16  ;;  %v657_v34 = vshll.u32 %v6465_v21, 16 }
  0x43   : > { %v631_v35 = vrot.slane %v629_v25, 7  ;;  %v639_v38 = vrot.slane %v637_v27, 7  ;;  %v663_v43 = vshrl.u32 %v6466_v22, 16  ;;  %v666_v44 = vshll.u32 %v6466_v22, 16  ;;  %v7691_v27 = vld [vmem:[%s7498_s27 + $0x30] sm:$0xff]  }
  0x44   : > { %v648_v47 = vrot.slane %v646_v31, 7  ;;  %v656_v48 = vrot.slane %v654_v33, 7  ;;  %v671_v49 = vshrl.u32 %v6467_v23, 16  ;;  %v674_v50 = vshll.u32 %v6467_v23, 16 }
  0x45   : > { %v634_v52 = vor.u32 %v632_v26, %v631_v35  ;;  %v635_v53 = vrot.slane %v631_v35, 4  ;;  %v642_v54 = vor.u32 %v640_v29, %v639_v38  ;;  %v644_v55 = vrot.slane %v639_v38, 4 }
  0x46   : > { %v651_v58 = vor.u32 %v649_v32, %v648_v47  ;;  %v652_v59 = vrot.slane %v648_v47, 4  ;;  %v659_v60 = vor.u32 %v657_v34, %v656_v48  ;;  %v661_v61 = vrot.slane %v656_v48, 4 }
  0x47   : > { %v643_v62 = vsel %vm7645_vm13, %v635_v53, %v642_v54  ;;  %v953_v63 = vsel %vm7651_vm14, %v634_v52, %v952_v42  ;;  %v960_v0 = vsel %vm7657_vm15, %v644_v55, %v959_v46  ;;  %v665_v1 = vrot.slane %v663_v43, 7 }
  0x48   : > { %954 = vst [vmem:[#allocation3 + $0xc] sm:$0xf] %v953_v63  ;;  %956 = vst.msk [vmem:[#allocation3 + $0x10] sm:$0xf] %vm949_vm10, %v643_v62  ;;  %v660_v3 = vsel %vm7645_vm13, %v652_v59, %v659_v60  ;;  %v963_v4 = vsel %vm7651_vm14, %v651_v58, %v962_v56  ;;  %v967_v6 = vsel %vm7657_vm15, %v661_v61, %v966_v57  ;;  %v673_v7 = vrot.slane %v671_v49, 7  ;;  %v7725_v59 = vld [vmem:[%s7498_s27 + $0x38] sm:$0xff]  }
  0x49   : > { %961 = vst [vmem:[#allocation3 + $0x14] sm:$0x1] %v960_v0  ;;  %964 = vst [vmem:[#allocation3 + $0x18] sm:$0xf] %v963_v4  ;;  %v668_v9 = vor.u32 %v666_v44, %v665_v1  ;;  %v669_v10 = vrot.slane %v665_v1, 4  ;;  %v504_v12 = vmax.f32 %v7641_v20, 0.0  ;;  %v6468_v13 = vpack.c.bf16 %v503_v24, %v503_v24 }
  0x4a   : > { %965 = vst.msk [vmem:[#allocation3 + $0x1c] sm:$0xf] %vm949_vm10, %v660_v3  ;;  %968 = vst [vmem:[#allocation3 + $0x20] sm:$0x1] %v967_v6  ;;  %v676_v14 = vor.u32 %v674_v50, %v673_v7  ;;  %v678_v15 = vrot.slane %v673_v7, 4  ;;  %v6544_v16 = vunpack.c.l.bf16 %v6593_v2  ;;  %v6545_v17 = vunpack.c.h.bf16 %v6593_v2 }
  0x4b   : > { %v970_v19 = vsel %vm7651_vm14, %v668_v9, %v969_v8  ;;  %v7682_v21 = vpack.c.bf16 %v504_v12, %v504_v12  ;;  %v680_v22 = vshrl.u32 %v6468_v13, 16  ;;  %v683_v23 = vshll.u32 %v6468_v13, 16 }
  0x4c   : > { %v677_v25 = vsel %vm7645_vm13, %v669_v10, %v676_v14  ;;  %971 = vst [vmem:[#allocation3 + $0x24] sm:$0xf] %v970_v19  ;;  %v974_v20 = vsel %vm7657_vm15, %v678_v15, %v973_v11  ;;  %v392_v24 = vsub.f32 %v6544_v16, %v7598_v40  ;;  %v393_v26 = vsub.f32 %v6545_v17, %v7598_v40 }
  0x4d   : > { %v7695_v29 = vsel %vm1602_vm3, %v7591_v36, 0  ;;  %972 = vst.msk [vmem:[#allocation3 + $0x28] sm:$0xf] %vm949_vm10, %v677_v25  ;;  %975 = vst [vmem:[#allocation3 + $0x2c] sm:$0x1] %v974_v20  ;;  %v7698_v31 = vrot.slane %v680_v22, 7  ;;  %v6548_v32 = vunpack.c.l.bf16 %v7678_v18  ;;  %v6552_v47 = vunpack.c.l.bf16 %v7691_v27 }
  0x4e   : > { %v7703_v33 = vsel %vm1602_vm3, %v7596_v37, 0  ;;  %v688_v34 = vshrl.u32 %v7682_v21, 16  ;;  %v691_v35 = vshll.u32 %v7682_v21, 16  ;;  %v7708_v38 = vmul.f32 %v7600_v41, %v392_v24 }
  0x4f   : > { %v1069_v36 = vld [vmem:[#allocation3 + $0xc] sm:$0xf]  ;;  %v1070_v42 = vld [vmem:[#allocation3 + $0x10] sm:$0xf]  ;;  %v7711_v44 = vor.u32 %v683_v23, %v7698_v31  ;;  %v7714_v46 = vmul.f32 %v7600_v41, %v393_v26  ;;  %v6549_v37 = vunpack.c.h.bf16 %v7678_v18  ;;  %v7721_v57 = vsub.f32 %v6548_v32, %v7598_v40 }
  0x50   : > { %v1101_v43 = vld [vmem:[#allocation3 + $0x14] sm:$0x1]  ;;  %v1144_v48 = vshrl.u32 %v1069_v36, 16  ;;  %v1147_v49 = vshll.u32 %v1069_v36, 16  ;;  %v1153_v50 = vshll.u32 %v1070_v42, 16  ;;  %v1157_v52 = vshrl.u32 %v1070_v42, 16 }
  0x51   : > { %v2874_v53 = vld [vmem:[#allocation3 + $0xc] sm:$0xf]  ;;  %v1163_v54 = vshll.u32 %v1101_v43, 16  ;;  %v7718_v55 = vld [vmem:[#allocation3 + $0x10] sm:$0xf]  ;;  %v6553_v58 = vunpack.c.h.bf16 %v7691_v27  ;;  %v6556_v15 = vunpack.c.l.bf16 %v7725_v59  ;;  %v396_v21 = vsub.f32 %v6552_v47, %v7598_v40 }
  0x52   : > { %v2923_v56 = vshrl.u32 %v2874_v53, 16  ;;  %v1146_v60 = vrot.slane %v1144_v48, 4  ;;  %v1149_v61 = vrot.slane %v1147_v49, 5  ;;  %v1155_v62 = vrot.slane %v1153_v50, 5  ;;  %v7727_v0 = vld [vmem:[#allocation3 + $0x14] sm:$0x1] }
  0x53   : > { %v1159_v63 = vrot.slane %v1157_v52, 4  ;;  %v1165_v1 = vrot.slane %v1163_v54, 5  ;;  %v2926_v3 = vshll.u32 %v2874_v53, 16  ;;  %v2932_v4 = vshll.u32 %v7718_v55, 16  ;;  %v2877_v10 = vld [vmem:[#allocation3 + $0x18] sm:$0xf] }
  0x54   : > { %v2925_v2 = vrot.slane %v2923_v56, 4  ;;  %v1150_v6 = vor.u32 %v1149_v61, %v1146_v60  ;;  %v2936_v8 = vshrl.u32 %v7718_v55, 16  ;;  %v2942_v9 = vshll.u32 %v7727_v0, 16  ;;  %v7732_v11 = vld [vmem:[#allocation3 + $0x1c] sm:$0xf] }
  0x55   : > { %v1160_v7 = vor.u32 %v1159_v63, %v1155_v62  ;;  %v2928_v12 = vrot.slane %v2926_v3, 5  ;;  %v2934_v13 = vrot.slane %v2932_v4, 5  ;;  %v3666_v14 = vrot.slane %v7718_v55, 5  ;;  %v7736_v25 = vld [vmem:[#allocation3 + $0x20] sm:$0x1] }
  0x56   : > { %v1151_v16 = vrot.slane %v1150_v6, 4  ;;  %v2938_v19 = vrot.slane %v2936_v8, 4  ;;  %v2944_v22 = vrot.slane %v2942_v9, 5  ;;  %v2947_v20 = vshrl.u32 %v2877_v10, 16  ;;  %v1071_v53 = vld [vmem:[#allocation3 + $0x18] sm:$0xf] }
  0x57   : > { %v1161_v17 = vrot.slane %v1160_v7, 4  ;;  %v2929_v23 = vor.u32 %v2928_v12, %v2925_v2  ;;  %v2950_v24 = vshll.u32 %v2877_v10, 16  ;;  %v2956_v26 = vshll.u32 %v7732_v11, 16  ;;  %v1072_v3 = vld [vmem:[#allocation3 + $0x1c] sm:$0xf] }
  0x58   : > { %v1156_v32 = vsel %vm7583_vm6, %v1151_v16, %v1155_v62  ;;  %v2939_v42 = vor.u32 %v2938_v19, %v2934_v13  ;;  %v2960_v43 = vshrl.u32 %v7732_v11, 16  ;;  %v2949_v50 = vrot.slane %v2947_v20, 4  ;;  %v1102_v8 = vld [vmem:[#allocation3 + $0x20] sm:$0x1]  ;;  %v1073_v10 = vld [vmem:[#allocation3 + $0x24] sm:$0xf] }
  0x59   : > { %v1166_v36 = vsel %vm7583_vm6, %v1161_v17, %v1165_v1  ;;  %v2930_v49 = vrot.slane %v2929_v23, 4  ;;  %v2952_v52 = vrot.slane %v2950_v24, 5  ;;  %v2958_v56 = vrot.slane %v2956_v26, 5  ;;  %v1074_v19 = vld [vmem:[#allocation3 + $0x28] sm:$0xf] }
  0x5a   : > { %v6083_v48 = vcombine.low %v1156_v32, %v1166_v36  ;;  %v2940_v54 = vrot.slane %v2939_v42, 4  ;;  %v2962_v60 = vrot.slane %v2960_v43, 4  ;;  %v2966_v61 = vshll.u32 %v7736_v25, 16  ;;  %v1103_v32 = vld [vmem:[#allocation3 + $0x2c] sm:$0x1] }
  0x5b   : > { %v2935_v62 = vsel %vm7583_vm6, %v2930_v49, %v2934_v13  ;;  %v3669_v63 = vrot.slane %v7727_v0, 5  ;;  %v2953_v1 = vor.u32 %v2952_v52, %v2949_v50  ;;  %v3673_v2 = vrot.slane %v7732_v11, 5  ;;  %v2880_v43 = vld [vmem:[#allocation3 + $0x24] sm:$0xf] }
  0x5c   : > { %6761 = vmatmul.mubr.msk.bf16.vlgmr.msra.gmra.mrb[0].mxu1 %vm1553_vm7, %v6083_v48  ;;  %v2945_v4 = vsel %vm7583_vm6, %v2940_v54, %v2944_v22  ;;  %v2963_v6 = vor.u32 %v2962_v60, %v2958_v56  ;;  %v2968_v7 = vrot.slane %v2966_v61, 5  ;;  %v1168_v9 = vshrl.u32 %v1071_v53, 16 }
  0x5d   : > { %6793 = vmatpush3.bf16.msra.mxu1 %v7695_v29  ;;  %v6229_v12 = vcombine.low %v2935_v62, %v2945_v4  ;;  %v2954_v16 = vrot.slane %v2953_v1, 4  ;;  %v3676_v13 = vrot.slane %v7736_v25, 5  ;;  %v1171_v17 = vshll.u32 %v1071_v53, 16  ;;  %v7762_v53 = vld [vmem:[%s9564_s4 + $0xc] sm:$0x3] }
  0x5e   : > { %v2964_v23 = vrot.slane %v2963_v6, 4  ;;  %v1170_v20 = vrot.slane %v1168_v9, 4  ;;  %v1177_v24 = vshll.u32 %v1072_v3, 16  ;;  %v1181_v26 = vshrl.u32 %v1072_v3, 16  ;;  %v2882_v9 = vld [vmem:[#allocation3 + $0x2c] sm:$0x1] }
  0x5f   : > { %6896 = vmatprep.mubr.msk.bf16.mxu0 %vm1553_vm7, %v6229_v12  ;;  %v2959_v29 = vsel %vm7583_vm6, %v2954_v16, %v2958_v56  ;;  %v1173_v22 = vrot.slane %v1171_v17, 5  ;;  %v1187_v36 = vshll.u32 %v1102_v8, 16  ;;  %v1192_v42 = vshrl.u32 %v1073_v10, 16  ;;  %v7764_v56 = vld [vmem:[#allocation3 + $0x28] sm:$0xf] }
  0x60   : > { %v2969_v48 = vsel %vm7583_vm6, %v2964_v23, %v2968_v7  ;;  %v1179_v49 = vrot.slane %v1177_v24, 5  ;;  %v1183_v50 = vrot.slane %v1181_v26, 4  ;;  %v1195_v52 = vshll.u32 %v1073_v10, 16  ;;  %v8024_v25 = vld [vmem:[#allocation3 + $0x24] sm:$0xe] }
  0x61   : > { %v6230_v54 = vcombine.low %v2959_v29, %v2969_v48  ;;  %v1174_v60 = vor.u32 %v1173_v22, %v1170_v20  ;;  %v1189_v61 = vrot.slane %v1187_v36, 5  ;;  %v1194_v62 = vrot.slane %v1192_v42, 4 }
  0x62   : > { %v1184_v1 = vor.u32 %v1183_v50, %v1179_v49  ;;  %v1197_v3 = vrot.slane %v1195_v52, 5  ;;  %v1201_v4 = vshll.u32 %v1074_v19, 16  ;;  %v1205_v6 = vshrl.u32 %v1074_v19, 16  ;;  %v976_v52 = vld [vmem:[#allocation3 + $0x30] sm:$0xf] }
  0x63   : > { %6897 = vmatmul.mubr.msk.bf16.vlgmr.msra.gmra.mrb[0].mxu0 %vm1553_vm7, %v6230_v54  ;;  %v1175_v7 = vrot.slane %v1174_v60, 4  ;;  %v1211_v8 = vshll.u32 %v1103_v32, 16  ;;  %v2971_v10 = vshrl.u32 %v2880_v43, 16  ;;  %v2974_v12 = vshll.u32 %v2880_v43, 16 }
  0x64   : > { %6929 = vmatpush3.bf16.msra.mxu0 %v7703_v33  ;;  %v1185_v16 = vrot.slane %v1184_v1, 4  ;;  %v1198_v17 = vor.u32 %v1197_v3, %v1194_v62  ;;  %v1203_v23 = vrot.slane %v1201_v4, 5  ;;  %v1207_v20 = vrot.slane %v1205_v6, 4 }
  0x65   : > { %v1180_v24 = vsel %vm7583_vm6, %v1175_v7, %v1179_v49  ;;  %v1213_v26 = vrot.slane %v1211_v8, 5  ;;  %v2973_v29 = vrot.slane %v2971_v10, 4  ;;  %v2976_v22 = vrot.slane %v2974_v12, 5  ;;  %7329 = vmatprep.subr.msk.bf16.mxu0 %vm1602_vm3, %v7762_v53 }
  0x66   : > { %v1190_v19 = vsel %vm7583_vm6, %v1185_v16, %v1189_v61  ;;  %v1199_v32 = vrot.slane %v1198_v17, 4  ;;  %v1208_v36 = vor.u32 %v1207_v20, %v1203_v23  ;;  %v2980_v33 = vshll.u32 %v7764_v56, 16  ;;  %v980_v16 = vld [vmem:[#allocation3 + $0x38] sm:$0x1] }
  0x67   : > { %v6084_v42 = vcombine.low %v1180_v24, %v1190_v19  ;;  %v2977_v43 = vor.u32 %v2976_v22, %v2973_v29  ;;  %v2984_v48 = vshrl.u32 %v7764_v56, 16  ;;  %v2990_v50 = vshll.u32 %v2882_v9, 16 }
  0x68   : > { %v1204_v49 = vsel %vm7583_vm6, %v1199_v32, %v1203_v23  ;;  %v1209_v54 = vrot.slane %v1208_v36, 4  ;;  %v2982_v60 = vrot.slane %v2980_v33, 5  ;;  %v686_v62 = vrot.slane %v7698_v31, 4 }
  0x69   : > { %6764 = vmatprep.mubr.msk.bf16.mxu1 %vm1553_vm7, %v6084_v42  ;;  %v2978_v61 = vrot.slane %v2977_v43, 4  ;;  %v2986_v1 = vrot.slane %v2984_v48, 4  ;;  %v2992_v3 = vrot.slane %v2990_v50, 5  ;;  %v690_v4 = vrot.slane %v688_v34, 7 }
  0x6a   : > { %v1214_v6 = vsel %vm7583_vm6, %v1209_v54, %v1213_v26  ;;  %v977_v7 = vsel %vm7651_vm14, %v7711_v44, %v976_v52  ;;  %v473_v8 = vadd.f32 %v7617_v51, %v7708_v38  ;;  %v474_v31 = vadd.f32 %v7617_v51, %v7714_v46 }
  0x6b   : > { %v6085_v9 = vcombine.low %v1204_v49, %v1214_v6  ;;  %v2983_v10 = vsel %vm7583_vm6, %v2978_v61, %v2982_v60  ;;  %v2987_v12 = vor.u32 %v2986_v1, %v2982_v60  ;;  %v693_v34 = vor.u32 %v691_v35, %v690_v4  ;;  %978 = vst [vmem:[#allocation3 + $0x30] sm:$0xf] %v977_v7 }
  0x6c   : > { %v695_v17 = vrot.slane %v690_v4, 4  ;;  %v505_v23 = vmax.f32 %v473_v8, 0.0  ;;  %v506_v20 = vmax.f32 %v474_v31, 0.0  ;;  %v395_v38 = vsub.f32 %v6549_v37, %v7598_v40  ;;  %v983_v4 = vld [vmem:[#allocation3 + $0x3c] sm:$0xf] }
  0x6d   : > { %6765 = vmatmul.mubr.msk.bf16.gmra.mrb[4].mxu1 %vm1553_vm7, %v6085_v9  ;;  %v2988_v44 = vrot.slane %v2987_v12, 4  ;;  %v694_v46 = vsel %vm7645_vm13, %v686_v62, %v693_v34  ;;  %v437_v24 = vmul.f32 %v7600_v41, %v7721_v57  ;;  %v397_v57 = vsub.f32 %v6553_v58, %v7598_v40 }
  0x6e   : > { %979 = vst.msk [vmem:[#allocation3 + $0x34] sm:$0xf] %vm949_vm10, %v694_v46  ;;  %v981_v35 = vsel %vm7657_vm15, %v695_v17, %v980_v16  ;;  %v6470_v18 = vpack.c.bf16 %v505_v23, %v505_v23  ;;  %v6471_v37 = vpack.c.bf16 %v506_v20, %v506_v20  ;;  %v438_v26 = vmul.f32 %v7600_v41, %v395_v38 }
  0x6f   : > { %v2993_v29 = vsel %vm7583_vm6, %v2988_v44, %v2992_v3  ;;  %982 = vst [vmem:[#allocation3 + $0x38] sm:$0x1] %v981_v35  ;;  %v475_v22 = vadd.f32 %v7617_v51, %v437_v24  ;;  %v439_v47 = vmul.f32 %v7600_v41, %v396_v21  ;;  %v440_v50 = vmul.f32 %v7600_v41, %v397_v57 }
  0x70   : > { %v6231_v19 = vcombine.low %v2983_v10, %v2993_v29  ;;  %v697_v32 = vshrl.u32 %v6470_v18, 16  ;;  %v700_v36 = vshll.u32 %v6470_v18, 16  ;;  %v705_v33 = vshrl.u32 %v6471_v37, 16 }
  0x71   : > { %v708_v42 = vshll.u32 %v6471_v37, 16  ;;  %v476_v43 = vadd.f32 %v7617_v51, %v438_v26  ;;  %v507_v48 = vmax.f32 %v475_v22, 0.0  ;;  %v7821_v27 = vadd.f32 %v7617_v51, %v439_v47  ;;  %v987_v26 = vld [vmem:[#allocation3 + $0x44] sm:$0x1] }
  0x72   : > { %6900 = vmatprep.mubr.msk.bf16.mxu0 %vm1553_vm7, %v6231_v19  ;;  %v2883_v52 = vld [vmem:[#allocation3 + $0x30] sm:$0xf]  ;;  %v699_v54 = vrot.slane %v697_v32, 7  ;;  %v707_v60 = vrot.slane %v705_v33, 7  ;;  %v6557_v58 = vunpack.c.h.bf16 %v7725_v59  ;;  %v7829_v17 = vadd.f32 %v7617_v51, %v440_v50 }
  0x73   : > { %v1075_v49 = vld [vmem:[#allocation3 + $0x30] sm:$0xf]  ;;  %v2995_v62 = vshrl.u32 %v2883_v52, 16  ;;  %v2998_v61 = vshll.u32 %v2883_v52, 16  ;;  %v7826_v16 = vpack.c.bf16 %v507_v48, %v507_v48  ;;  %vm2107_vm0 = vcmask 1042432  }
  0x74   : > { %v1216_v1 = vshrl.u32 %v1075_v49, 16  ;;  %v1219_v3 = vshll.u32 %v1075_v49, 16  ;;  %v702_v6 = vor.u32 %v700_v36, %v699_v54  ;;  %v703_v7 = vrot.slane %v699_v54, 4 }
  0x75   : > { %v710_v8 = vor.u32 %v708_v42, %v707_v60  ;;  %v712_v31 = vrot.slane %v707_v60, 4  ;;  %v7824_v9 = vld [vmem:[#allocation3 + $0x34] sm:$0xf]  ;;  %v2997_v10 = vrot.slane %v2995_v62, 4  ;;  %v3000_v12 = vrot.slane %v2998_v61, 5 }
  0x76   : > { %v1076_v34 = vld [vmem:[#allocation3 + $0x34] sm:$0xf]  ;;  %v7831_v23 = vld [vmem:[#allocation3 + $0x38] sm:$0x1]  ;;  %v3004_v20 = vshll.u32 %v7824_v9, 16  ;;  %v3008_v38 = vshrl.u32 %v7824_v9, 16  ;;  %v984_v24 = vsel %vm7651_vm14, %v702_v6, %v983_v4 }
  0x77   : > { %v1104_v44 = vld [vmem:[#allocation3 + $0x38] sm:$0x1]  ;;  %v711_v46 = vsel %vm7645_vm13, %v703_v7, %v710_v8  ;;  %v3001_v21 = vor.u32 %v3000_v12, %v2997_v10  ;;  %v3014_v35 = vshll.u32 %v7831_v23, 16  ;;  %v1218_v18 = vrot.slane %v1216_v1, 4  ;;  %985 = vst [vmem:[#allocation3 + $0x3c] sm:$0xf] %v984_v24 }
  0x78   : > { %v1221_v37 = vrot.slane %v1219_v3, 5  ;;  %986 = vst.msk [vmem:[#allocation3 + $0x40] sm:$0xf] %vm949_vm10, %v711_v46  ;;  %v3006_v29 = vrot.slane %v3004_v20, 5  ;;  %v3010_v22 = vrot.slane %v3008_v38, 4  ;;  %v1225_v57 = vshll.u32 %v1076_v34, 16 }
  0x79   : > { %v1229_v47 = vshrl.u32 %v1076_v34, 16  ;;  %v3002_v19 = vrot.slane %v3001_v21, 4  ;;  %v3016_v32 = vrot.slane %v3014_v35, 5  ;;  %v1235_v33 = vshll.u32 %v1104_v44, 16 }
  0x7a   : > { %v1222_v36 = vor.u32 %v1221_v37, %v1218_v18  ;;  %v3011_v42 = vor.u32 %v3010_v22, %v3006_v29  ;;  %v1227_v48 = vrot.slane %v1225_v57, 5  ;;  %v988_v52 = vsel %vm7657_vm15, %v712_v31, %v987_v26 }
  0x7b   : > { %v1231_v50 = vrot.slane %v1229_v47, 4  ;;  %v3007_v49 = vsel %vm7583_vm6, %v3002_v19, %v3006_v29  ;;  %v1237_v60 = vrot.slane %v1235_v33, 5  ;;  %989 = vst [vmem:[#allocation3 + $0x44] sm:$0x1] %v988_v52  ;;  %v508_v62 = vmax.f32 %v476_v43, 0.0 }
  0x7c   : > { %v1223_v54 = vrot.slane %v1222_v36, 4  ;;  %v3012_v61 = vrot.slane %v3011_v42, 4  ;;  %v714_v3 = vshrl.u32 %v7826_v16, 16  ;;  %v717_v4 = vshll.u32 %v7826_v16, 16 }
  0x7d   : > { %v1232_v1 = vor.u32 %v1231_v50, %v1227_v48  ;;  %v7849_v7 = vpack.c.bf16 %v508_v62, %v508_v62  ;;  %v509_v8 = vmax.f32 %v7821_v27, 0.0  ;;  %v510_v31 = vmax.f32 %v7829_v17, 0.0 }
  0x7e   : > { %v1228_v6 = vsel %vm7583_vm6, %v1223_v54, %v1227_v48  ;;  %v3017_v10 = vsel %vm7583_vm6, %v3012_v61, %v3016_v32  ;;  %v1077_v43 = vld [vmem:[#allocation3 + $0x3c] sm:$0xf]  ;;  %v7855_v20 = vrot.slane %v714_v3, 7  ;;  %v398_v16 = vsub.f32 %v6556_v15, %v7598_v40 }
  0x7f   : > { %v1233_v12 = vrot.slane %v1232_v1, 4  ;;  %v1078_v34 = vld [vmem:[#allocation3 + $0x40] sm:$0xf]  ;;  %v6232_v38 = vcombine.low %v3007_v49, %v3017_v10  ;;  %v1240_v44 = vshrl.u32 %v1077_v43, 16  ;;  %v1243_v46 = vshll.u32 %v1077_v43, 16 }
  0x80   : > { %v1249_v24 = vshll.u32 %v1078_v34, 16  ;;  %v2886_v21 = vld [vmem:[#allocation3 + $0x3c] sm:$0xf]  ;;  %v1253_v17 = vshrl.u32 %v1078_v34, 16  ;;  %v7862_v35 = vld [vmem:[#allocation3 + $0x40] sm:$0xf]  ;;  %v719_v36 = vor.u32 %v717_v4, %v7855_v20  ;;  %v6474_v33 = vpack.c.bf16 %v509_v8, %v509_v8 }
  0x81   : > { %v1238_v27 = vsel %vm7583_vm6, %v1233_v12, %v1237_v60  ;;  %v3019_v18 = vshrl.u32 %v2886_v21, 16  ;;  %v3022_v37 = vshll.u32 %v2886_v21, 16  ;;  %6901 = vmatmul.mubr.msk.bf16.gmra.mrb[4].mxu0 %vm1553_vm7, %v6232_v38  ;;  %v1242_v29 = vrot.slane %v1240_v44, 4  ;;  %v990_v49 = vld [vmem:[#allocation3 + $0x48] sm:$0xf] }
  0x82   : > { %v6086_v26 = vcombine.low %v1228_v6, %v1238_v27  ;;  %v1245_v22 = vrot.slane %v1243_v46, 5  ;;  %v1251_v57 = vrot.slane %v1249_v24, 5  ;;  %v1105_v15 = vld [vmem:[#allocation3 + $0x44] sm:$0x1]  ;;  %v1255_v47 = vrot.slane %v1253_v17, 4 }
  0x83   : > { %v7865_v19 = vld [vmem:[#allocation3 + $0x44] sm:$0x1]  ;;  %v3021_v32 = vrot.slane %v3019_v18, 4  ;;  %v1259_v48 = vshll.u32 %v1105_v15, 16  ;;  %v3024_v50 = vrot.slane %v3022_v37, 5  ;;  %v3028_v52 = vshll.u32 %v7862_v35, 16 }
  0x84   : > { %6768 = vmatprep.mubr.msk.bf16.mxu1 %vm1553_vm7, %v6086_v26  ;;  %v1246_v42 = vor.u32 %v1245_v22, %v1242_v29  ;;  %v1256_v54 = vor.u32 %v1255_v47, %v1251_v57  ;;  %v3032_v60 = vshrl.u32 %v7862_v35, 16  ;;  %v3038_v62 = vshll.u32 %v7865_v19, 16  ;;  %v994_v37 = vld [vmem:[#allocation3 + $0x50] sm:$0x1] }
  0x85   : > { %v720_v61 = vrot.slane %v7855_v20, 4  ;;  %v1261_v3 = vrot.slane %v1259_v48, 5  ;;  %v3025_v6 = vor.u32 %v3024_v50, %v3021_v32  ;;  %v3030_v4 = vrot.slane %v3028_v52, 5  ;;  %v997_v52 = vld [vmem:[#allocation3 + $0x54] sm:$0xf] }
  0x86   : > { %v1247_v1 = vrot.slane %v1246_v42, 4  ;;  %v1257_v8 = vrot.slane %v1256_v54, 4  ;;  %v3034_v10 = vrot.slane %v3032_v60, 4  ;;  %v3040_v12 = vrot.slane %v3038_v62, 5 }
  0x87   : > { %v722_v43 = vshrl.u32 %v7849_v7, 16  ;;  %v3026_v38 = vrot.slane %v3025_v6, 4  ;;  %v725_v44 = vshll.u32 %v7849_v7, 16  ;;  %v991_v46 = vsel %vm7651_vm14, %v719_v36, %v990_v49  ;;  %v6597_v49 = vld [vmem:[%s7498_s27 + $0x40] sm:$0xff]  }
  0x88   : > { %v1252_v34 = vsel %vm7583_vm6, %v1247_v1, %v1251_v57  ;;  %v1262_v20 = vsel %vm7583_vm6, %v1257_v8, %v1261_v3  ;;  %v3035_v24 = vor.u32 %v3034_v10, %v3030_v4  ;;  %992 = vst [vmem:[#allocation3 + $0x48] sm:$0xf] %v991_v46  ;;  %v6475_v27 = vpack.c.bf16 %v510_v31, %v510_v31  ;;  %v1001_v1 = vld [vmem:[#allocation3 + $0x5c] sm:$0x1] }
  0x89   : > { %v724_v21 = vrot.slane %v722_v43, 7  ;;  %v6087_v17 = vcombine.low %v1252_v34, %v1262_v20  ;;  %v3031_v18 = vsel %vm7583_vm6, %v3026_v38, %v3030_v4  ;;  %v731_v26 = vshrl.u32 %v6474_v33, 16  ;;  %v7907_v20 = vld [vmem:[%s7498_s27 + $0x48] sm:$0xff]  }
  0x8a   : > { %v734_v29 = vshll.u32 %v6474_v33, 16  ;;  %v3036_v22 = vrot.slane %v3035_v24, 4  ;;  %v739_v15 = vshrl.u32 %v6475_v27, 16  ;;  %v742_v32 = vshll.u32 %v6475_v27, 16 }
  0x8b   : > { %v727_v7 = vor.u32 %v725_v44, %v724_v21  ;;  %v729_v57 = vrot.slane %v724_v21, 4  ;;  %6769 = vmatmul.mubr.msk.bf16.gmra.mrb[8].mxu1 %vm1553_vm7, %v6087_v17  ;;  %v733_v47 = vrot.slane %v731_v26, 7  ;;  %v399_v31 = vsub.f32 %v6557_v58, %v7598_v40 }
  0x8c   : > { %v441_v36 = vmul.f32 %v7600_v41, %v398_v16  ;;  %v3041_v42 = vsel %vm7583_vm6, %v3036_v22, %v3040_v12  ;;  %v741_v50 = vrot.slane %v739_v15, 7  ;;  %v7899_v60 = vrot.slane %v3673_v2, 4 }
  0x8d   : > { %v728_v33 = vsel %vm7645_vm13, %v720_v61, %v727_v7  ;;  %v995_v48 = vsel %vm7657_vm15, %v729_v57, %v994_v37  ;;  %v6233_v54 = vcombine.low %v3031_v18, %v3041_v42  ;;  %v736_v59 = vor.u32 %v734_v29, %v733_v47 }
  0x8e   : > { %993 = vst.msk [vmem:[#allocation3 + $0x4c] sm:$0xf] %vm949_vm10, %v728_v33  ;;  %996 = vst [vmem:[#allocation3 + $0x50] sm:$0x1] %v995_v48  ;;  %v737_v58 = vrot.slane %v733_v47, 4  ;;  %v442_v16 = vmul.f32 %v7600_v41, %v399_v31  ;;  %v744_v62 = vor.u32 %v742_v32, %v741_v50  ;;  %v746_v61 = vrot.slane %v741_v50, 4 }
  0x8f   : > { %v479_v3 = vadd.f32 %v7617_v51, %v441_v36  ;;  %6904 = vmatprep.mubr.msk.bf16.mxu0 %vm1553_vm7, %v6233_v54  ;;  %v2889_v6 = vld [vmem:[#allocation3 + $0x48] sm:$0xf]  ;;  %v998_v8 = vsel %vm7651_vm14, %v736_v59, %v997_v52  ;;  %v6560_v12 = vunpack.c.l.bf16 %v6597_v49  ;;  %v6561_v43 = vunpack.c.h.bf16 %v6597_v49 }
  0x90   : > { %v1079_v4 = vld [vmem:[#allocation3 + $0x48] sm:$0xf]  ;;  %v480_v10 = vadd.f32 %v7617_v51, %v442_v16  ;;  %v3043_v34 = vshrl.u32 %v2889_v6, 16  ;;  %v3046_v38 = vshll.u32 %v2889_v6, 16  ;;  %999 = vst [vmem:[#allocation3 + $0x54] sm:$0xf] %v998_v8  ;;  %v745_v24 = vsel %vm7645_vm13, %v737_v58, %v744_v62 }
  0x91   : > { %v1264_v44 = vshrl.u32 %v1079_v4, 16  ;;  %v1267_v46 = vshll.u32 %v1079_v4, 16  ;;  %v1002_v21 = vsel %vm7657_vm15, %v746_v61, %v1001_v1  ;;  %v511_v27 = vmax.f32 %v479_v3, 0.0  ;;  %1000 = vst.msk [vmem:[#allocation3 + $0x58] sm:$0xf] %vm949_vm10, %v745_v24 }
  0x92   : > { %v512_v17 = vmax.f32 %v480_v10, 0.0  ;;  %v3045_v18 = vrot.slane %v3043_v34, 4  ;;  %v3048_v37 = vrot.slane %v3046_v38, 5  ;;  %1003 = vst [vmem:[#allocation3 + $0x5c] sm:$0x1] %v1002_v21  ;;  %v400_v7 = vsub.f32 %v6560_v12, %v7598_v40 }
  0x93   : > { %v1266_v51 = vrot.slane %v1264_v44, 4  ;;  %v1269_v26 = vrot.slane %v1267_v46, 5  ;;  %v7914_v29 = vpack.c.bf16 %v511_v27, %v511_v27  ;;  %v7920_v57 = vsub.f32 %v6561_v43, %v7598_v40 }
  0x94   : > { %v7916_v22 = vpack.c.bf16 %v512_v17, %v512_v17  ;;  %v3049_v32 = vor.u32 %v3048_v37, %v3045_v18  ;;  %v6564_v42 = vunpack.c.l.bf16 %v7907_v20  ;;  %v6565_v33 = vunpack.c.h.bf16 %v7907_v20 }
  0x95   : > { %v7922_v15 = vld [vmem:[#allocation3 + $0x4c] sm:$0xf]  ;;  %v7924_v47 = vld [vmem:[#allocation3 + $0x50] sm:$0x1]  ;;  %v1270_v36 = vor.u32 %v1269_v26, %v1266_v51  ;;  %v443_v27 = vmul.f32 %v7600_v41, %v400_v7  ;;  %v6162_v7 = vld [vmem:[%s9564_s4 + $0x4] sm:$0x3] }
  0x96   : > { %v1080_v31 = vld [vmem:[#allocation3 + $0x4c] sm:$0xf]  ;;  %v3052_v48 = vshll.u32 %v7922_v15, 16  ;;  %v3056_v50 = vshrl.u32 %v7922_v15, 16  ;;  %v3062_v52 = vshll.u32 %v7924_v47, 16  ;;  %v3050_v59 = vrot.slane %v3049_v32, 4  ;;  %7324 = vmatprep.subr.msk.bf16.mxu1 %vm1602_vm3, %v6162_v7 }
  0x97   : > { %v1106_v49 = vld [vmem:[#allocation3 + $0x50] sm:$0x1]  ;;  %v1273_v54 = vshll.u32 %v1080_v31, 16  ;;  %v1271_v58 = vrot.slane %v1270_v36, 4  ;;  %v1277_v16 = vshrl.u32 %v1080_v31, 16  ;;  %vm2108_vm1 = vcmask 1046532  }
  0x98   : > { %v1283_v62 = vshll.u32 %v1106_v49, 16  ;;  %v3054_v61 = vrot.slane %v3052_v48, 5  ;;  %v3058_v1 = vrot.slane %v3056_v50, 4  ;;  %v3064_v3 = vrot.slane %v3062_v52, 5  ;;  %v1081_v4 = vld [vmem:[#allocation3 + $0x54] sm:$0xf]  ;;  %vm7980_vm2 = vmor %vm2107_vm0, %vm2108_vm1 }
  0x99   : > { %v1275_v6 = vrot.slane %v1273_v54, 5  ;;  %v1279_v8 = vrot.slane %v1277_v16, 4  ;;  %v1288_v12 = vshrl.u32 %v1081_v4, 16  ;;  %v1291_v43 = vshll.u32 %v1081_v4, 16  ;;  %v2892_v34 = vld [vmem:[#allocation3 + $0x54] sm:$0xf] }
  0x9a   : > { %v1285_v10 = vrot.slane %v1283_v62, 5  ;;  %v3055_v38 = vsel %vm7583_vm6, %v3050_v59, %v3054_v61  ;;  %v3059_v44 = vor.u32 %v3058_v1, %v3054_v61  ;;  %v1082_v24 = vld [vmem:[#allocation3 + $0x58] sm:$0xf]  ;;  %v1107_v21 = vld [vmem:[#allocation3 + $0x5c] sm:$0x1]  ;;  %v3067_v50 = vshrl.u32 %v2892_v34, 16 }
  0x9b   : > { %v1276_v46 = vsel %vm7583_vm6, %v1271_v58, %v1275_v6  ;;  %v1280_v17 = vor.u32 %v1279_v8, %v1275_v6  ;;  %v1290_v18 = vrot.slane %v1288_v12, 4  ;;  %v1293_v37 = vrot.slane %v1291_v43, 5  ;;  %v7936_v26 = vld [vmem:[#allocation3 + $0x58] sm:$0xf]  ;;  %v7938_v48 = vld [vmem:[#allocation3 + $0x5c] sm:$0x1] }
  0x9c   : > { %v1297_v51 = vshll.u32 %v1082_v24, 16  ;;  %v3060_v32 = vrot.slane %v3059_v44, 4  ;;  %v1301_v31 = vshrl.u32 %v1082_v24, 16  ;;  %v1307_v36 = vshll.u32 %v1107_v21, 16  ;;  %v8401_v39 = vld [vmem:[#allocation3 + $0x58] sm:$0xf] }
  0x9d   : > { %v1281_v52 = vrot.slane %v1280_v17, 4  ;;  %v1294_v49 = vor.u32 %v1293_v37, %v1290_v18  ;;  %v3070_v59 = vshll.u32 %v2892_v34, 16  ;;  %v3069_v61 = vrot.slane %v3067_v50, 4 }
  0x9e   : > { %v1299_v54 = vrot.slane %v1297_v51, 5  ;;  %v3065_v58 = vsel %vm7583_vm6, %v3060_v32, %v3064_v3  ;;  %v1303_v16 = vrot.slane %v1301_v31, 4  ;;  %v1309_v62 = vrot.slane %v1307_v36, 5 }
  0x9f   : > { %v6234_v1 = vcombine.low %v3055_v38, %v3065_v58  ;;  %v1286_v6 = vsel %vm7583_vm6, %v1281_v52, %v1285_v10  ;;  %v1295_v4 = vrot.slane %v1294_v49, 4  ;;  %v3072_v8 = vrot.slane %v3070_v59, 5  ;;  %v1004_v49 = vld [vmem:[#allocation3 + $0x60] sm:$0xf]  ;;  %v3600_v59 = vld [vmem:[#allocation3 + $0xc] sm:$0xe] }
  0xa0   : > { %v6088_v12 = vcombine.low %v1276_v46, %v1286_v6  ;;  %v1304_v43 = vor.u32 %v1303_v16, %v1299_v54  ;;  %v3076_v34 = vshll.u32 %v7936_v26, 16  ;;  %v3080_v44 = vshrl.u32 %v7936_v26, 16 }
  0xa1   : > { %6905 = vmatmul.mubr.msk.bf16.gmra.mrb[8].mxu0 %vm1553_vm7, %v6234_v1  ;;  %v1300_v3 = vsel %vm7583_vm6, %v1295_v4, %v1299_v54  ;;  %v3073_v24 = vor.u32 %v3072_v8, %v3069_v61  ;;  %v3086_v21 = vshll.u32 %v7938_v48, 16  ;;  %v748_v38 = vshrl.u32 %v7914_v29, 16  ;;  %v1008_v4 = vld [vmem:[#allocation3 + $0x68] sm:$0x1] }
  0xa2   : > { %6772 = vmatprep.mubr.msk.bf16.mxu1 %vm1553_vm7, %v6088_v12  ;;  %v1305_v10 = vrot.slane %v1304_v43, 4  ;;  %v3078_v17 = vrot.slane %v3076_v34, 5  ;;  %v3082_v46 = vrot.slane %v3080_v44, 4  ;;  %v751_v18 = vshll.u32 %v7914_v29, 16 }
  0xa3   : > { %v3074_v37 = vrot.slane %v3073_v24, 4  ;;  %v3088_v51 = vrot.slane %v3086_v21, 5  ;;  %v750_v32 = vrot.slane %v748_v38, 7  ;;  %v756_v31 = vshrl.u32 %v7916_v22, 16  ;;  %v3601_v24 = vld [vmem:[#allocation3 + $0x18] sm:$0xe] }
  0xa4   : > { %v1310_v36 = vsel %vm7583_vm6, %v1305_v10, %v1309_v62  ;;  %v3083_v50 = vor.u32 %v3082_v46, %v3078_v17  ;;  %v759_v52 = vshll.u32 %v7916_v22, 16  ;;  %v444_v54 = vmul.f32 %v7600_v41, %v7920_v57  ;;  %v7968_v62 = vld [vmem:[%s9563_s3] ss:$0 sm:$0xff] }
  0xa5   : > { %v6089_v7 = vcombine.low %v1300_v3, %v1310_v36  ;;  %v3079_v29 = vsel %vm7583_vm6, %v3074_v37, %v3078_v17  ;;  %v753_v58 = vor.u32 %v751_v18, %v750_v32  ;;  %v754_v16 = vrot.slane %v750_v32, 4 }
  0xa6   : > { %v3084_v61 = vrot.slane %v3083_v50, 4  ;;  %v758_v1 = vrot.slane %v756_v31, 7  ;;  %v481_v22 = vadd.f32 %v7968_v62, %v443_v27  ;;  %v482_v6 = vadd.f32 %v7968_v62, %v444_v54 }
  0xa7   : > { %6773 = vmatmul.mubr.msk.bf16.gmra.mrb[12].mxu1 %vm1553_vm7, %v6089_v7  ;;  %v1005_v57 = vsel %vm7651_vm14, %v753_v58, %v1004_v49  ;;  %v6261_v8 = vrot.slane %v3600_v59, 9  ;;  %v3668_v12 = vrot.slane %v3666_v14, 4  ;;  %v8016_v32 = vsel %vm1602_vm3, %v7762_v53, 0 }
  0xa8   : > { %v3089_v43 = vsel %vm7583_vm6, %v3084_v61, %v3088_v51  ;;  %v761_v34 = vor.u32 %v759_v52, %v758_v1  ;;  %v763_v44 = vrot.slane %v758_v1, 4  ;;  %1006 = vst [vmem:[#allocation3 + $0x60] sm:$0xf] %v1005_v57  ;;  %v513_v27 = vmax.f32 %v481_v22, 0.0  ;;  %v8003_v51 = vld [vmem:[%s7498_s27 + $0x50] sm:$0xff]  }
  0xa9   : > { %v6235_v21 = vcombine.low %v3079_v29, %v3089_v43  ;;  %v514_v38 = vmax.f32 %v482_v6, 0.0  ;;  %v7988_v10 = vsel %vm7980_vm2, %v6261_v8, %v3666_v14  ;;  %v7994_v17 = vsel %vm7980_vm2, %v3668_v12, %v3669_v63 }
  0xaa   : > { %v762_v46 = vsel %vm7645_vm13, %v754_v16, %v761_v34  ;;  %v1009_v18 = vsel %vm7657_vm15, %v763_v44, %v1008_v4  ;;  %v6478_v37 = vpack.c.bf16 %v513_v27, %v513_v27  ;;  %v6278_v55 = vcombine.low %v7988_v10, %v7994_v17  ;;  %v1011_v27 = vld [vmem:[#allocation3 + $0x6c] sm:$0xf] }
  0xab   : > { %6908 = vmatprep.mubr.msk.bf16.mxu0 %vm1553_vm7, %v6235_v21  ;;  %1007 = vst.msk [vmem:[#allocation3 + $0x64] sm:$0xf] %vm949_vm10, %v762_v46  ;;  %1010 = vst [vmem:[#allocation3 + $0x68] sm:$0x1] %v1009_v18  ;;  %v6479_v0 = vpack.c.bf16 %v514_v38, %v514_v38  ;;  %v6262_v14 = vrot.slane %v3601_v24, 9  ;;  %v8012_v63 = vsel %vm7980_vm2, %v7899_v60, %v3676_v13  ;;  %v6568_v53 = vunpack.c.l.bf16 %v8003_v51 }
  0xac   : > { %v765_v31 = vshrl.u32 %v6478_v37, 16  ;;  %v768_v36 = vshll.u32 %v6478_v37, 16  ;;  %v402_v50 = vsub.f32 %v6564_v42, %v7598_v40  ;;  %v403_v52 = vsub.f32 %v6565_v33, %v7598_v40 }
  0xad   : > { %v773_v49 = vshrl.u32 %v6479_v0, 16  ;;  %v776_v54 = vshll.u32 %v6479_v0, 16  ;;  %v8030_v13 = vsel %vm7980_vm2, %v6262_v14, %v3673_v2  ;;  %v6569_v58 = vunpack.c.h.bf16 %v8003_v51  ;;  %v1015_v0 = vld [vmem:[#allocation3 + $0x74] sm:$0x1] }
  0xae   : > { %v767_v60 = vrot.slane %v765_v31, 7  ;;  %v6279_v42 = vcombine.low %v8030_v13, %v8012_v63  ;;  %v445_v59 = vmul.f32 %v7600_v41, %v402_v50  ;;  %v446_v20 = vmul.f32 %v7600_v41, %v403_v52 }
  0xaf   : > { %v2895_v33 = vld [vmem:[#allocation3 + $0x60] sm:$0xf]  ;;  %v775_v29 = vrot.slane %v773_v49, 7  ;;  %v404_v11 = vsub.f32 %v6568_v53, %v7598_v40  ;;  %v6263_v2 = vrot.slane %v8024_v25, 9 }
  0xb0   : > { %v1083_v7 = vld [vmem:[#allocation3 + $0x60] sm:$0xf]  ;;  %v3091_v16 = vshrl.u32 %v2895_v33, 16  ;;  %v3094_v61 = vshll.u32 %v2895_v33, 16  ;;  %v770_v6 = vor.u32 %v768_v36, %v767_v60  ;;  %v771_v57 = vrot.slane %v767_v60, 4 }
  0xb1   : > { %v1312_v1 = vshrl.u32 %v1083_v7, 16  ;;  %v1315_v22 = vshll.u32 %v1083_v7, 16  ;;  %v778_v4 = vor.u32 %v776_v54, %v775_v29  ;;  %v780_v8 = vrot.slane %v775_v29, 4 }
  0xb2   : > { %v8040_v12 = vld [vmem:[#allocation3 + $0x64] sm:$0xf]  ;;  %v8042_v43 = vld [vmem:[#allocation3 + $0x68] sm:$0x1]  ;;  %v3093_v34 = vrot.slane %v3091_v16, 4  ;;  %v3096_v44 = vrot.slane %v3094_v61, 5  ;;  %v483_v24 = vadd.f32 %v7968_v62, %v445_v59  ;;  %v484_v21 = vadd.f32 %v7968_v62, %v446_v20 }
  0xb3   : > { %v3100_v38 = vshll.u32 %v8040_v12, 16  ;;  %v3104_v46 = vshrl.u32 %v8040_v12, 16  ;;  %v3110_v18 = vshll.u32 %v8042_v43, 16  ;;  %v1084_v37 = vld [vmem:[#allocation3 + $0x64] sm:$0xf]  ;;  %v1314_v51 = vrot.slane %v1312_v1, 4 }
  0xb4   : > { %v3097_v14 = vor.u32 %v3096_v44, %v3093_v34  ;;  %v1108_v31 = vld [vmem:[#allocation3 + $0x68] sm:$0x1]  ;;  %v1317_v36 = vrot.slane %v1315_v22, 5  ;;  %v1321_v50 = vshll.u32 %v1084_v37, 16  ;;  %v1325_v52 = vshrl.u32 %v1084_v37, 16 }
  0xb5   : > { %v3102_v25 = vrot.slane %v3100_v38, 5  ;;  %v3106_v49 = vrot.slane %v3104_v46, 4  ;;  %v3112_v54 = vrot.slane %v3110_v18, 5  ;;  %v1331_v53 = vshll.u32 %v1108_v31, 16 }
  0xb6   : > { %v3098_v60 = vrot.slane %v3097_v14, 4  ;;  %v1318_v59 = vor.u32 %v1317_v36, %v1314_v51  ;;  %v1323_v20 = vrot.slane %v1321_v50, 5  ;;  %v1327_v33 = vrot.slane %v1325_v52, 4 }
  0xb7   : > { %v3107_v7 = vor.u32 %v3106_v49, %v3102_v25  ;;  %v1333_v29 = vrot.slane %v1331_v53, 5  ;;  %v779_v16 = vsel %vm7645_vm13, %v771_v57, %v778_v4  ;;  %v1012_v61 = vsel %vm7651_vm14, %v770_v6, %v1011_v27  ;;  %v1018_v49 = vld [vmem:[#allocation3 + $0x78] sm:$0xf] }
  0xb8   : > { %v3103_v1 = vsel %vm7583_vm6, %v3098_v60, %v3102_v25  ;;  %v1319_v22 = vrot.slane %v1318_v59, 4  ;;  %v1328_v34 = vor.u32 %v1327_v33, %v1323_v20  ;;  %1013 = vst [vmem:[#allocation3 + $0x6c] sm:$0xf] %v1012_v61  ;;  %1014 = vst.msk [vmem:[#allocation3 + $0x70] sm:$0xf] %vm949_vm10, %v779_v16  ;;  %v1016_v44 = vsel %vm7657_vm15, %v780_v8, %v1015_v0 }
  0xb9   : > { %v3108_v38 = vrot.slane %v3107_v7, 4  ;;  %1017 = vst [vmem:[#allocation3 + $0x74] sm:$0x1] %v1016_v44  ;;  %v515_v46 = vmax.f32 %v483_v24, 0.0  ;;  %v516_v18 = vmax.f32 %v484_v21, 0.0  ;;  %v405_v57 = vsub.f32 %v6569_v58, %v7598_v40 }
  0xba   : > { %v1324_v6 = vsel %vm7583_vm6, %v1319_v22, %v1323_v20  ;;  %v1329_v4 = vrot.slane %v1328_v34, 4  ;;  %v447_v27 = vmul.f32 %v7600_v41, %v404_v11  ;;  %v3680_v37 = vrot.slane %v7764_v56, 5  ;;  %v8074_v11 = vld [vmem:[%s7498_s27 + $0x58] sm:$0xff]  }
  0xbb   : > { %v3113_v51 = vsel %vm7583_vm6, %v3108_v38, %v3112_v54  ;;  %v6480_v14 = vpack.c.bf16 %v515_v46, %v515_v46  ;;  %v6481_v8 = vpack.c.bf16 %v516_v18, %v516_v18  ;;  %v448_v0 = vmul.f32 %v7600_v41, %v405_v57  ;;  %v1022_v57 = vld [vmem:[#allocation3 + $0x80] sm:$0x1] }
  0xbc   : > { %v6236_v31 = vcombine.low %v3103_v1, %v3113_v51  ;;  %v1334_v24 = vsel %vm7583_vm6, %v1329_v4, %v1333_v29  ;;  %v485_v58 = vadd.f32 %v7968_v62, %v447_v27  ;;  %v8071_v21 = vsel %vm7980_vm2, %v6263_v2, %v3680_v37  ;;  %v3603_v4 = vld [vmem:[#allocation3 + $0x30] sm:$0xe] }
  0xbd   : > { %v6090_v56 = vcombine.low %v1324_v6, %v1334_v24  ;;  %v782_v36 = vshrl.u32 %v6480_v14, 16  ;;  %v785_v50 = vshll.u32 %v6480_v14, 16  ;;  %v790_v52 = vshrl.u32 %v6481_v8, 16 }
  0xbe   : > { %6909 = vmatmul.mubr.msk.bf16.gmra.mrb[12].mxu0 %vm1553_vm7, %v6236_v31  ;;  %v793_v25 = vshll.u32 %v6481_v8, 16  ;;  %v486_v54 = vadd.f32 %v7968_v62, %v448_v0  ;;  %v517_v53 = vmax.f32 %v485_v58, 0.0  ;;  %v3682_v60 = vrot.slane %v3680_v37, 4  ;;  %v6343_v8 = vld [vmem:[%s9564_s4 + $0xe] sm:$0x3] }
  0xbf   : > { %6776 = vmatprep.mubr.msk.bf16.mxu1 %vm1553_vm7, %v6090_v56  ;;  %v1085_v59 = vld [vmem:[#allocation3 + $0x6c] sm:$0xf]  ;;  %v1086_v20 = vld [vmem:[#allocation3 + $0x70] sm:$0xf]  ;;  %6930 = vmatprep.mubr.msk.bf16.mxu0 %vm1553_vm7, %v6278_v55  ;;  %v784_v2 = vrot.slane %v782_v36, 7  ;;  %v792_v33 = vrot.slane %v790_v52, 7  ;;  %v6572_v7 = vunpack.c.l.bf16 %v8074_v11  ;;  %v6573_v29 = vunpack.c.h.bf16 %v8074_v11 }
  0xc0   : > { %v1109_v16 = vld [vmem:[#allocation3 + $0x74] sm:$0x1]  ;;  %v1336_v61 = vshrl.u32 %v1085_v59, 16  ;;  %v1339_v1 = vshll.u32 %v1085_v59, 16  ;;  %v1345_v22 = vshll.u32 %v1086_v20, 16  ;;  %v1349_v34 = vshrl.u32 %v1086_v20, 16 }
  0xc1   : > { %v1355_v44 = vshll.u32 %v1109_v16, 16  ;;  %v787_v38 = vor.u32 %v785_v50, %v784_v2  ;;  %v788_v46 = vrot.slane %v784_v2, 4  ;;  %v795_v18 = vor.u32 %v793_v25, %v792_v33  ;;  %v7375_v36 = vld [vmem:[#allocation3 + $0x2c] sm:$0x1]  ;;  %v3604_v11 = vld [vmem:[#allocation3 + $0x3c] sm:$0xe] }
  0xc2   : > { %v1338_v6 = vrot.slane %v1336_v61, 4  ;;  %v1341_v10 = vrot.slane %v1339_v1, 5  ;;  %v1347_v17 = vrot.slane %v1345_v22, 5  ;;  %v1351_v55 = vrot.slane %v1349_v34, 4  ;;  %v6601_v61 = vld [vmem:[%s7498_s27 + $0x60] sm:$0xff]  }
  0xc3   : > { %v1357_v27 = vrot.slane %v1355_v44, 5  ;;  %v796_v37 = vsel %vm7645_vm13, %v788_v46, %v795_v18  ;;  %v797_v51 = vrot.slane %v792_v33, 4  ;;  %v1019_v14 = vsel %vm7651_vm14, %v787_v38, %v1018_v49  ;;  %v1025_v46 = vld [vmem:[#allocation3 + $0x84] sm:$0xf] }
  0xc4   : > { %v1342_v0 = vor.u32 %v1341_v10, %v1338_v6  ;;  %v1352_v31 = vor.u32 %v1351_v55, %v1347_v17  ;;  %1020 = vst [vmem:[#allocation3 + $0x78] sm:$0xf] %v1019_v14  ;;  %1021 = vst.msk [vmem:[#allocation3 + $0x7c] sm:$0xf] %vm949_vm10, %v796_v37  ;;  %v518_v24 = vmax.f32 %v486_v54, 0.0  ;;  %v6482_v58 = vpack.c.bf16 %v517_v53, %v517_v53 }
  0xc5   : > { %v1023_v56 = vsel %vm7657_vm15, %v797_v51, %v1022_v57  ;;  %v3683_v50 = vrot.slane %v7375_v36, 5  ;;  %v6264_v52 = vrot.slane %v3603_v4, 9  ;;  %v3687_v25 = vrot.slane %v7824_v9, 5  ;;  %v1029_v37 = vld [vmem:[#allocation3 + $0x8c] sm:$0x1] }
  0xc6   : > { %v1343_v49 = vrot.slane %v1342_v0, 4  ;;  %v1353_v59 = vrot.slane %v1352_v31, 4  ;;  %6931 = vmatmul.mubr.msk.bf16.vlgmr.msra.gmra.mrb[0].mxu0 %vm1553_vm7, %v6279_v42  ;;  %1024 = vst [vmem:[#allocation3 + $0x80] sm:$0x1] %v1023_v56  ;;  %v6483_v20 = vpack.c.bf16 %v518_v24, %v518_v24  ;;  %v799_v54 = vshrl.u32 %v6482_v58, 16 }
  0xc7   : > { %6963 = vmatpush3.bf16.msra.mxu0 %v8016_v32  ;;  %v802_v53 = vshll.u32 %v6482_v58, 16  ;;  %v3684_v2 = vsel %vm7980_vm2, %v3682_v60, %v3683_v50  ;;  %v3688_v9 = vsel %vm7980_vm2, %v6264_v52, %v3687_v25  ;;  %v3689_v33 = vrot.slane %v3687_v25, 4 }
  0xc8   : > { %v1348_v16 = vsel %vm7583_vm6, %v1343_v49, %v1347_v17  ;;  %v1358_v63 = vsel %vm7583_vm6, %v1353_v59, %v1357_v27  ;;  %v801_v13 = vrot.slane %v799_v54, 7  ;;  %v807_v42 = vshrl.u32 %v6483_v20, 16  ;;  %7330 = vmatprep.subr.msk.bf16.mxu0 %vm1602_vm3, %v6343_v8 }
  0xc9   : > { %v6091_v32 = vcombine.low %v1348_v16, %v1358_v63  ;;  %v810_v1 = vshll.u32 %v6483_v20, 16  ;;  %v6280_v22 = vcombine.low %v8071_v21, %v3684_v2  ;;  %v3690_v60 = vrot.slane %v7831_v23, 5 }
  0xca   : > { %v804_v34 = vor.u32 %v802_v53, %v801_v13  ;;  %v805_v44 = vrot.slane %v801_v13, 4  ;;  %v809_v38 = vrot.slane %v807_v42, 7  ;;  %v406_v18 = vsub.f32 %v6572_v7, %v7598_v40 }
  0xcb   : > { %6777 = vmatmul.mubr.msk.bf16.gmra.mrb[16].mxu1 %vm1553_vm7, %v6091_v32  ;;  %v8115_v57 = vld [vmem:[#allocation3 + $0x78] sm:$0xf]  ;;  %v8117_v6 = vld [vmem:[#allocation3 + $0x7c] sm:$0xf]  ;;  %6934 = vmatprep.mubr.msk.bf16.mxu0 %vm1553_vm7, %v6280_v22  ;;  %v3691_v10 = vsel %vm7980_vm2, %v3689_v33, %v3690_v60  ;;  %v407_v23 = vsub.f32 %v6573_v29, %v7598_v40  ;;  %v6576_v21 = vunpack.c.l.bf16 %v6601_v61  ;;  %v6577_v17 = vunpack.c.h.bf16 %v6601_v61 }
  0xcc   : > { %v1360_v55 = vshrl.u32 %v8115_v57, 16  ;;  %v1363_v7 = vshll.u32 %v8115_v57, 16  ;;  %v1369_v4 = vshll.u32 %v8117_v6, 16  ;;  %v1373_v27 = vshrl.u32 %v8117_v6, 16 }
  0xcd   : > { %v1110_v51 = vld [vmem:[#allocation3 + $0x80] sm:$0x1]  ;;  %v812_v14 = vor.u32 %v810_v1, %v809_v38  ;;  %v814_v8 = vrot.slane %v809_v38, 4  ;;  %v1026_v0 = vsel %vm7651_vm14, %v804_v34, %v1025_v46  ;;  %v6281_v31 = vcombine.low %v3688_v9, %v3691_v10  ;;  %v8153_v46 = vld [vmem:[%s7498_s27 + $0x68] sm:$0xff]  }
  0xce   : > { %v1362_v29 = vrot.slane %v1360_v55, 4  ;;  %v1365_v24 = vrot.slane %v1363_v7, 5  ;;  %v1371_v58 = vrot.slane %v1369_v4, 5  ;;  %v1375_v56 = vrot.slane %v1373_v27, 4  ;;  %1027 = vst [vmem:[#allocation3 + $0x84] sm:$0xf] %v1026_v0 }
  0xcf   : > { %v1379_v36 = vshll.u32 %v1110_v51, 16  ;;  %v813_v50 = vsel %vm7645_vm13, %v805_v44, %v812_v14  ;;  %v1030_v52 = vsel %vm7657_vm15, %v814_v8, %v1029_v37  ;;  %6935 = vmatmul.mubr.msk.bf16.gmra.mrb[4].mxu0 %vm1553_vm7, %v6281_v31  ;;  %v449_v25 = vmul.f32 %v7600_v41, %v406_v18 }
  0xd0   : > { %v1366_v49 = vor.u32 %v1365_v24, %v1362_v29  ;;  %v1376_v59 = vor.u32 %v1375_v56, %v1371_v58  ;;  %1028 = vst.msk [vmem:[#allocation3 + $0x88] sm:$0xf] %vm949_vm10, %v813_v50  ;;  %1031 = vst [vmem:[#allocation3 + $0x8c] sm:$0x1] %v1030_v52  ;;  %v450_v20 = vmul.f32 %v7600_v41, %v407_v23  ;;  %v6265_v33 = vrot.slane %v3604_v11, 9 }
  0xd1   : > { %v408_v54 = vsub.f32 %v6576_v21, %v7598_v40  ;;  %v1381_v53 = vrot.slane %v1379_v36, 5  ;;  %v487_v2 = vadd.f32 %v7968_v62, %v449_v25  ;;  %v409_v9 = vsub.f32 %v6577_v17, %v7598_v40 }
  0xd2   : > { %v1367_v16 = vrot.slane %v1366_v49, 4  ;;  %v1377_v63 = vrot.slane %v1376_v59, 4  ;;  %v488_v13 = vadd.f32 %v7968_v62, %v450_v20  ;;  %v3694_v1 = vrot.slane %v7862_v35, 5  ;;  %v1032_v59 = vld [vmem:[#allocation3 + $0x90] sm:$0xf] }
  0xd3   : > { %v451_v42 = vmul.f32 %v7600_v41, %v408_v54  ;;  %v519_v61 = vmax.f32 %v487_v2, 0.0  ;;  %v452_v32 = vmul.f32 %v7600_v41, %v409_v9  ;;  %v3697_v22 = vrot.slane %v7865_v19, 5 }
  0xd4   : > { %v1372_v60 = vsel %vm7583_vm6, %v1367_v16, %v1371_v58  ;;  %v1382_v34 = vsel %vm7583_vm6, %v1377_v63, %v1381_v53  ;;  %v520_v44 = vmax.f32 %v488_v13, 0.0  ;;  %v8160_v35 = vsel %vm7980_vm2, %v6265_v33, %v3694_v1  ;;  %v1036_v33 = vld [vmem:[#allocation3 + $0x98] sm:$0x1] }
  0xd5   : > { %v489_v38 = vadd.f32 %v7968_v62, %v451_v42  ;;  %v6092_v18 = vcombine.low %v1372_v60, %v1382_v34  ;;  %v8155_v10 = vld [vmem:[#allocation3 + $0x84] sm:$0xf]  ;;  %v6484_v23 = vpack.c.bf16 %v519_v61, %v519_v61  ;;  %v490_v21 = vadd.f32 %v7968_v62, %v452_v32 }
  0xd6   : > { %v1384_v17 = vshrl.u32 %v8155_v10, 16  ;;  %v1387_v55 = vshll.u32 %v8155_v10, 16  ;;  %v6485_v7 = vpack.c.bf16 %v520_v44, %v520_v44  ;;  %v6580_v8 = vunpack.c.l.bf16 %v8153_v46  ;;  %v3605_v44 = vld [vmem:[#allocation3 + $0x48] sm:$0xe] }
  0xd7   : > { %v521_v4 = vmax.f32 %v489_v38, 0.0  ;;  %6780 = vmatprep.mubr.msk.bf16.mxu1 %vm1553_vm7, %v6092_v18  ;;  %v8165_v27 = vld [vmem:[#allocation3 + $0x88] sm:$0xf]  ;;  %v1111_v37 = vld [vmem:[#allocation3 + $0x8c] sm:$0x1]  ;;  %v816_v51 = vshrl.u32 %v6484_v23, 16  ;;  %v6581_v0 = vunpack.c.h.bf16 %v8153_v46 }
  0xd8   : > { %v819_v14 = vshll.u32 %v6484_v23, 16  ;;  %v1386_v31 = vrot.slane %v1384_v17, 4  ;;  %v1389_v11 = vrot.slane %v1387_v55, 5  ;;  %v1393_v29 = vshll.u32 %v8165_v27, 16 }
  0xd9   : > { %v1397_v24 = vshrl.u32 %v8165_v27, 16  ;;  %v1403_v58 = vshll.u32 %v1111_v37, 16  ;;  %v818_v56 = vrot.slane %v816_v51, 7  ;;  %v824_v36 = vshrl.u32 %v6485_v7, 16 }
  0xda   : > { %v827_v50 = vshll.u32 %v6485_v7, 16  ;;  %v1390_v52 = vor.u32 %v1389_v11, %v1386_v31  ;;  %v1395_v25 = vrot.slane %v1393_v29, 5  ;;  %v522_v20 = vmax.f32 %v490_v21, 0.0  ;;  %v1039_v11 = vld [vmem:[#allocation3 + $0x9c] sm:$0xf] }
  0xdb   : > { %v1399_v49 = vrot.slane %v1397_v24, 4  ;;  %v1405_v54 = vrot.slane %v1403_v58, 5  ;;  %v821_v53 = vor.u32 %v819_v14, %v818_v56  ;;  %v822_v2 = vrot.slane %v818_v56, 4  ;;  %v6603_v58 = vld [vmem:[%s7498_s27 + $0x70] sm:$0xff]  }
  0xdc   : > { %v826_v9 = vrot.slane %v824_v36, 7  ;;  %v1391_v16 = vrot.slane %v1390_v52, 4  ;;  %v6486_v13 = vpack.c.bf16 %v521_v4, %v521_v4  ;;  %v6487_v42 = vpack.c.bf16 %v522_v20, %v522_v20 }
  0xdd   : > { %v1400_v63 = vor.u32 %v1399_v49, %v1395_v25  ;;  %v1033_v60 = vsel %vm7651_vm14, %v821_v53, %v1032_v59  ;;  %v3696_v34 = vrot.slane %v3694_v1, 4  ;;  %v6266_v51 = vrot.slane %v3605_v44, 9 }
  0xde   : > { %v829_v61 = vor.u32 %v827_v50, %v826_v9  ;;  %v831_v32 = vrot.slane %v826_v9, 4  ;;  %v1396_v38 = vsel %vm7583_vm6, %v1391_v16, %v1395_v25  ;;  %1034 = vst [vmem:[#allocation3 + $0x90] sm:$0xf] %v1033_v60  ;;  %v833_v18 = vshrl.u32 %v6486_v13, 16  ;;  %v1043_v50 = vld [vmem:[#allocation3 + $0xa4] sm:$0x1] }
  0xdf   : > { %v1401_v46 = vrot.slane %v1400_v63, 4  ;;  %v836_v23 = vshll.u32 %v6486_v13, 16  ;;  %v841_v55 = vshrl.u32 %v6487_v42, 16  ;;  %v844_v7 = vshll.u32 %v6487_v42, 16 }
  0xe0   : > { %v830_v21 = vsel %vm7645_vm13, %v822_v2, %v829_v61  ;;  %v1037_v17 = vsel %vm7657_vm15, %v831_v32, %v1036_v33  ;;  %v835_v4 = vrot.slane %v833_v18, 7  ;;  %v3698_v37 = vsel %vm7980_vm2, %v3696_v34, %v3697_v22  ;;  %v3606_v18 = vld [vmem:[#allocation3 + $0x54] sm:$0xe] }
  0xe1   : > { %v1406_v1 = vsel %vm7583_vm6, %v1401_v46, %v1405_v54  ;;  %1035 = vst.msk [vmem:[#allocation3 + $0x94] sm:$0xf] %vm949_vm10, %v830_v21  ;;  %1038 = vst [vmem:[#allocation3 + $0x98] sm:$0x1] %v1037_v17  ;;  %v843_v31 = vrot.slane %v841_v55, 7  ;;  %v6282_v29 = vcombine.low %v8160_v35, %v3698_v37  ;;  %v3701_v24 = vrot.slane %v7922_v15, 5 }
  0xe2   : > { %v6093_v14 = vcombine.low %v1396_v38, %v1406_v1  ;;  %v838_v56 = vor.u32 %v836_v23, %v835_v4  ;;  %v839_v36 = vrot.slane %v835_v4, 4  ;;  %v3704_v52 = vrot.slane %v7924_v47, 5 }
  0xe3   : > { %v410_v25 = vsub.f32 %v6580_v8, %v7598_v40  ;;  %v846_v19 = vor.u32 %v844_v7, %v843_v31  ;;  %v848_v22 = vrot.slane %v843_v31, 4  ;;  %6938 = vmatprep.mubr.msk.bf16.mxu0 %vm1553_vm7, %v6282_v29  ;;  %v3702_v49 = vsel %vm7980_vm2, %v6266_v51, %v3701_v24 }
  0xe4   : > { %6781 = vmatmul.mubr.msk.bf16.gmra.mrb[20].mxu1 %vm1553_vm7, %v6093_v14  ;;  %v3703_v35 = vrot.slane %v3701_v24, 4  ;;  %v1040_v15 = vsel %vm7651_vm14, %v838_v56, %v1039_v11  ;;  %v411_v59 = vsub.f32 %v6581_v0, %v7598_v40  ;;  %v6584_v47 = vunpack.c.l.bf16 %v6603_v58 }
  0xe5   : > { %v453_v20 = vmul.f32 %v7600_v41, %v410_v25  ;;  %v8199_v54 = vld [vmem:[#allocation3 + $0x90] sm:$0xf]  ;;  %v847_v8 = vsel %vm7645_vm13, %v839_v36, %v846_v19  ;;  %1041 = vst [vmem:[#allocation3 + $0x9c] sm:$0xf] %v1040_v15  ;;  %v1044_v53 = vsel %vm7657_vm15, %v848_v22, %v1043_v50  ;;  %v6585_v9 = vunpack.c.h.bf16 %v6603_v58 }
  0xe6   : > { %v3705_v2 = vsel %vm7980_vm2, %v3703_v35, %v3704_v52  ;;  %v1408_v33 = vshrl.u32 %v8199_v54, 16  ;;  %v1411_v0 = vshll.u32 %v8199_v54, 16  ;;  %1042 = vst.msk [vmem:[#allocation3 + $0xa0] sm:$0xf] %vm949_vm10, %v847_v8  ;;  %1045 = vst [vmem:[#allocation3 + $0xa4] sm:$0x1] %v1044_v53  ;;  %v454_v63 = vmul.f32 %v7600_v41, %v411_v59 }
  0xe7   : > { %v6283_v16 = vcombine.low %v3702_v49, %v3705_v2  ;;  %v491_v61 = vadd.f32 %v7968_v62, %v453_v20  ;;  %v412_v32 = vsub.f32 %v6584_v47, %v7598_v40  ;;  %v413_v60 = vsub.f32 %v6585_v9, %v7598_v40 }
  0xe8   : > { %v8211_v13 = vld [vmem:[#allocation3 + $0x94] sm:$0xf]  ;;  %v1112_v42 = vld [vmem:[#allocation3 + $0x98] sm:$0x1]  ;;  %v1410_v34 = vrot.slane %v1408_v33, 4  ;;  %v1413_v44 = vrot.slane %v1411_v0, 5  ;;  %v492_v21 = vadd.f32 %v7968_v62, %v454_v63 }
  0xe9   : > { %v1417_v38 = vshll.u32 %v8211_v13, 16  ;;  %v1421_v46 = vshrl.u32 %v8211_v13, 16  ;;  %6939 = vmatmul.mubr.msk.bf16.gmra.mrb[8].mxu0 %vm1553_vm7, %v6283_v16  ;;  %v1427_v23 = vshll.u32 %v1112_v42, 16  ;;  %v523_v17 = vmax.f32 %v491_v61, 0.0 }
  0xea   : > { %v455_v55 = vmul.f32 %v7600_v41, %v412_v32  ;;  %v1414_v7 = vor.u32 %v1413_v44, %v1410_v34  ;;  %v456_v37 = vmul.f32 %v7600_v41, %v413_v60  ;;  %v524_v14 = vmax.f32 %v492_v21, 0.0  ;;  %v1046_v34 = vld [vmem:[#allocation3 + $0xa8] sm:$0xf] }
  0xeb   : > { %v1419_v1 = vrot.slane %v1417_v38, 5  ;;  %v1423_v4 = vrot.slane %v1421_v46, 4  ;;  %v1429_v51 = vrot.slane %v1427_v23, 5  ;;  %v6488_v31 = vpack.c.bf16 %v523_v17, %v523_v17 }
  0xec   : > { %v6267_v11 = vrot.slane %v3606_v18, 9  ;;  %v1415_v29 = vrot.slane %v1414_v7, 4  ;;  %v8222_v58 = vld [vmem:[#allocation3 + $0x9c] sm:$0xf]  ;;  %v493_v56 = vadd.f32 %v7968_v62, %v455_v55  ;;  %v3708_v36 = vrot.slane %v7936_v26, 5 }
  0xed   : > { %v1424_v24 = vor.u32 %v1423_v4, %v1419_v1  ;;  %v8226_v50 = vld [vmem:[#allocation3 + $0xa0] sm:$0xf]  ;;  %v1113_v52 = vld [vmem:[#allocation3 + $0xa4] sm:$0x1]  ;;  %v1432_v25 = vshrl.u32 %v8222_v58, 16  ;;  %v1435_v19 = vshll.u32 %v8222_v58, 16  ;;  %v6489_v22 = vpack.c.bf16 %v524_v14, %v524_v14 }
  0xee   : > { %v494_v49 = vadd.f32 %v7968_v62, %v456_v37  ;;  %v1420_v35 = vsel %vm7583_vm6, %v1415_v29, %v1419_v1  ;;  %v1441_v59 = vshll.u32 %v8226_v50, 16  ;;  %v1445_v20 = vshrl.u32 %v8226_v50, 16  ;;  %v1050_v37 = vld [vmem:[#allocation3 + $0xb0] sm:$0x1] }
  0xef   : > { %v1425_v15 = vrot.slane %v1424_v24, 4  ;;  %v1434_v47 = vrot.slane %v1432_v25, 4  ;;  %v1437_v26 = vrot.slane %v1435_v19, 5  ;;  %v1451_v8 = vshll.u32 %v1113_v52, 16  ;;  %v3607_v52 = vld [vmem:[#allocation3 + $0x60] sm:$0xe] }
  0xf0   : > { %v850_v53 = vshrl.u32 %v6488_v31, 16  ;;  %v1443_v9 = vrot.slane %v1441_v59, 5  ;;  %v1447_v33 = vrot.slane %v1445_v20, 4  ;;  %v853_v0 = vshll.u32 %v6488_v31, 16 }
  0xf1   : > { %v1430_v2 = vsel %vm7583_vm6, %v1425_v15, %v1429_v51  ;;  %v1438_v62 = vor.u32 %v1437_v26, %v1434_v47  ;;  %v1453_v63 = vrot.slane %v1451_v8, 5  ;;  %v858_v32 = vshrl.u32 %v6489_v22, 16 }
  0xf2   : > { %v6094_v16 = vcombine.low %v1420_v35, %v1430_v2  ;;  %v852_v42 = vrot.slane %v850_v53, 7  ;;  %v1448_v61 = vor.u32 %v1447_v33, %v1443_v9  ;;  %v861_v60 = vshll.u32 %v6489_v22, 16  ;;  %v2899_v35 = vld [vmem:[#allocation3 + $0x70] sm:$0xf]  ;;  %v3608_v53 = vld [vmem:[#allocation3 + $0x6c] sm:$0xe] }
  0xf3   : > { %v525_v44 = vmax.f32 %v493_v56, 0.0  ;;  %v1439_v38 = vrot.slane %v1438_v62, 4  ;;  %v526_v23 = vmax.f32 %v494_v49, 0.0  ;;  %v860_v17 = vrot.slane %v858_v32, 7  ;;  %v1053_v49 = vld [vmem:[#allocation3 + $0xb4] sm:$0xf] }
  0xf4   : > { %6784 = vmatprep.mubr.msk.bf16.mxu1 %vm1553_vm7, %v6094_v16  ;;  %v855_v46 = vor.u32 %v853_v0, %v852_v42  ;;  %v856_v18 = vrot.slane %v852_v42, 4  ;;  %v1449_v21 = vrot.slane %v1448_v61, 4  ;;  %v3709_v7 = vsel %vm7980_vm2, %v6267_v11, %v3708_v36  ;;  %v1057_v33 = vld [vmem:[#allocation3 + $0xbc] sm:$0x1]  ;;  %v2900_v62 = vld [vmem:[#allocation3 + $0x74] sm:$0x1] }
  0xf5   : > { %v6490_v55 = vpack.c.bf16 %v525_v44, %v525_v44  ;;  %v1444_v1 = vsel %vm7583_vm6, %v1439_v38, %v1443_v9  ;;  %v6491_v51 = vpack.c.bf16 %v526_v23, %v526_v23  ;;  %v3710_v14 = vrot.slane %v3708_v36, 4 }
  0xf6   : > { %v1047_v4 = vsel %vm7651_vm14, %v855_v46, %v1046_v34  ;;  %v1454_v31 = vsel %vm7583_vm6, %v1449_v21, %v1453_v63  ;;  %v863_v29 = vor.u32 %v861_v60, %v860_v17  ;;  %v865_v24 = vrot.slane %v860_v17, 4 }
  0xf7   : > { %1048 = vst [vmem:[#allocation3 + $0xa8] sm:$0xf] %v1047_v4  ;;  %v867_v56 = vshrl.u32 %v6490_v55, 16  ;;  %v6095_v25 = vcombine.low %v1444_v1, %v1454_v31  ;;  %v870_v19 = vshll.u32 %v6490_v55, 16  ;;  %v875_v11 = vshrl.u32 %v6491_v51, 16 }
  0xf8   : > { %v878_v22 = vshll.u32 %v6491_v51, 16  ;;  %v864_v15 = vsel %vm7645_vm13, %v856_v18, %v863_v29  ;;  %v1051_v36 = vsel %vm7657_vm15, %v865_v24, %v1050_v37  ;;  %v3711_v20 = vrot.slane %v7938_v48, 5  ;;  %v8275_v1 = vld [vmem:[#allocation3 + $0x7c] sm:$0xf] }
  0xf9   : > { %v869_v59 = vrot.slane %v867_v56, 7  ;;  %6785 = vmatmul.mubr.msk.bf16.gmra.mrb[24].mxu1 %vm1553_vm7, %v6095_v25  ;;  %1049 = vst.msk [vmem:[#allocation3 + $0xac] sm:$0xf] %vm949_vm10, %v864_v15  ;;  %1052 = vst [vmem:[#allocation3 + $0xb0] sm:$0x1] %v1051_v36  ;;  %v877_v47 = vrot.slane %v875_v11, 7 }
  0xfa   : > { %v6268_v26 = vrot.slane %v3607_v52, 9  ;;  %v3715_v8 = vrot.slane %v8040_v12, 5  ;;  %v3712_v0 = vsel %vm7980_vm2, %v3710_v14, %v3711_v20  ;;  %v3718_v16 = vrot.slane %v8042_v43, 5  ;;  %v3609_v52 = vld [vmem:[#allocation3 + $0x78] sm:$0xe] }
  0xfb   : > { %v872_v2 = vor.u32 %v870_v19, %v869_v59  ;;  %v873_v9 = vrot.slane %v869_v59, 4  ;;  %v880_v48 = vor.u32 %v878_v22, %v877_v47  ;;  %v882_v63 = vrot.slane %v877_v47, 4 }
  0xfc   : > { %v6284_v42 = vcombine.low %v3709_v7, %v3712_v0  ;;  %v3716_v61 = vsel %vm7980_vm2, %v6268_v26, %v3715_v8  ;;  %v3717_v12 = vrot.slane %v3715_v8, 4  ;;  %v6269_v60 = vrot.slane %v3608_v53, 9 }
  0xfd   : > { %v1054_v32 = vsel %vm7651_vm14, %v872_v2, %v1053_v49  ;;  %v3722_v34 = vrot.slane %v2899_v35, 5  ;;  %v881_v38 = vsel %vm7645_vm13, %v873_v9, %v880_v48  ;;  %v1058_v43 = vsel %vm7657_vm15, %v882_v63, %v1057_v33  ;;  %v8297_v2 = vld [vmem:[#allocation3 + $0x80] sm:$0x1]  ;;  %v3610_v9 = vld [vmem:[#allocation3 + $0x84] sm:$0xe] }
  0xfe   : > { %v8261_v44 = vld [vmem:[#allocation3 + $0xa8] sm:$0xf]  ;;  %1055 = vst [vmem:[#allocation3 + $0xb4] sm:$0xf] %v1054_v32  ;;  %6942 = vmatprep.mubr.msk.bf16.mxu0 %vm1553_vm7, %v6284_v42  ;;  %v3725_v46 = vrot.slane %v2900_v62, 5  ;;  %v3719_v21 = vsel %vm7980_vm2, %v3717_v12, %v3718_v16  ;;  %v6270_v36 = vrot.slane %v3609_v52, 9 }
  0xff   : > { %v1456_v18 = vshrl.u32 %v8261_v44, 16  ;;  %v1459_v23 = vshll.u32 %v8261_v44, 16  ;;  %1056 = vst.msk [vmem:[#allocation3 + $0xb8] sm:$0xf] %vm949_vm10, %v881_v38  ;;  %1059 = vst [vmem:[#allocation3 + $0xbc] sm:$0x1] %v1058_v43  ;;  %v6285_v17 = vcombine.low %v3716_v61, %v3719_v21  ;;  %v3723_v55 = vsel %vm7980_vm2, %v6269_v60, %v3722_v34 }
 0x100   : > { %v3724_v7 = vrot.slane %v3722_v34, 4  ;;  %v8277_v4 = vld [vmem:[#allocation3 + $0xac] sm:$0xf]  ;;  %v8279_v37 = vld [vmem:[#allocation3 + $0xb0] sm:$0x1]  ;;  %v3729_v59 = vrot.slane %v8275_v1, 5 }
 0x101   : > { %v1458_v51 = vrot.slane %v1456_v18, 4  ;;  %v1461_v14 = vrot.slane %v1459_v23, 5  ;;  %v1465_v31 = vshll.u32 %v8277_v4, 16  ;;  %v1469_v29 = vshrl.u32 %v8277_v4, 16  ;;  %6943 = vmatmul.mubr.msk.bf16.gmra.mrb[12].mxu0 %vm1553_vm7, %v6285_v17  ;;  %v2905_v62 = vld [vmem:[#allocation3 + $0x88] sm:$0xf] }
 0x102   : > { %v1475_v24 = vshll.u32 %v8279_v37, 16  ;;  %v3726_v56 = vsel %vm7980_vm2, %v3724_v7, %v3725_v46  ;;  %v2906_v48 = vld [vmem:[#allocation3 + $0x8c] sm:$0x1]  ;;  %v3611_v63 = vld [vmem:[#allocation3 + $0x90] sm:$0xe]  ;;  %v3730_v21 = vsel %vm7980_vm2, %v6270_v36, %v3729_v59  ;;  %v3731_v17 = vrot.slane %v3729_v59, 4 }
 0x103   : > { %v1462_v25 = vor.u32 %v1461_v14, %v1458_v51  ;;  %v6286_v19 = vcombine.low %v3723_v55, %v3726_v56  ;;  %v1467_v11 = vrot.slane %v1465_v31, 5  ;;  %v1471_v22 = vrot.slane %v1469_v29, 4  ;;  %v2908_v60 = vld [vmem:[#allocation3 + $0x94] sm:$0xf]  ;;  %v2909_v46 = vld [vmem:[#allocation3 + $0x98] sm:$0x1] }
 0x104   : > { %v1477_v35 = vrot.slane %v1475_v24, 5  ;;  %v3732_v51 = vrot.slane %v8297_v2, 5  ;;  %v6271_v14 = vrot.slane %v3610_v9, 9  ;;  %v3736_v29 = vrot.slane %v2905_v62, 5  ;;  %v3612_v52 = vld [vmem:[#allocation3 + $0x9c] sm:$0xe] }
 0x105   : > { %v1463_v49 = vrot.slane %v1462_v25, 4  ;;  %v8287_v15 = vld [vmem:[#allocation3 + $0xb4] sm:$0xf]  ;;  %6946 = vmatprep.mubr.msk.bf16.mxu0 %vm1553_vm7, %v6286_v19  ;;  %v1472_v20 = vor.u32 %v1471_v22, %v1467_v11  ;;  %v3739_v24 = vrot.slane %v2906_v48, 5  ;;  %v6272_v56 = vrot.slane %v3611_v63, 9 }
 0x106   : > { %v8291_v47 = vld [vmem:[#allocation3 + $0xb8] sm:$0xf]  ;;  %v8293_v26 = vld [vmem:[#allocation3 + $0xbc] sm:$0x1]  ;;  %v1480_v8 = vshrl.u32 %v8287_v15, 16  ;;  %v1483_v53 = vshll.u32 %v8287_v15, 16  ;;  %v3733_v19 = vsel %vm7980_vm2, %v3731_v17, %v3732_v51  ;;  %v3737_v59 = vsel %vm7980_vm2, %v6271_v14, %v3736_v29 }
 0x107   : > { %v1489_v33 = vshll.u32 %v8291_v47, 16  ;;  %v1493_v0 = vshrl.u32 %v8291_v47, 16  ;;  %v1499_v16 = vshll.u32 %v8293_v26, 16  ;;  %v1468_v42 = vsel %vm7583_vm6, %v1463_v49, %v1467_v11  ;;  %v2911_v49 = vld [vmem:[#allocation3 + $0xa0] sm:$0xf]  ;;  %v6604_v17 = vld [vmem:[%s7498_s27 + $0x78] sm:$0xff]  }
 0x108   : > { %v1473_v61 = vrot.slane %v1472_v20, 4  ;;  %v1482_v32 = vrot.slane %v1480_v8, 4  ;;  %v1485_v12 = vrot.slane %v1483_v53, 5  ;;  %v3743_v11 = vrot.slane %v2908_v60, 5  ;;  %v2912_v8 = vld [vmem:[#allocation3 + $0xa4] sm:$0x1] }
 0x109   : > { %v1491_v34 = vrot.slane %v1489_v33, 5  ;;  %v1495_v38 = vrot.slane %v1493_v0, 4  ;;  %v1501_v43 = vrot.slane %v1499_v16, 5  ;;  %v3746_v22 = vrot.slane %v2909_v46, 5  ;;  %v7376_v9 = vld [vmem:[#allocation3] sm:$0xf] }
 0x10a   : > { %v1478_v18 = vsel %vm7583_vm6, %v1473_v61, %v1477_v35  ;;  %v1486_v23 = vor.u32 %v1485_v12, %v1482_v32  ;;  %v6287_v36 = vcombine.low %v3730_v21, %v3733_v19  ;;  %v3738_v20 = vrot.slane %v3736_v29, 4  ;;  %v8318_v33 = vld [vmem:[#allocation3 + $0x4] sm:$0xf]  ;;  %v2914_v62 = vld [vmem:[#allocation3 + $0xac] sm:$0xf] }
 0x10b   : > { %v6096_v55 = vcombine.low %v1468_v42, %v1478_v18  ;;  %v1496_v7 = vor.u32 %v1495_v38, %v1491_v34  ;;  %v6114_v0 = vcombine.low %v7376_v9, %v8318_v33  ;;  %v3745_v16 = vrot.slane %v3743_v11, 4  ;;  %v3613_v32 = vld [vmem:[#allocation3 + $0xa8] sm:$0xe]  ;;  %v2917_v46 = vld [vmem:[#allocation3 + $0xb8] sm:$0xf] }
 0x10c   : > { %v1487_v31 = vrot.slane %v1486_v23, 4  ;;  %6947 = vmatmul.mubr.msk.bf16.gmra.mrb[16].mxu0 %vm1553_vm7, %v6287_v36  ;;  %v3740_v63 = vsel %vm7980_vm2, %v3738_v20, %v3739_v24  ;;  %v6273_v42 = vrot.slane %v3612_v52, 9  ;;  %v3750_v61 = vrot.slane %v2911_v49, 5  ;;  %v3614_v51 = vld [vmem:[#allocation3 + $0xb4] sm:$0xe] }
 0x10d   : > { %6788 = vmatprep.mubr.msk.bf16.mxu1 %vm1553_vm7, %v6096_v55  ;;  %v1497_v25 = vrot.slane %v1496_v7, 4  ;;  %v6288_v12 = vcombine.low %v3737_v59, %v3740_v63  ;;  %v3744_v60 = vsel %vm7980_vm2, %v6272_v56, %v3743_v11  ;;  %v3753_v38 = vrot.slane %v2912_v8, 5  ;;  %v2918_v7 = vld [vmem:[#allocation3 + $0xbc] sm:$0x1]  ;;  %v7378_v11 = vld [vmem:[#allocation3 + $0xc] sm:$0xf] }
 0x10e   : > { %v1492_v35 = vsel %vm7583_vm6, %v1487_v31, %v1491_v34  ;;  %v3747_v34 = vsel %vm7980_vm2, %v3745_v16, %v3746_v22  ;;  %v3751_v18 = vsel %vm7980_vm2, %v6273_v42, %v3750_v61  ;;  %v3752_v23 = vrot.slane %v3750_v61, 4  ;;  %v8336_v22 = vld [vmem:[#allocation3 + $0x10] sm:$0xf]  ;;  %v7380_v20 = vld [vmem:[#allocation3 + $0x18] sm:$0xf] }
 0x10f   : > { %v1502_v53 = vsel %vm7583_vm6, %v1497_v25, %v1501_v43  ;;  %v2915_v43 = vld [vmem:[#allocation3 + $0xb0] sm:$0x1]  ;;  %v3757_v21 = vrot.slane %v2914_v62, 5  ;;  %6950 = vmatprep.mubr.msk.bf16.mxu0 %vm1553_vm7, %v6288_v12  ;;  %v6274_v55 = vrot.slane %v3613_v32, 9  ;;  %v6289_v14 = vcombine.low %v3744_v60, %v3747_v34  ;;  %v8339_v8 = vld [vmem:[#allocation3 + $0x1c] sm:$0xf] }
 0x110   : > { %v6097_v48 = vcombine.low %v1492_v35, %v1502_v53  ;;  %v3754_v31 = vsel %vm7980_vm2, %v3752_v23, %v3753_v38  ;;  %v3760_v29 = vrot.slane %v2915_v43, 5  ;;  %v3764_v24 = vrot.slane %v2917_v46, 5  ;;  %v7382_v16 = vld [vmem:[%s9564_s4 + $0x4] sm:$0x3]  ;;  %v8359_v61 = vld [vmem:[%s9564_s4 + $0x6] sm:$0x3] }
 0x111   : > { %v6290_v56 = vcombine.low %v3751_v18, %v3754_v31  ;;  %v3759_v52 = vrot.slane %v3757_v21, 4  ;;  %v6588_v25 = vunpack.c.l.bf16 %v6604_v17  ;;  %v6589_v19 = vunpack.c.h.bf16 %v6604_v17  ;;  %v7384_v23 = vld [vmem:[#allocation3 + $0x24] sm:$0xf] }
 0x112   : > { %6789 = vmatmul.mubr.msk.bf16.gmra.mrb[28].mxu1 %vm1553_vm7, %v6097_v48  ;;  %v6115_v49 = vcombine.low %v7378_v11, %v8336_v22  ;;  %v6275_v35 = vrot.slane %v3614_v51, 9  ;;  %v3766_v36 = vrot.slane %v3764_v24, 4  ;;  %v3767_v59 = vrot.slane %v2918_v7, 5  ;;  %v8375_v7 = vld [vmem:[#allocation3 + $0x34] sm:$0xf] }
 0x113   : > { %6794 = vmatprep.mubr.msk.bf16.mxu1 %vm1553_vm7, %v6114_v0  ;;  %v6116_v53 = vcombine.low %v7380_v20, %v8339_v8  ;;  %v414_v9 = vsub.f32 %v6588_v25, %v7598_v40  ;;  %v415_v0 = vsub.f32 %v6589_v19, %v7598_v40  ;;  %v2321_v62 = vsel %vm1602_vm3, %v7382_v16, 0  ;;  %v1060_v11 = vld [vmem:[#allocation3 + $0xc0] sm:$0xf]  ;;  %v7390_v16 = vld [vmem:[#allocation3 + $0x48] sm:$0xf] }
 0x114   : > { %6951 = vmatmul.mubr.msk.bf16.gmra.mrb[20].mxu0 %vm1553_vm7, %v6289_v14  ;;  %v3758_v48 = vsel %vm7980_vm2, %v6274_v55, %v3757_v21  ;;  %v3761_v63 = vsel %vm7980_vm2, %v3759_v52, %v3760_v29  ;;  %v3765_v32 = vsel %vm7980_vm2, %v6275_v35, %v3764_v24  ;;  %v3768_v12 = vsel %vm7980_vm2, %v3766_v36, %v3767_v59  ;;  %v8372_v21 = vld [vmem:[#allocation3 + $0x28] sm:$0xf]  ;;  %v7386_v55 = vld [vmem:[#allocation3 + $0x30] sm:$0xf] }
 0x115   : > { %6954 = vmatprep.mubr.msk.bf16.mxu0 %vm1553_vm7, %v6290_v56  ;;  %v457_v42 = vmul.f32 %v7600_v41, %v414_v9  ;;  %v458_v40 = vmul.f32 %v7600_v41, %v415_v0  ;;  %v7383_v41 = vld [vmem:[%s9563_s3] ss:$0 sm:$0xff]  ;;  %v6291_v38 = vcombine.low %v3758_v48, %v3761_v63  ;;  %v6292_v43 = vcombine.low %v3765_v32, %v3768_v12  ;;  %v8382_v9 = vld [vmem:[#allocation3 + $0x40] sm:$0xf] }
 0x116   : > { %v6117_v17 = vcombine.low %v7384_v23, %v8372_v21  ;;  %v6118_v51 = vcombine.low %v7386_v55, %v8375_v7  ;;  %v3148_v32 = vshll.u32 %v8275_v1, 16  ;;  %v3152_v12 = vshrl.u32 %v8275_v1, 16 }
 0x117   : > { %v495_v60 = vadd.f32 %v7383_v41, %v457_v42  ;;  %v496_v34 = vadd.f32 %v7383_v41, %v458_v40  ;;  %v7392_v41 = vld [vmem:[#allocation3 + $0x54] sm:$0xf] }
 0x118   : > { %v8399_v30 = vrot.slane %v3148_v32, 5  ;;  %v6121_v45 = vcombine.low %v7392_v41, %v8401_v39  ;;  %v3154_v23 = vrot.slane %v3152_v12, 4 }
 0x119   : > { %v527_v46 = vmax.f32 %v495_v60, 0.0  ;;  %v528_v18 = vmax.f32 %v496_v34, 0.0 }
 0x11a   : > { %6795 = vmatmul.mubr.msk.bf16.vlgmr.msra.gmra.mrb[0].mxu1 %vm1553_vm7, %v6115_v49  ;;  %v1064_v49 = vld [vmem:[#allocation3 + $0xc8] sm:$0x1]  ;;  %9592 = vst [vmem:[#allocation5_spill] sm:$0xff] %v8399_v30 }
 0x11b   : > { %6827 = vmatpush3.bf16.msra.mxu1 %v2321_v62  ;;  %6798 = vmatprep.mubr.msk.bf16.mxu1 %vm1553_vm7, %v6116_v53  ;;  %v6492_v14 = vpack.c.bf16 %v527_v46, %v527_v46  ;;  %v6493_v31 = vpack.c.bf16 %v528_v18, %v528_v18  ;;  %v7388_v53 = vld [vmem:[#allocation3 + $0x3c] sm:$0xf]  ;;  %v8385_v62 = vld [vmem:[#allocation3 + $0x4c] sm:$0xf]  ;;  %v8404_v46 = vld [vmem:[#allocation3 + $0x64] sm:$0xf] }
 0x11c   : > { %7325 = vmatprep.subr.msk.bf16.mxu1 %vm1602_vm3, %v8359_v61  ;;  %6955 = vmatmul.mubr.msk.bf16.gmra.mrb[24].mxu0 %vm1553_vm7, %v6291_v38  ;;  %v6119_v0 = vcombine.low %v7388_v53, %v8382_v9  ;;  %v6120_v48 = vcombine.low %v7390_v16, %v8385_v62  ;;  %v2061_v53 = vld [vmem:[#allocation3 + $0x18] sm:$0xe]  ;;  %v7398_v16 = vld [vmem:[#allocation3 + $0x8] sm:$0x1] }
 0x11d   : > { %6958 = vmatprep.mubr.msk.bf16.mxu0 %vm1553_vm7, %v6292_v43  ;;  %v884_v29 = vshrl.u32 %v6492_v14, 16  ;;  %v887_v24 = vshll.u32 %v6492_v14, 16  ;;  %v892_v56 = vshrl.u32 %v6493_v31, 16  ;;  %v895_v52 = vshll.u32 %v6493_v31, 16  ;;  %v7394_v43 = vld [vmem:[#allocation3 + $0x60] sm:$0xf] }
 0x11e   : > { %v6122_v18 = vcombine.low %v7394_v43, %v8404_v46  ;;  %v3155_v31 = vor.u32 %v3154_v23, %v8399_v30  ;;  %v7402_v23 = vld [vmem:[#allocation3 + $0x2c] sm:$0x1] }
 0x11f   : > { %v886_v25 = vrot.slane %v884_v29, 7  ;;  %v894_v19 = vrot.slane %v892_v56, 7  ;;  %v3158_v29 = vshll.u32 %v8297_v2, 16  ;;  %v7342_v56 = vld [vmem:[#allocation3 + $0x18] sm:$0xff]   ;;  %v6124_v2 = vcombine.low %v8115_v57, %v8117_v6  ;;  %v7343_v57 = vld [vmem:[#allocation3 + $0x24] sm:$0xff]  }
 0x120   : > { %v6148_v6 = vrot.slane %v2061_v53, 9  ;;  %v9567_v53 = vrot.slane %v8382_v9, 5 }
 0x121   : > { %v889_v35 = vor.u32 %v887_v24, %v886_v25  ;;  %v890_v36 = vrot.slane %v886_v25, 4  ;;  %v897_v59 = vor.u32 %v895_v52, %v894_v19  ;;  %v899_v20 = vrot.slane %v894_v19, 4  ;;  %v2059_v19 = vld [vmem:[#allocation3] sm:$0xe] }
 0x122   : > { %6799 = vmatmul.mubr.msk.bf16.gmra.mrb[4].mxu1 %vm1553_vm7, %v6117_v17  ;;  %v2119_v52 = vrot.slane %v8336_v22, 5  ;;  %v2133_v22 = vrot.slane %v8372_v21, 5  ;;  %v7400_v21 = vld [vmem:[#allocation3 + $0x20] sm:$0x1] }
 0x123   : > { %6802 = vmatprep.mubr.msk.bf16.mxu1 %vm1553_vm7, %v6118_v51  ;;  %v898_v63 = vsel %vm7645_vm13, %v890_v36, %v897_v59  ;;  %v1061_v42 = vsel %vm7651_vm14, %v889_v35, %v1060_v11  ;;  %v1065_v40 = vsel %vm7657_vm15, %v899_v20, %v1064_v49  ;;  %v2112_v11 = vrot.slane %v8318_v33, 5  ;;  %v7396_v49 = vld [vmem:[#allocation3 + $0x6c] sm:$0xf]  ;;  %v8417_v35 = vld [vmem:[#allocation3 + $0x70] sm:$0xf] }
 0x124   : > { %1062 = vst [vmem:[#allocation3 + $0xc0] sm:$0xf] %v1061_v42  ;;  %1063 = vst.msk [vmem:[#allocation3 + $0xc4] sm:$0xf] %vm949_vm10, %v898_v63  ;;  %v6123_v36 = vcombine.low %v7396_v49, %v8417_v35  ;;  %v2060_v59 = vld [vmem:[#allocation3 + $0xc] sm:$0xe] }
 0x125   : > { %1066 = vst [vmem:[#allocation3 + $0xc8] sm:$0x1] %v1065_v40  ;;  %v2126_v20 = vrot.slane %v8339_v8, 5  ;;  %v7399_v33 = vld [vmem:[#allocation3 + $0x14] sm:$0x1]  ;;  %v8425_v42 = vrot.slane %v3155_v31, 4  ;;  %v6126_v31 = vcombine.low %v8199_v54, %v8211_v13 }
 0x126   : > { %v2122_v63 = vrot.slane %v7399_v33, 5  ;;  %v8427_v40 = vrot.slane %v3158_v29, 5  ;;  %v6146_v8 = vrot.slane %v2059_v19, 9  ;;  %v2114_v32 = vrot.slane %v2112_v11, 4  ;;  %v8461_v54 = vld [vmem:[#allocation3 + $0x3c] sm:$0xe] }
 0x127   : > { %9593 = vst [vmem:[#allocation6_spill] sm:$0xff] %v8425_v42  ;;  %v6147_v12 = vrot.slane %v2060_v59, 9  ;;  %v2121_v41 = vrot.slane %v2119_v52, 4  ;;  %v8465_v13 = vsel %vm7980_vm2, %v6148_v6, %v2126_v20  ;;  %v8478_v49 = vld [vmem:[%s9564_s4 + $0x10] sm:$0x3]  ;;  %v8495_v33 = vsel %vm1602_vm3, %v8359_v61, 0 }
 0x128   : > { %9594 = vst [vmem:[#allocation7_spill] sm:$0xff] %v8427_v40  ;;  %v7345_v6 = vld [vmem:[#allocation3 + $0x3c] sm:$0xff]   ;;  %v7408_v29 = vld [vmem:[#allocation3 + $0x74] sm:$0x1] }
 0x129   : > { %v8707_v42 = vld [vmem:[#allocation3 + $0x5c] sm:$0x1] }
 0x12a   : > { %6803 = vmatmul.mubr.msk.bf16.gmra.mrb[8].mxu1 %vm1553_vm7, %v6119_v0  ;;  %v2062_v0 = vld [vmem:[#allocation3 + $0x24] sm:$0xe] }
 0x12b   : > { %6806 = vmatprep.mubr.msk.bf16.mxu1 %vm1553_vm7, %v6120_v48  ;;  %v2920_v60 = vld [vmem:[#allocation3 + $0xc4] sm:$0xf]  ;;  %v3615_v38 = vld [vmem:[#allocation3 + $0xc0] sm:$0xe]  ;;  %v2115_v48 = vrot.slane %v7398_v16, 5 }
 0x12c   : > { %v2921_v34 = vld [vmem:[#allocation3 + $0xc8] sm:$0x1]  ;;  %v6276_v17 = vrot.slane %v3615_v38, 9  ;;  %v3771_v55 = vrot.slane %v2920_v60, 5  ;;  %v2129_v60 = vrot.slane %v7400_v21, 5 }
 0x12d   : > { %v3774_v51 = vrot.slane %v2921_v34, 5  ;;  %v6149_v34 = vrot.slane %v2062_v0, 9  ;;  %v7401_v38 = vld [vmem:[%s9564_s4 + $0xe] sm:$0x3]  ;;  %v4430_v0 = vld [vmem:[#allocation3 + $0x1c] sm:$0xf] }
 0x12e   : > { %v3772_v1 = vsel %vm7980_vm2, %v6276_v17, %v3771_v55  ;;  %v3773_v14 = vrot.slane %v3771_v55, 4  ;;  %v4960_v43 = vsel %vm1602_vm3, %v7401_v38, 0  ;;  %v2136_v17 = vrot.slane %v7402_v23, 5  ;;  %v2063_v55 = vld [vmem:[#allocation3 + $0x30] sm:$0xe]  ;;  %v7346_v38 = vld [vmem:[#allocation3 + $0x48] sm:$0xff]  }
 0x12f   : > { %v8473_v19 = vsel %vm7980_vm2, %v6149_v34, %v2133_v22  ;;  %v4487_v21 = vshll.u32 %v4430_v0, 16  ;;  %v4432_v34 = vld [vmem:[#allocation3 + $0x24] sm:$0xf] }
 0x130   : > { %v3775_v24 = vsel %vm7980_vm2, %v3773_v14, %v3774_v51  ;;  %v2140_v51 = vrot.slane %v8375_v7, 5  ;;  %v7344_v14 = vld [vmem:[#allocation3 + $0x30] sm:$0xff]   ;;  %v8451_v7 = vsel %vm7980_vm2, %v2114_v32, %v2115_v48  ;;  %v6151_v32 = vrot.slane %v8461_v54, 9  ;;  %v7404_v23 = vld [vmem:[#allocation3 + $0x44] sm:$0x1] }
 0x131   : > { %v6293_v25 = vcombine.low %v3772_v1, %v3775_v24  ;;  %v6125_v1 = vcombine.low %v8155_v10, %v8165_v27  ;;  %v8455_v10 = vsel %vm7980_vm2, %v6147_v12, %v2119_v52  ;;  %v8459_v27 = vsel %vm7980_vm2, %v2121_v41, %v2122_v63  ;;  %v8497_v63 = vld [vmem:[#allocation3 + $0x48] sm:$0xe]  ;;  %v8502_v12 = vld [vmem:[#allocation3 + $0x54] sm:$0xe] }
 0x132   : > { %6807 = vmatmul.mubr.msk.bf16.gmra.mrb[12].mxu1 %vm1553_vm7, %v6121_v45  ;;  %v2128_v45 = vrot.slane %v2126_v20, 4  ;;  %v6150_v52 = vrot.slane %v2063_v55, 9  ;;  %v2142_v59 = vrot.slane %v2140_v51, 4  ;;  %v7403_v20 = vld [vmem:[#allocation3 + $0x38] sm:$0x1]  ;;  %v6152_v55 = vrot.slane %v8497_v63, 9 }
 0x133   : > { %6810 = vmatprep.mubr.msk.bf16.mxu1 %vm1553_vm7, %v6122_v18  ;;  %6959 = vmatmul.mubr.msk.bf16.gmra.mrb[28].mxu0 %vm1553_vm7, %v6293_v25  ;;  %v2135_v18 = vrot.slane %v2133_v22, 4  ;;  %v4502_v48 = vshrl.u32 %v4432_v34, 16 }
 0x134   : > { %6964 = vmatprep.mubr.msk.bf16.mxu0 %vm1553_vm7, %v7342_v56  ;;  %v8447_v56 = vsel %vm7980_vm2, %v6146_v8, %v2112_v11  ;;  %v8469_v25 = vsel %vm7980_vm2, %v2128_v45, %v2129_v60  ;;  %v4429_v11 = vld [vmem:[#allocation3 + $0x18] sm:$0xf]  ;;  %v8511_v45 = vsel %vm7980_vm2, %v6150_v52, %v2140_v51  ;;  %v4491_v60 = vshrl.u32 %v4430_v0, 16 }
 0x135   : > { %v4478_v41 = vshrl.u32 %v4429_v11, 16  ;;  %v2154_v51 = vrot.slane %v8385_v62, 5  ;;  %v6153_v52 = vrot.slane %v8502_v12, 9  ;;  %v8526_v8 = vrot.slane %v4487_v21, 5 }
 0x136   : > { %v4493_v63 = vrot.slane %v4491_v60, 4  ;;  %v4505_v62 = vshll.u32 %v4432_v34, 16  ;;  %v2178_v60 = vrot.slane %v7408_v29, 5 }
 0x137   : > { %v4480_v0 = vrot.slane %v4478_v41, 4 }
 0x13a   : > { %6811 = vmatmul.mubr.msk.bf16.gmra.mrb[16].mxu1 %vm1553_vm7, %v6123_v36  ;;  %v8483_v36 = vsel %vm7980_vm2, %v2135_v18, %v2136_v17  ;;  %v2149_v18 = vrot.slane %v9567_v53, 4  ;;  %v2150_v17 = vrot.slane %v7404_v23, 5  ;;  %v4431_v23 = vld [vmem:[#allocation3 + $0x20] sm:$0x1] }
 0x13b   : > { %6814 = vmatprep.mubr.msk.bf16.mxu1 %vm1553_vm7, %v6124_v2  ;;  %6965 = vmatmul.mubr.msk.bf16.vlgmr.msra.gmra.mrb[0].mxu0 %vm1553_vm7, %v7343_v57  ;;  %v2143_v2 = vrot.slane %v7403_v20, 5  ;;  %v4481_v57 = vshll.u32 %v4429_v11, 16  ;;  %v2067_v11 = vld [vmem:[#allocation3 + $0x60] sm:$0xe]  ;;  %v2068_v20 = vld [vmem:[#allocation3 + $0x6c] sm:$0xe] }
 0x13c   : > { %6997 = vmatpush3.bf16.msra.mxu0 %v4960_v43  ;;  %6968 = vmatprep.mubr.msk.bf16.mxu0 %vm1553_vm7, %v7344_v14  ;;  %v7405_v14 = vld [vmem:[#allocation3 + $0x50] sm:$0x1]  ;;  %v6154_v16 = vrot.slane %v2067_v11, 9  ;;  %v4497_v5 = vshll.u32 %v4431_v23, 16  ;;  %v4504_v11 = vrot.slane %v4502_v48, 4 }
 0x13d   : > { %7331 = vmatprep.subr.msk.bf16.mxu0 %vm1602_vm3, %v8478_v49  ;;  %v8516_v43 = vsel %vm7980_vm2, %v2142_v59, %v2143_v2  ;;  %v2157_v54 = vrot.slane %v7405_v14, 5  ;;  %v2168_v59 = vrot.slane %v8404_v46, 5  ;;  %v2175_v2 = vrot.slane %v8417_v35, 5  ;;  %v7406_v14 = vld [vmem:[#allocation3 + $0x5c] sm:$0x1] }
 0x13e   : > { %v4483_v61 = vrot.slane %v4481_v57, 5  ;;  %v2164_v12 = vrot.slane %v7406_v14, 5  ;;  %v2156_v46 = vrot.slane %v2154_v51, 4  ;;  %v7407_v35 = vld [vmem:[#allocation3 + $0x68] sm:$0x1]  ;;  %v6155_v57 = vrot.slane %v2068_v20, 9 }
 0x13f   : > { %v2171_v41 = vrot.slane %v7407_v35, 5  ;;  %v2170_v24 = vrot.slane %v2168_v59, 4  ;;  %v2177_v21 = vrot.slane %v2175_v2, 4  ;;  %v7347_v14 = vld [vmem:[#allocation3 + $0x54] sm:$0xff]   ;;  %v9596_v35 = vcombine.low %v8261_v44, %v8277_v4 }
 0x140   : > { %v4484_v34 = vor.u32 %v4483_v61, %v4480_v0  ;;  %v9597_v20 = vrot.slane %v8382_v9, 5  ;;  %v7348_v61 = vld [vmem:[#allocation3 + $0x60] sm:$0xff]   ;;  %v8553_v0 = vsel %vm7980_vm2, %v6152_v55, %v2154_v51  ;;  %v8557_v44 = vsel %vm7980_vm2, %v2156_v46, %v2157_v54  ;;  %v4435_v54 = vld [vmem:[#allocation3 + $0x30] sm:$0xf]  ;;  %v2069_v23 = vld [vmem:[#allocation3 + $0x78] sm:$0xe] }
 0x141   : > { %v8577_v55 = vsel %vm7980_vm2, %v6155_v57, %v2175_v2  ;;  %v8581_v51 = vsel %vm7980_vm2, %v2177_v21, %v2178_v60  ;;  %v7409_v2 = vld [vmem:[#allocation3 + $0x7c] sm:$0xf]  ;;  %v4529_v46 = vshll.u32 %v4435_v54, 16  ;;  %v6156_v60 = vrot.slane %v2069_v23, 9 }
 0x142   : > { %6815 = vmatmul.mubr.msk.bf16.gmra.mrb[20].mxu1 %vm1553_vm7, %v6125_v1  ;;  %v4433_v1 = vld [vmem:[#allocation3 + $0x28] sm:$0xf]  ;;  %v8543_v29 = vsel %vm7980_vm2, %v6151_v32, %v9597_v20  ;;  %v8565_v32 = vsel %vm7980_vm2, %v6154_v16, %v2168_v59  ;;  %v4485_v16 = vrot.slane %v4484_v34, 4  ;;  %v9599_v34 = vcombine.low %v8287_v15, %v8291_v47  ;;  %v2070_v20 = vld [vmem:[#allocation3 + $0x84] sm:$0xe] }
 0x143   : > { %6818 = vmatprep.mubr.msk.bf16.mxu1 %vm1553_vm7, %v6126_v31  ;;  %v2161_v31 = vrot.slane %v8401_v39, 5  ;;  %6969 = vmatmul.mubr.msk.bf16.gmra.mrb[4].mxu0 %vm1553_vm7, %v7345_v6  ;;  %v4511_v39 = vshll.u32 %v4433_v1, 16  ;;  %v4515_v22 = vshrl.u32 %v4433_v1, 16  ;;  %v9595_v6 = vcombine.low %v8222_v58, %v8226_v50  ;;  %v4438_v21 = vld [vmem:[#allocation3 + $0x3c] sm:$0xf] }
 0x144   : > { %6972 = vmatprep.mubr.msk.bf16.mxu0 %vm1553_vm7, %v7346_v38  ;;  %v4494_v1 = vor.u32 %v4493_v63, %v8526_v8  ;;  %v4507_v38 = vrot.slane %v4505_v62, 5  ;;  %v8547_v58 = vsel %vm7980_vm2, %v2149_v18, %v2150_v17  ;;  %v4434_v18 = vld [vmem:[#allocation3 + $0x2c] sm:$0x1]  ;;  %v8573_v17 = vsel %vm7980_vm2, %v2170_v24, %v2171_v41  ;;  %v8646_v41 = vld [vmem:[#allocation3 + $0x44] sm:$0x1] }
 0x145   : > { %v2163_v53 = vrot.slane %v2161_v31, 4  ;;  %v8549_v50 = vrot.slane %v4511_v39, 5  ;;  %v4517_v48 = vrot.slane %v4515_v22, 4  ;;  %v8561_v9 = vsel %vm7980_vm2, %v6153_v52, %v2161_v31  ;;  %9603 = vst [vmem:[#allocation11_spill] sm:$0xff] %v8646_v41 }
 0x146   : > { %v4495_v52 = vrot.slane %v4494_v1, 4  ;;  %v4499_v31 = vrot.slane %v4497_v5, 5  ;;  %v4508_v59 = vor.u32 %v4507_v38, %v4504_v11  ;;  %v4521_v63 = vshll.u32 %v4434_v18, 16  ;;  %v7349_v1 = vld [vmem:[#allocation3 + $0x6c] sm:$0xff]   ;;  %v7350_v11 = vld [vmem:[#allocation3 + $0x78] sm:$0xff]  }
 0x147   : > { %v8569_v22 = vsel %vm7980_vm2, %v2163_v53, %v2164_v12  ;;  %v4518_v53 = vor.u32 %v4517_v48, %v8549_v50  ;;  %v2182_v62 = vrot.slane %v7409_v2, 5  ;;  %v4526_v39 = vshrl.u32 %v4435_v54, 16  ;;  %v7410_v48 = vld [vmem:[#allocation3 + $0x88] sm:$0xf]  ;;  %v7411_v2 = vld [vmem:[#allocation3 + $0x80] sm:$0x1] }
 0x148   : > { %v4490_v38 = vsel %vm7583_vm6, %v4485_v16, %v8526_v8  ;;  %v9600_v18 = vcombine.low %v8447_v56, %v8451_v7  ;;  %v4523_v54 = vrot.slane %v4521_v63, 5  ;;  %v4531_v8 = vrot.slane %v4529_v46, 5  ;;  %v4441_v63 = vld [vmem:[#allocation3 + $0x48] sm:$0xf] }
 0x149   : > { %v4519_v15 = vrot.slane %v4518_v53, 4  ;;  %v2184_v23 = vrot.slane %v2182_v62, 4  ;;  %v4528_v57 = vrot.slane %v4526_v39, 4  ;;  %v8621_v56 = vsel %vm1602_vm3, %v8478_v49, 0 }
 0x14a   : > { %6819 = vmatmul.mubr.msk.bf16.gmra.mrb[24].mxu1 %vm1553_vm7, %v9595_v6  ;;  %v8598_v6 = vld [vmem:[#allocation3 + $0x34] sm:$0xf]  ;;  %v8625_v7 = vsel %vm7980_vm2, %v6156_v60, %v2182_v62  ;;  %v6157_v53 = vrot.slane %v2070_v20, 9  ;;  %v8637_v62 = vld [vmem:[#allocation3 + $0x38] sm:$0x1]  ;;  %v4553_v60 = vshll.u32 %v4438_v21, 16  ;;  %v9604_v12 = vcombine.low %v8455_v10, %v8459_v27 }
 0x14b   : > { %6822 = vmatprep.mubr.msk.bf16.mxu1 %vm1553_vm7, %v9596_v35  ;;  %6973 = vmatmul.mubr.msk.bf16.gmra.mrb[8].mxu0 %vm1553_vm7, %v7347_v14  ;;  %9598 = vst [vmem:[#allocation8_spill] sm:$0xff] %v8598_v6  ;;  %v4500_v14 = vsel %vm7583_vm6, %v4495_v52, %v4499_v31  ;;  %v4509_v35 = vrot.slane %v4508_v59, 4  ;;  %v4535_v16 = vshll.u32 %v8598_v6, 16  ;;  %v4539_v52 = vshrl.u32 %v8598_v6, 16  ;;  %v8615_v31 = vld [vmem:[#allocation3 + $0x40] sm:$0xf] }
 0x14c   : > { %6976 = vmatprep.mubr.msk.bf16.mxu0 %vm1553_vm7, %v7348_v61  ;;  %v2189_v61 = vrot.slane %v7410_v48, 5  ;;  %9601 = vst [vmem:[#allocation9_spill] sm:$0xff] %v8615_v31  ;;  %v8617_v59 = vcombine.low %v4490_v38, %v4500_v14  ;;  %v7412_v48 = vld [vmem:[#allocation3 + $0x8c] sm:$0x1]  ;;  %9602 = vst [vmem:[#allocation10_spill] sm:$0xff] %v8637_v62  ;;  %v4559_v14 = vshll.u32 %v8615_v31, 16  ;;  %v9607_v30 = vcombine.low %v8511_v45, %v8516_v43 }
 0x14d   : > { %v4514_v39 = vsel %vm7583_vm6, %v4509_v35, %v8549_v50  ;;  %v8630_v38 = vld [vmem:[#allocation3 + $0x4c] sm:$0xf]  ;;  %v4563_v20 = vshrl.u32 %v8615_v31, 16  ;;  %v4524_v50 = vsel %vm7583_vm6, %v4519_v15, %v4523_v54  ;;  %v4532_v35 = vor.u32 %v4531_v8, %v4528_v57  ;;  %v7352_v57 = vld [vmem:[#allocation3 + $0x90] sm:$0xff]  }
 0x14e   : > { %v2191_v46 = vrot.slane %v2189_v61, 4  ;;  %v4583_v5 = vshll.u32 %v8630_v38, 16  ;;  %v8658_v15 = vsel %vm7980_vm2, %v6157_v53, %v2189_v61  ;;  %v4545_v54 = vshll.u32 %v8637_v62, 16 }
 0x14f   : > { %v4555_v10 = vrot.slane %v4553_v60, 5  ;;  %v8666_v27 = vrot.slane %v4559_v14, 5  ;;  %v8669_v61 = vcombine.low %v4514_v39, %v4524_v50  ;;  %v7413_v60 = vld [vmem:[%s9564_s4 + $0x8] sm:$0x3] }
 0x152   : > { %6823 = vmatmul.mubr.msk.bf16.gmra.mrb[28].mxu1 %vm1553_vm7, %v9599_v34  ;;  %v2185_v34 = vrot.slane %v7411_v2, 5  ;;  %v4550_v2 = vshrl.u32 %v4438_v21, 16  ;;  %v4587_v21 = vshrl.u32 %v8630_v38, 16 }
 0x153   : > { %6828 = vmatprep.mubr.msk.bf16.mxu1 %vm1553_vm7, %v9600_v18  ;;  %v2192_v18 = vrot.slane %v7412_v48, 5  ;;  %6977 = vmatmul.mubr.msk.bf16.gmra.mrb[12].mxu0 %vm1553_vm7, %v7349_v1  ;;  %v8644_v48 = vrot.slane %v4535_v16, 5  ;;  %v4541_v1 = vrot.slane %v4539_v52, 4  ;;  %v9605_v16 = vcombine.low %v8465_v13, %v8469_v25  ;;  %v2071_v25 = vld [vmem:[#allocation3 + $0x90] sm:$0xe] }
 0x154   : > { %v8635_v49 = vsel %vm7980_vm2, %v2184_v23, %v2185_v34  ;;  %6980 = vmatprep.mubr.msk.bf16.mxu0 %vm1553_vm7, %v7350_v11  ;;  %v4574_v23 = vshrl.u32 %v4441_v63, 16  ;;  %v4577_v34 = vshll.u32 %v4441_v63, 16  ;;  %v7351_v11 = vld [vmem:[#allocation3 + $0x84] sm:$0xff]   ;;  %v4552_v8 = vrot.slane %v4550_v2, 4  ;;  %v4444_v63 = vld [vmem:[#allocation3 + $0x54] sm:$0xf] }
 0x155   : > { %v4569_v52 = vshll.u32 %v8646_v41, 16  ;;  %v8673_v53 = vsel %vm7980_vm2, %v2191_v46, %v2192_v18  ;;  %v4542_v13 = vor.u32 %v4541_v1, %v8644_v48  ;;  %v8678_v2 = vld [vmem:[#allocation3 + $0x50] sm:$0x1]  ;;  %v4589_v50 = vrot.slane %v4587_v21, 4  ;;  %v8686_v46 = vld [vmem:[#allocation3 + $0x58] sm:$0xf] }
 0x156   : > { %v4576_v14 = vrot.slane %v4574_v23, 4  ;;  %v4579_v39 = vrot.slane %v4577_v34, 5  ;;  %v4547_v18 = vrot.slane %v4545_v54, 5  ;;  %v4598_v1 = vshrl.u32 %v4444_v63, 16  ;;  %v7415_v34 = vld [vmem:[#allocation3 + $0xa0] sm:$0xf] }
 0x157   : > { %v4601_v24 = vshll.u32 %v4444_v63, 16  ;;  %v4556_v41 = vor.u32 %v4555_v10, %v4552_v8  ;;  %v4571_v62 = vrot.slane %v4569_v52, 5  ;;  %v6158_v6 = vrot.slane %v2071_v25, 9  ;;  %v7353_v52 = vld [vmem:[#allocation3 + $0x9c] sm:$0xff]  }
 0x158   : > { %v4543_v23 = vrot.slane %v4542_v13, 4  ;;  %v2203_v21 = vrot.slane %v7415_v34, 5  ;;  %v4607_v54 = vshll.u32 %v8686_v46, 16  ;;  %v4580_v8 = vor.u32 %v4579_v39, %v4576_v14  ;;  %v7416_v13 = vld [vmem:[#allocation3 + $0x98] sm:$0x1] }
 0x159   : > { %v2199_v25 = vrot.slane %v7416_v13, 5  ;;  %v4603_v34 = vrot.slane %v4601_v24, 5  ;;  %v7417_v39 = vld [vmem:[#allocation3 + $0xa4] sm:$0x1]  ;;  %v2073_v24 = vld [vmem:[#allocation3 + $0xa8] sm:$0xe] }
 0x15a   : > { %6829 = vmatmul.mubr.msk.bf16.vlgmr.msra.gmra.mrb[0].mxu1 %vm1553_vm7, %v9604_v12  ;;  %v4565_v12 = vrot.slane %v4563_v20, 4  ;;  %v8684_v20 = vrot.slane %v4583_v5, 5  ;;  %v2072_v5 = vld [vmem:[#allocation3 + $0x9c] sm:$0xe]  ;;  %v4581_v40 = vrot.slane %v4580_v8, 4 }
 0x15b   : > { %6861 = vmatpush3.bf16.msra.mxu1 %v8495_v33  ;;  %6832 = vmatprep.mubr.msk.bf16.mxu1 %vm1553_vm7, %v9605_v16  ;;  %v8675_v33 = vrot.slane %v4532_v35, 4  ;;  %v7414_v35 = vld [vmem:[#allocation3 + $0x94] sm:$0xf]  ;;  %v6159_v14 = vrot.slane %v2072_v5, 9  ;;  %v4447_v8 = vld [vmem:[#allocation3 + $0x60] sm:$0xf] }
 0x15c   : > { %7327 = vmatprep.subr.msk.bf16.mxu1 %vm1602_vm3, %v7413_v60  ;;  %v2196_v16 = vrot.slane %v7414_v35, 5  ;;  %6981 = vmatmul.mubr.msk.bf16.gmra.mrb[16].mxu0 %vm1553_vm7, %v7351_v11  ;;  %v4566_v31 = vor.u32 %v4565_v12, %v8666_v27  ;;  %v4593_v60 = vshll.u32 %v8678_v2, 16  ;;  %v4590_v10 = vor.u32 %v4589_v50, %v8684_v20 }
 0x15d   : > { %6984 = vmatprep.mubr.msk.bf16.mxu0 %vm1553_vm7, %v7352_v57  ;;  %v4538_v11 = vsel %vm7583_vm6, %v8675_v33, %v8644_v48  ;;  %v4611_v12 = vshrl.u32 %v8686_v46, 16  ;;  %v9606_v57 = vcombine.low %v8473_v19, %v8483_v36  ;;  %v4600_v35 = vrot.slane %v4598_v1, 4  ;;  %v7354_v19 = vld [vmem:[#allocation3 + $0xa8] sm:$0xff]  }
 0x15e   : > { %v2198_v63 = vrot.slane %v2196_v16, 4  ;;  %v4557_v48 = vrot.slane %v4556_v41, 4  ;;  %v4567_v33 = vrot.slane %v4566_v31, 4  ;;  %v2206_v50 = vrot.slane %v7417_v39, 5 }
 0x15f   : > { %v4548_v36 = vsel %vm7583_vm6, %v4543_v23, %v4547_v18  ;;  %v4595_v13 = vrot.slane %v4593_v60, 5  ;;  %v8711_v1 = vrot.slane %v4607_v54, 5  ;;  %v4591_v45 = vrot.slane %v4590_v10, 4 }
 0x160   : > { %v4613_v43 = vrot.slane %v4611_v12, 4  ;;  %v8718_v31 = vsel %vm7980_vm2, %v6158_v6, %v2196_v16  ;;  %v8722_v18 = vsel %vm7980_vm2, %v2198_v63, %v2199_v25  ;;  %v4604_v23 = vor.u32 %v4603_v34, %v4600_v35  ;;  %v2074_v63 = vld [vmem:[#allocation3 + $0xb4] sm:$0xe] }
 0x161   : > { %v4562_v5 = vsel %vm7583_vm6, %v4557_v48, %v8666_v27  ;;  %v4617_v60 = vshll.u32 %v8707_v42, 16  ;;  %v6160_v54 = vrot.slane %v2073_v24, 9  ;;  %v8732_v6 = vcombine.low %v4538_v11, %v4548_v36  ;;  %v7355_v25 = vld [vmem:[#allocation3 + $0xb4] sm:$0xff]  }
 0x162   : > { %6833 = vmatmul.mubr.msk.bf16.gmra.mrb[4].mxu1 %vm1553_vm7, %v9606_v57  ;;  %v2205_v57 = vrot.slane %v2203_v21, 4  ;;  %v8736_v16 = vsel %vm7980_vm2, %v6159_v14, %v2203_v21  ;;  %v2213_v27 = vrot.slane %v8279_v37, 5  ;;  %v4596_v12 = vsel %vm7583_vm6, %v4591_v45, %v4595_v13  ;;  %v8773_v14 = vld [vmem:[#allocation3 + $0x68] sm:$0x1]  ;;  %v8779_v13 = vld [vmem:[#allocation3 + $0x70] sm:$0xf] }
 0x163   : > { %6836 = vmatprep.mubr.msk.bf16.mxu1 %vm1553_vm7, %v9607_v30  ;;  %v2210_v30 = vrot.slane %v8277_v4, 5  ;;  %v4572_v4 = vsel %vm7583_vm6, %v4567_v33, %v4571_v62  ;;  %v4586_v62 = vsel %vm7583_vm6, %v4581_v40, %v8684_v20  ;;  %v4614_v11 = vor.u32 %v4613_v43, %v8711_v1  ;;  %v8759_v40 = vld [vmem:[#allocation3 + $0x64] sm:$0xf]  ;;  %9611 = vst [vmem:[#allocation13_spill] sm:$0xff] %v8773_v14  ;;  %v4459_v37 = vld [vmem:[#allocation3 + $0x90] sm:$0xf] }
 0x164   : > { %6985 = vmatmul.mubr.msk.bf16.gmra.mrb[20].mxu0 %vm1553_vm7, %v7353_v52  ;;  %v8740_v10 = vsel %vm7980_vm2, %v2205_v57, %v2206_v50  ;;  %v9608_v21 = vcombine.low %v8543_v29, %v8547_v58  ;;  %v8753_v35 = vcombine.low %v4562_v5, %v4572_v4  ;;  %v8757_v34 = vrot.slane %v4604_v23, 4  ;;  %v4450_v50 = vld [vmem:[#allocation3 + $0x6c] sm:$0xf]  ;;  %9612 = vst [vmem:[#allocation14_spill] sm:$0xff] %v8779_v13  ;;  %v4453_v23 = vld [vmem:[#allocation3 + $0x78] sm:$0xf] }
 0x165   : > { %6988 = vmatprep.mubr.msk.bf16.mxu0 %vm1553_vm7, %v7354_v19  ;;  %v2212_v52 = vrot.slane %v2210_v30, 4  ;;  %v4622_v20 = vshrl.u32 %v4447_v8, 16  ;;  %v9609_v48 = vcombine.low %v8553_v0, %v8557_v44  ;;  %v8767_v58 = vrot.slane %v4617_v60, 5  ;;  %v7356_v19 = vld [vmem:[#allocation3 + $0xc0] sm:$0xff]  }
 0x166   : > { %v8771_v33 = vsel %vm7980_vm2, %v6160_v54, %v2210_v30  ;;  %v4625_v39 = vshll.u32 %v4447_v8, 16  ;;  %v8775_v36 = vcombine.low %v4586_v62, %v4596_v12  ;;  %v6161_v57 = vrot.slane %v2074_v63, 9  ;;  %v8797_v12 = vld [vmem:[#allocation3 + $0x7c] sm:$0xf] }
 0x167   : > { %9610 = vst [vmem:[#allocation12_spill] sm:$0xff] %v8771_v33  ;;  %v2217_v0 = vrot.slane %v8291_v47, 5  ;;  %v8781_v24 = vrot.slane %v4614_v11, 4  ;;  %v8785_v45 = vsel %vm7980_vm2, %v2212_v52, %v2213_v27  ;;  %v4631_v43 = vshll.u32 %v8759_v40, 16  ;;  %9614 = vst [vmem:[#allocation16_spill] sm:$0xff] %v8797_v12 }
 0x168   : > { %9613 = vst [vmem:[#allocation15_spill] sm:$0xff] %v8785_v45  ;;  %v4635_v30 = vshrl.u32 %v8759_v40, 16  ;;  %v4624_v5 = vrot.slane %v4622_v20, 4  ;;  %v4641_v4 = vshll.u32 %v8773_v14, 16  ;;  %v4646_v60 = vshrl.u32 %v4450_v50, 16  ;;  %v7357_v20 = vld [vmem:[#allocation3 + $0xcc] sm:$0xff]  }
 0x169   : > { %v4627_v54 = vrot.slane %v4625_v39, 5  ;;  %v4649_v8 = vshll.u32 %v4450_v50, 16  ;;  %v4655_v27 = vshll.u32 %v8779_v13, 16  ;;  %v4659_v62 = vshrl.u32 %v8779_v13, 16 }
 0x16a   : > { %6837 = vmatmul.mubr.msk.bf16.gmra.mrb[8].mxu1 %vm1553_vm7, %v9608_v21  ;;  %v8804_v52 = vsel %vm7980_vm2, %v6161_v57, %v2217_v0  ;;  %v4670_v63 = vshrl.u32 %v4453_v23, 16  ;;  %v4673_v21 = vshll.u32 %v4453_v23, 16  ;;  %v8810_v39 = vrot.slane %v4631_v43, 5 }
 0x16b   : > { %6840 = vmatprep.mubr.msk.bf16.mxu1 %vm1553_vm7, %v9609_v48  ;;  %v2219_v48 = vrot.slane %v2217_v0, 4  ;;  %v4637_v50 = vrot.slane %v4635_v30, 4  ;;  %v9616_v11 = vcombine.low %v8561_v9, %v8569_v22  ;;  %v8818_v57 = vrot.slane %v4641_v4, 5  ;;  %v8828_v22 = vld [vmem:[#allocation3 + $0x94] sm:$0xf] }
 0x16c   : > { %6989 = vmatmul.mubr.msk.bf16.gmra.mrb[24].mxu0 %vm1553_vm7, %v7355_v25  ;;  %v4456_v25 = vld [vmem:[#allocation3 + $0x84] sm:$0xf]  ;;  %v4648_v23 = vrot.slane %v4646_v60, 4  ;;  %v4679_v29 = vshll.u32 %v8797_v12, 16  ;;  %v4683_v47 = vshrl.u32 %v8797_v12, 16  ;;  %v9617_v0 = vcombine.low %v8565_v32, %v8573_v17  ;;  %9618 = vst [vmem:[#allocation18_spill] sm:$0xff] %v8828_v22 }
 0x16d   : > { %6992 = vmatprep.mubr.msk.bf16.mxu0 %vm1553_vm7, %v7356_v19  ;;  %v8812_v19 = vld [vmem:[#allocation3 + $0x88] sm:$0xf]  ;;  %v4628_v43 = vor.u32 %v4627_v54, %v4624_v5  ;;  %v4651_v30 = vrot.slane %v4649_v8, 5  ;;  %v8826_v41 = vrot.slane %v4655_v27, 5  ;;  %v4661_v9 = vrot.slane %v4659_v62, 4 }
 0x16e   : > { %9615 = vst [vmem:[#allocation17_spill] sm:$0xff] %v8812_v19  ;;  %v8830_v4 = vld [vmem:[#allocation3 + $0x74] sm:$0x1]  ;;  %v4672_v60 = vrot.slane %v4670_v63, 4  ;;  %v4694_v44 = vshrl.u32 %v4456_v25, 16  ;;  %v4697_v12 = vshll.u32 %v4456_v25, 16  ;;  %v4638_v27 = vor.u32 %v4637_v50, %v8810_v39 }
 0x16f   : > { %v4703_v13 = vshll.u32 %v8812_v19, 16  ;;  %v4707_v14 = vshrl.u32 %v8812_v19, 16  ;;  %v4718_v32 = vshrl.u32 %v4459_v37, 16  ;;  %v4721_v17 = vshll.u32 %v4459_v37, 16  ;;  %v8842_v25 = vld [vmem:[#allocation3 + $0x80] sm:$0x1] }
 0x170   : > { %v4685_v5 = vrot.slane %v4683_v47, 4  ;;  %v4727_v54 = vshll.u32 %v8828_v22, 16  ;;  %v4731_v8 = vshrl.u32 %v8828_v22, 16  ;;  %v4652_v62 = vor.u32 %v4651_v30, %v4648_v23  ;;  %v4462_v50 = vld [vmem:[#allocation3 + $0x9c] sm:$0xf] }
 0x171   : > { %v4662_v63 = vor.u32 %v4661_v9, %v8826_v41  ;;  %v4629_v37 = vrot.slane %v4628_v43, 4  ;;  %v4696_v47 = vrot.slane %v4694_v44, 4  ;;  %v4699_v19 = vrot.slane %v4697_v12, 5 }
 0x172   : > { %6841 = vmatmul.mubr.msk.bf16.gmra.mrb[12].mxu1 %vm1553_vm7, %v9616_v11  ;;  %v4675_v11 = vrot.slane %v4673_v21, 5  ;;  %v4665_v21 = vshll.u32 %v8830_v4, 16  ;;  %v8846_v45 = vrot.slane %v4703_v13, 5  ;;  %v4709_v22 = vrot.slane %v4707_v14, 4 }
 0x173   : > { %6844 = vmatprep.mubr.msk.bf16.mxu1 %vm1553_vm7, %v9617_v0  ;;  %v8834_v0 = vrot.slane %v4679_v29, 5  ;;  %v4723_v33 = vrot.slane %v4721_v17, 5  ;;  %v9619_v23 = vcombine.low %v8577_v55, %v8581_v51  ;;  %v4689_v9 = vshll.u32 %v8842_v25, 16  ;;  %v8862_v51 = vld [vmem:[#allocation3 + $0x98] sm:$0x1] }
 0x174   : > { %6993 = vmatmul.mubr.msk.bf16.gmra.mrb[28].mxu0 %vm1553_vm7, %v7357_v20  ;;  %v4676_v29 = vor.u32 %v4675_v11, %v4672_v60  ;;  %v4720_v20 = vrot.slane %v4718_v32, 4  ;;  %v8856_v43 = vrot.slane %v4727_v54, 5  ;;  %v4733_v44 = vrot.slane %v4731_v8, 4 }
 0x175   : > { %6998 = vmatprep.mubr.msk.bf16.mxu0 %vm1553_vm7, %v8617_v59  ;;  %v4686_v30 = vor.u32 %v4685_v5, %v8834_v0  ;;  %v8854_v59 = vld [vmem:[#allocation3 + $0x8c] sm:$0x1]  ;;  %v9620_v14 = vcombine.low %v8625_v7, %v8635_v49  ;;  %v4639_v13 = vrot.slane %v4638_v27, 4  ;;  %v4653_v12 = vrot.slane %v4652_v62, 4  ;;  %v8872_v62 = vld [vmem:[#allocation3 + $0xa0] sm:$0xf] }
 0x176   : > { %v4663_v60 = vrot.slane %v4662_v63, 4  ;;  %v4667_v55 = vrot.slane %v4665_v21, 5  ;;  %v9621_v11 = vrot.slane %v8293_v26, 5  ;;  %v4677_v17 = vrot.slane %v4676_v29, 4 }
 0x177   : > { %v4742_v5 = vshrl.u32 %v4462_v50, 16  ;;  %v4745_v54 = vshll.u32 %v4462_v50, 16  ;;  %v4700_v8 = vor.u32 %v4699_v19, %v4696_v47  ;;  %v4710_v7 = vor.u32 %v4709_v22, %v8846_v45  ;;  %v4465_v50 = vld [vmem:[#allocation3 + $0xa8] sm:$0xf] }
 0x178   : > { %v8868_v32 = vsel %vm7980_vm2, %v2219_v48, %v9621_v11  ;;  %v4713_v49 = vshll.u32 %v8854_v59, 16  ;;  %v4724_v27 = vor.u32 %v4723_v33, %v4720_v20  ;;  %v4687_v63 = vrot.slane %v4686_v30, 4 }
 0x179   : > { %v4691_v21 = vrot.slane %v4689_v9, 5  ;;  %v4737_v26 = vshll.u32 %v8862_v51, 16  ;;  %v4634_v48 = vsel %vm7583_vm6, %v4629_v37, %v8810_v39  ;;  %v4644_v19 = vsel %vm7583_vm6, %v4639_v13, %v8818_v57 }
 0x17a   : > { %6845 = vmatmul.mubr.msk.bf16.gmra.mrb[16].mxu1 %vm1553_vm7, %v9619_v23  ;;  %v4734_v23 = vor.u32 %v4733_v44, %v8856_v43  ;;  %v4658_v33 = vsel %vm7583_vm6, %v4653_v12, %v8826_v41  ;;  %v4668_v22 = vsel %vm7583_vm6, %v4663_v60, %v4667_v55  ;;  %v4747_v29 = vrot.slane %v4745_v54, 5  ;;  %v5159_v55 = vld [vmem:[#allocation3 + $0x48] sm:$0xe] }
 0x17b   : > { %6848 = vmatprep.mubr.msk.bf16.mxu1 %vm1553_vm7, %v9620_v14  ;;  %v4751_v39 = vshll.u32 %v8872_v62, 16  ;;  %v4755_v37 = vshrl.u32 %v8872_v62, 16  ;;  %v8894_v47 = vrot.slane %v4700_v8, 4  ;;  %v8896_v57 = vrot.slane %v4710_v7, 4 }
 0x17c   : > { %6999 = vmatmul.mubr.msk.bf16.vlgmr.msra.gmra.mrb[0].mxu0 %vm1553_vm7, %v8669_v61  ;;  %v4744_v61 = vrot.slane %v4742_v5, 4  ;;  %v8898_v20 = vrot.slane %v4713_v49, 5  ;;  %v8900_v41 = vrot.slane %v4724_v27, 4  ;;  %v4692_v30 = vsel %vm7583_vm6, %v4687_v63, %v4691_v21  ;;  %v5160_v5 = vld [vmem:[#allocation3 + $0x54] sm:$0xe] }
 0x17d   : > { %7031 = vmatpush3.bf16.msra.mxu0 %v8621_v56  ;;  %7002 = vmatprep.mubr.msk.bf16.mxu0 %vm1553_vm7, %v8732_v6  ;;  %v9622_v56 = vcombine.low %v8658_v15, %v8673_v53  ;;  %v4682_v6 = vsel %vm7583_vm6, %v4677_v17, %v8834_v0  ;;  %v8911_v9 = vrot.slane %v4734_v23, 4  ;;  %v8913_v44 = vrot.slane %v4737_v26, 5  ;;  %v5161_v21 = vld [vmem:[#allocation3 + $0x60] sm:$0xe] }
 0x17e   : > { %v9623_v14 = vcombine.low %v8718_v31, %v8722_v18  ;;  %v9624_v15 = vsel %vm7583_vm6, %v8781_v24, %v8767_v58  ;;  %v9625_v53 = vsel %vm7583_vm6, %v8757_v34, %v8711_v1  ;;  %v6178_v13 = vcombine.low %v8804_v52, %v8868_v32  ;;  %v8935_v31 = vld [vmem:[#allocation3 + $0xa4] sm:$0x1]  ;;  %v8937_v18 = vld [vmem:[#allocation3 + $0xac] sm:$0xf]  ;;  %v4471_v32 = vld [vmem:[#allocation3 + $0xc0] sm:$0xf] }
 0x17f   : > { %v6349_v0 = vcombine.low %v9625_v53, %v9624_v15  ;;  %v8931_v12 = vcombine.low %v4634_v48, %v4644_v19  ;;  %v8933_v60 = vcombine.low %v4658_v33, %v4668_v22  ;;  %v4748_v11 = vor.u32 %v4747_v29, %v4744_v61  ;;  %v9628_v15 = vld [vmem:[#allocation15_spill] sm:$0xff] }
 0x180   : > { %v8939_v58 = vrot.slane %v4751_v39, 5  ;;  %v4757_v24 = vrot.slane %v4755_v37, 4  ;;  %v4766_v17 = vshrl.u32 %v4465_v50, 16  ;;  %v8941_v1 = vcombine.low %v4682_v6, %v4692_v30  ;;  %v5162_v39 = vld [vmem:[#allocation3 + $0x6c] sm:$0xe] }
 0x181   : > { %v4706_v34 = vsel %vm7583_vm6, %v8894_v47, %v8846_v45  ;;  %v4716_v54 = vsel %vm7583_vm6, %v8896_v57, %v8898_v20  ;;  %v4730_v8 = vsel %vm7583_vm6, %v8900_v41, %v8856_v43  ;;  %v4740_v7 = vsel %vm7583_vm6, %v8911_v9, %v8913_v44  ;;  %v4474_v20 = vld [vmem:[#allocation3 + $0xcc] sm:$0xf]  ;;  %v9148_v43 = vld [vmem:[#allocation3 + $0xd0] sm:$0xf] }
 0x182   : > { %6849 = vmatmul.mubr.msk.bf16.gmra.mrb[20].mxu1 %vm1553_vm7, %v9622_v56  ;;  %v4761_v49 = vshll.u32 %v8935_v31, 16  ;;  %v4769_v27 = vshll.u32 %v4465_v50, 16  ;;  %v6380_v63 = vrot.slane %v5159_v55, 9  ;;  %v4775_v23 = vshll.u32 %v8937_v18, 16  ;;  %v4468_v56 = vld [vmem:[#allocation3 + $0xb4] sm:$0xf] }
 0x183   : > { %6852 = vmatprep.mubr.msk.bf16.mxu1 %vm1553_vm7, %v9623_v14  ;;  %v5249_v26 = vrot.slane %v8630_v38, 5  ;;  %v5252_v48 = vrot.slane %v8678_v2, 5  ;;  %v6381_v19 = vrot.slane %v5160_v5, 9  ;;  %v8967_v33 = vrot.slane %v4748_v11, 4  ;;  %v9627_v14 = vld [vmem:[#allocation12_spill] sm:$0xff]  ;;  %v9630_v55 = vld [vmem:[#allocation13_spill] sm:$0xff] }
 0x184   : > { %7003 = vmatmul.mubr.msk.bf16.gmra.mrb[4].mxu0 %vm1553_vm7, %v8753_v35  ;;  %v4758_v22 = vor.u32 %v4757_v24, %v8939_v58  ;;  %v8970_v61 = vrot.slane %v4766_v17, 4  ;;  %v5256_v29 = vrot.slane %v8686_v46, 5  ;;  %v5259_v2 = vrot.slane %v8707_v42, 5  ;;  %v8993_v42 = vld [vmem:[#allocation3 + $0xb0] sm:$0x1]  ;;  %v9635_v17 = vld [vmem:[#allocation17_spill] sm:$0xff] }
 0x185   : > { %7006 = vmatprep.mubr.msk.bf16.mxu0 %vm1553_vm7, %v8775_v36  ;;  %v8975_v35 = vsel %vm7980_vm2, %v6380_v63, %v5249_v26  ;;  %v5251_v38 = vrot.slane %v5249_v26, 4  ;;  %v6382_v37 = vrot.slane %v5161_v21, 9  ;;  %v9626_v36 = vcombine.low %v8736_v16, %v8740_v10  ;;  %v9631_v26 = vld [vmem:[#allocation14_spill] sm:$0xff] }
 0x186   : > { %v8982_v50 = vrot.slane %v4769_v27, 5  ;;  %v8986_v46 = vsel %vm7980_vm2, %v6381_v19, %v5256_v29  ;;  %v5258_v6 = vrot.slane %v5256_v29, 4  ;;  %v5263_v30 = vrot.slane %v8759_v40, 5 }
 0x187   : > { %v9629_v53 = vcombine.low %v9627_v14, %v9628_v15  ;;  %v4779_v16 = vshrl.u32 %v8937_v18, 16  ;;  %v8998_v10 = vsel %vm7980_vm2, %v5251_v38, %v5252_v48  ;;  %v5266_v11 = vrot.slane %v9630_v55, 5  ;;  %v5163_v55 = vld [vmem:[#allocation3 + $0x78] sm:$0xe] }
 0x188   : > { %v6383_v24 = vrot.slane %v5162_v39, 9  ;;  %v9005_v40 = vsel %vm7980_vm2, %v5258_v6, %v5259_v2  ;;  %v9009_v5 = vsel %vm7980_vm2, %v6382_v37, %v5263_v30  ;;  %v5265_v27 = vrot.slane %v5263_v30, 4  ;;  %v2901_v37 = vld [vmem:[#allocation3 + $0x78] sm:$0xf] }
 0x189   : > { %v9011_v63 = vrot.slane %v4761_v49, 5  ;;  %v5270_v48 = vrot.slane %v9631_v26, 5  ;;  %v5273_v19 = vrot.slane %v8830_v4, 5  ;;  %v9017_v29 = vrot.slane %v4775_v23, 5  ;;  %v7358_v49 = vld [vmem:[#allocation3 + $0xc] sm:$0xff]  }
 0x18a   : > { %6853 = vmatmul.mubr.msk.bf16.gmra.mrb[24].mxu1 %vm1553_vm7, %v9626_v36  ;;  %v4785_v39 = vshll.u32 %v8993_v42, 16  ;;  %v4790_v38 = vshrl.u32 %v4468_v56, 16  ;;  %v9022_v2 = vsel %vm7980_vm2, %v5265_v27, %v5266_v11  ;;  %v4754_v36 = vsel %vm7583_vm6, %v8967_v33, %v8939_v58  ;;  %v9029_v6 = vld [vmem:[#allocation3 + $0xb8] sm:$0xf]  ;;  %v9633_v4 = vld [vmem:[#allocation6_spill] sm:$0xff] }
 0x18b   : > { %6856 = vmatprep.mubr.msk.bf16.mxu1 %vm1553_vm7, %v9629_v53  ;;  %v9035_v23 = vsel %vm7980_vm2, %v6383_v24, %v5270_v48  ;;  %v5272_v30 = vrot.slane %v5270_v48, 4  ;;  %v4772_v14 = vor.u32 %v8982_v50, %v8970_v61  ;;  %v4781_v15 = vrot.slane %v4779_v16, 4  ;;  %v9632_v24 = vld [vmem:[#allocation7_spill] sm:$0xff]  ;;  %v9154_v33 = vld [vmem:[#allocation3 + $0xc8] sm:$0x1] }
 0x18c   : > { %7007 = vmatmul.mubr.msk.bf16.gmra.mrb[8].mxu0 %vm1553_vm7, %v6349_v0  ;;  %v9039_v0 = vrot.slane %v4758_v22, 4  ;;  %v4793_v53 = vshll.u32 %v4468_v56, 16  ;;  %v3139_v27 = vshrl.u32 %v2901_v37, 16  ;;  %v3142_v26 = vshll.u32 %v2901_v37, 16 }
 0x18d   : > { %7010 = vmatprep.mubr.msk.bf16.mxu0 %vm1553_vm7, %v8931_v12  ;;  %v9045_v11 = vsel %vm7980_vm2, %v5272_v30, %v5273_v19  ;;  %v3161_v48 = vsel %vm7583_vm6, %v9633_v4, %v9632_v24  ;;  %v5164_v12 = vld [vmem:[#allocation3 + $0x84] sm:$0xe]  ;;  %v9055_v22 = vrot.slane %v4785_v39, 5  ;;  %v9057_v61 = vrot.slane %v4790_v38, 4  ;;  %v9634_v4 = vld [vmem:[#allocation16_spill] sm:$0xff] }
 0x18e   : > { %v4799_v50 = vshll.u32 %v9029_v6, 16  ;;  %v3141_v16 = vrot.slane %v3139_v27, 4  ;;  %v3144_v19 = vrot.slane %v3142_v26, 5  ;;  %v6384_v37 = vrot.slane %v5163_v55, 9  ;;  %v7359_v27 = vld [vmem:[#allocation3 + $0x18] sm:$0xff]  }
 0x18f   : > { %v5277_v30 = vrot.slane %v9634_v4, 5  ;;  %v4795_v24 = vrot.slane %v4793_v53, 5  ;;  %v4803_v52 = vshrl.u32 %v9029_v6, 16  ;;  %v6385_v39 = vrot.slane %v5164_v12, 9 }
 0x190   : > { %v3145_v38 = vor.u32 %v3144_v19, %v3141_v16  ;;  %v4764_v53 = vsel %vm7583_vm6, %v9039_v0, %v9011_v63  ;;  %v9075_v55 = vrot.slane %v4772_v14, 4  ;;  %v4782_v26 = vor.u32 %v4781_v15, %v9017_v29  ;;  %v7360_v16 = vld [vmem:[#allocation3 + $0x24] sm:$0xff]   ;;  %v9097_v14 = vld [vmem:[#allocation3 + $0xbc] sm:$0x1] }
 0x191   : > { %v9068_v21 = vsel %vm7980_vm2, %v6384_v37, %v5277_v30  ;;  %v5279_v56 = vrot.slane %v5277_v30, 4  ;;  %v5287_v12 = vrot.slane %v8854_v59, 5  ;;  %v4814_v19 = vshrl.u32 %v4471_v32, 16 }
 0x192   : > { %6857 = vmatmul.mubr.msk.bf16.gmra.mrb[28].mxu1 %vm1553_vm7, %v6178_v13  ;;  %v5280_v13 = vrot.slane %v8842_v25, 5  ;;  %v9078_v25 = vld [vmem:[#allocation3 + $0xc4] sm:$0xf]  ;;  %v3146_v37 = vrot.slane %v3145_v38, 4  ;;  %v9089_v63 = vrot.slane %v4799_v50, 5  ;;  %v4796_v15 = vor.u32 %v4795_v24, %v9057_v61  ;;  %v9637_v61 = vld [vmem:[#allocation4_spill] sm:$0xff] }
 0x193   : > { %6862 = vmatprep.mubr.msk.bf16.mxu1 %vm1553_vm7, %v7358_v49  ;;  %v5284_v49 = vrot.slane %v9635_v17, 5  ;;  %v4817_v17 = vshll.u32 %v4471_v32, 16  ;;  %v4827_v30 = vshrl.u32 %v9078_v25, 16  ;;  %v9636_v32 = vld [vmem:[#allocation5_spill] sm:$0xff]  ;;  %v4783_v50 = vrot.slane %v4782_v26, 4 }
 0x194   : > { %7011 = vmatmul.mubr.msk.bf16.gmra.mrb[12].mxu0 %vm1553_vm7, %v8933_v60  ;;  %v9085_v4 = vsel %vm7980_vm2, %v5279_v56, %v5280_v13  ;;  %v4823_v56 = vshll.u32 %v9078_v25, 16  ;;  %v4805_v13 = vrot.slane %v4803_v52, 4  ;;  %v6353_v24 = vcombine.low %v4706_v34, %v4716_v54  ;;  %v7361_v34 = vld [vmem:[#allocation3 + $0x30] sm:$0xff]   ;;  %v5166_v26 = vld [vmem:[#allocation3 + $0x9c] sm:$0xe] }
 0x195   : > { %7014 = vmatprep.mubr.msk.bf16.mxu0 %vm1553_vm7, %v8941_v1  ;;  %v6401_v0 = vcombine.low %v9068_v21, %v9085_v4  ;;  %v9095_v59 = vsel %vm7980_vm2, %v6385_v39, %v5284_v49  ;;  %v5286_v60 = vrot.slane %v5284_v49, 4  ;;  %v3151_v1 = vsel %vm7583_vm6, %v3146_v37, %v9636_v32  ;;  %v5165_v49 = vld [vmem:[#allocation3 + $0x90] sm:$0xe] }
 0x196   : > { %v9106_v38 = vcombine.low %v3151_v1, %v3161_v48  ;;  %v4816_v48 = vrot.slane %v4814_v19, 4  ;;  %v4819_v52 = vrot.slane %v4817_v17, 5  ;;  %v6354_v57 = vcombine.low %v4730_v8, %v4740_v7 }
 0x197   : > { %v9110_v39 = vsel %vm7980_vm2, %v5286_v60, %v5287_v12  ;;  %v6355_v45 = vcombine.low %v4754_v36, %v4764_v53  ;;  %v4809_v47 = vshll.u32 %v9097_v14, 16  ;;  %v4778_v9 = vsel %vm7583_vm6, %v9075_v55, %v9017_v29  ;;  %v9638_v36 = vld [vmem:[#allocation18_spill] sm:$0xff]  ;;  %v7362_v29 = vld [vmem:[#allocation3 + $0x3c] sm:$0xff]  }
 0x198   : > { %v9146_v44 = vrot.slane %v4823_v56, 5  ;;  %v4829_v54 = vrot.slane %v4827_v30, 4  ;;  %v6386_v41 = vrot.slane %v5165_v49, 9  ;;  %v4788_v58 = vsel %vm7583_vm6, %v4783_v50, %v9055_v22 }
 0x199   : > { %v4797_v8 = vrot.slane %v4796_v15, 4  ;;  %v4806_v7 = vor.u32 %v4805_v13, %v9089_v63  ;;  %v5291_v53 = vrot.slane %v9638_v36, 5  ;;  %v4820_v55 = vor.u32 %v4819_v52, %v4816_v48  ;;  %v9182_v48 = vld [vmem:[#allocation3 + $0xd4] sm:$0x1] }
 0x19a   : > { %6863 = vmatmul.mubr.msk.bf16.vlgmr.msra.gmra.mrb[0].mxu1 %vm1553_vm7, %v7359_v27  ;;  %v6402_v27 = vcombine.low %v9095_v59, %v9110_v39  ;;  %v4838_v12 = vshrl.u32 %v4474_v20, 16  ;;  %v5294_v19 = vrot.slane %v8862_v51, 5  ;;  %v4847_v22 = vshll.u32 %v9148_v43, 16 }
 0x19b   : > { %7065 = vmatpush3.bf16.msra.mxu1 %v9637_v61  ;;  %6866 = vmatprep.mubr.msk.bf16.mxu1 %vm1553_vm7, %v7360_v16  ;;  %v4841_v16 = vshll.u32 %v4474_v20, 16  ;;  %v4851_v17 = vshrl.u32 %v9148_v43, 16  ;;  %v9164_v37 = vsel %vm7980_vm2, %v6386_v41, %v5291_v53  ;;  %v5293_v60 = vrot.slane %v5291_v53, 4  ;;  %v7363_v41 = vld [vmem:[#allocation3 + $0x48] sm:$0xff]  }
 0x19c   : > { %7015 = vmatmul.mubr.msk.bf16.gmra.mrb[16].mxu0 %vm1553_vm7, %v6353_v24  ;;  %v4830_v15 = vor.u32 %v4829_v54, %v9146_v44  ;;  %v4833_v56 = vshll.u32 %v9154_v33, 16  ;;  %v6387_v30 = vrot.slane %v5166_v26, 9  ;;  %v5298_v32 = vrot.slane %v8872_v62, 5  ;;  %v7364_v26 = vld [vmem:[#allocation3 + $0x54] sm:$0xff]  }
 0x19d   : > { %7018 = vmatprep.mubr.msk.bf16.mxu0 %vm1553_vm7, %v6354_v57  ;;  %v6356_v51 = vcombine.low %v4778_v9, %v4788_v58  ;;  %v4811_v1 = vrot.slane %v4809_v47, 5  ;;  %v9172_v50 = vsel %vm7980_vm2, %v5293_v60, %v5294_v19  ;;  %v5301_v13 = vrot.slane %v8935_v31, 5 }
 0x19e   : > { %v4807_v49 = vrot.slane %v4806_v7, 4  ;;  %v6403_v61 = vcombine.low %v9164_v37, %v9172_v50  ;;  %v9180_v24 = vsel %vm7980_vm2, %v6387_v30, %v5298_v32  ;;  %v5300_v62 = vrot.slane %v5298_v32, 4  ;;  %v5167_v7 = vld [vmem:[#allocation3 + $0xa8] sm:$0xe] }
 0x19f   : > { %v4840_v52 = vrot.slane %v4838_v12, 4  ;;  %v4843_v57 = vrot.slane %v4841_v16, 5  ;;  %v9184_v47 = vrot.slane %v4847_v22, 5  ;;  %v4853_v20 = vrot.slane %v4851_v17, 4  ;;  %v5168_v17 = vld [vmem:[#allocation3 + $0xb4] sm:$0xe] }
 0x1a0   : > { %v4831_v31 = vrot.slane %v4830_v15, 4  ;;  %v4835_v9 = vrot.slane %v4833_v56, 5  ;;  %v9188_v54 = vsel %vm7980_vm2, %v5300_v62, %v5301_v13  ;;  %v4802_v36 = vsel %vm7583_vm6, %v4797_v8, %v9089_v63  ;;  %v7418_v63 = vld [vmem:[#allocation3 + $0x1c] sm:$0xf]  ;;  %v7419_v56 = vld [vmem:[#allocation3 + $0x28] sm:$0xf] }
 0x1a1   : > { %v6404_v58 = vcombine.low %v9180_v24, %v9188_v54  ;;  %v4812_v53 = vsel %vm7583_vm6, %v4807_v49, %v4811_v1  ;;  %v4844_v12 = vor.u32 %v4843_v57, %v4840_v52  ;;  %v4854_v16 = vor.u32 %v4853_v20, %v9184_v47  ;;  %v5156_v13 = vld [vmem:[#allocation3 + $0x24] sm:$0xe] }
 0x1a2   : > { %6867 = vmatmul.mubr.msk.bf16.gmra.mrb[4].mxu1 %vm1553_vm7, %v7361_v34  ;;  %v4821_v34 = vrot.slane %v4820_v55, 4  ;;  %v5155_v55 = vld [vmem:[#allocation3 + $0x18] sm:$0xe]  ;;  %v4836_v19 = vsel %vm7583_vm6, %v4831_v31, %v4835_v9  ;;  %v5221_v8 = vrot.slane %v7418_v63, 5  ;;  %v6388_v22 = vrot.slane %v5167_v7, 9  ;;  %v7365_v7 = vld [vmem:[#allocation3 + $0x60] sm:$0xff]  }
 0x1a3   : > { %6870 = vmatprep.mubr.msk.bf16.mxu1 %vm1553_vm7, %v7362_v29  ;;  %v4857_v29 = vshll.u32 %v9182_v48, 16  ;;  %v6357_v60 = vcombine.low %v4802_v36, %v4812_v53  ;;  %v6376_v15 = vrot.slane %v5155_v55, 9  ;;  %v5228_v30 = vrot.slane %v7419_v56, 5 }
 0x1a4   : > { %7019 = vmatmul.mubr.msk.bf16.gmra.mrb[20].mxu0 %vm1553_vm7, %v6355_v45  ;;  %v4826_v45 = vsel %vm7583_vm6, %v4821_v34, %v9146_v44  ;;  %v5305_v44 = vrot.slane %v8937_v18, 5  ;;  %v5308_v49 = vrot.slane %v8993_v42, 5  ;;  %v4845_v52 = vrot.slane %v4844_v12, 4  ;;  %v7366_v18 = vld [vmem:[#allocation3 + $0x6c] sm:$0xff]  }
 0x1a5   : > { %7022 = vmatprep.mubr.msk.bf16.mxu0 %vm1553_vm7, %v6356_v51  ;;  %v4859_v32 = vrot.slane %v4857_v29, 5  ;;  %v7420_v51 = vld [vmem:[#allocation3 + $0x20] sm:$0x1]  ;;  %v6358_v62 = vcombine.low %v4826_v45, %v4836_v19  ;;  %v4855_v57 = vrot.slane %v4854_v16, 4  ;;  %v6389_v20 = vrot.slane %v5168_v17, 9  ;;  %v9639_v45 = vld [vmem:[#allocation8_spill] sm:$0xff] }
 0x1a6   : > { %v5224_v1 = vrot.slane %v7420_v51, 5  ;;  %v5223_v34 = vrot.slane %v5221_v8, 4  ;;  %v9212_v31 = vsel %vm7980_vm2, %v6388_v22, %v5305_v44  ;;  %v5307_v9 = vrot.slane %v5305_v44, 4  ;;  %v7421_v42 = vld [vmem:[#allocation3 + $0x2c] sm:$0x1] }
 0x1a7   : > { %v6377_v36 = vrot.slane %v5156_v13, 9  ;;  %v5230_v53 = vrot.slane %v5228_v30, 4  ;;  %v5231_v29 = vrot.slane %v7421_v42, 5  ;;  %v5235_v19 = vrot.slane %v9639_v45, 5 }
 0x1a8   : > { %v9219_v55 = vsel %vm7980_vm2, %v5307_v9, %v5308_v49  ;;  %v5222_v22 = vsel %vm7980_vm2, %v6376_v15, %v5221_v8  ;;  %v5225_v17 = vsel %vm7980_vm2, %v5223_v34, %v5224_v1  ;;  %v5169_v15 = vld [vmem:[#allocation3 + $0xc0] sm:$0xe]  ;;  %v9640_v49 = vld [vmem:[#allocation10_spill] sm:$0xff]  ;;  %v5158_v9 = vld [vmem:[#allocation3 + $0x3c] sm:$0xe] }
 0x1a9   : > { %v6405_v63 = vcombine.low %v9212_v31, %v9219_v55  ;;  %v5229_v51 = vsel %vm7980_vm2, %v6377_v36, %v5228_v30  ;;  %v5232_v8 = vsel %vm7980_vm2, %v5230_v53, %v5231_v29  ;;  %v6393_v1 = vcombine.low %v5222_v22, %v5225_v17 }
 0x1aa   : > { %6871 = vmatmul.mubr.msk.bf16.gmra.mrb[8].mxu1 %vm1553_vm7, %v7363_v41  ;;  %v5312_v41 = vrot.slane %v9029_v6, 5  ;;  %v4850_v6 = vsel %vm7583_vm6, %v4845_v52, %v9184_v47  ;;  %v5237_v44 = vrot.slane %v5235_v19, 4  ;;  %v2898_v52 = vld [vmem:[#allocation3 + $0x6c] sm:$0xf]  ;;  %v6394_v34 = vcombine.low %v5229_v51, %v5232_v8 }
 0x1ab   : > { %6874 = vmatprep.mubr.msk.bf16.mxu1 %vm1553_vm7, %v7364_v26  ;;  %v5315_v26 = vrot.slane %v9097_v14, 5  ;;  %v4860_v14 = vsel %vm7583_vm6, %v4855_v57, %v4859_v32  ;;  %v5170_v57 = vld [vmem:[#allocation3 + $0xcc] sm:$0xe]  ;;  %v3115_v36 = vshrl.u32 %v2898_v52, 16  ;;  %v5319_v53 = vrot.slane %v9078_v25, 5 }
 0x1ac   : > { %7023 = vmatmul.mubr.msk.bf16.gmra.mrb[24].mxu0 %vm1553_vm7, %v6357_v60  ;;  %v9223_v12 = vsel %vm7980_vm2, %v6389_v20, %v5312_v41  ;;  %v5314_v16 = vrot.slane %v5312_v41, 4  ;;  %v5157_v60 = vld [vmem:[#allocation3 + $0x30] sm:$0xe]  ;;  %v6359_v32 = vcombine.low %v4850_v6, %v4860_v14  ;;  %v7367_v20 = vld [vmem:[#allocation3 + $0x78] sm:$0xff]   ;;  %v6390_v41 = vrot.slane %v5169_v15, 9 }
 0x1ad   : > { %7026 = vmatprep.mubr.msk.bf16.mxu0 %vm1553_vm7, %v6358_v62  ;;  %v6378_v13 = vrot.slane %v5157_v60, 9  ;;  %v5238_v62 = vrot.slane %v9640_v49, 5  ;;  %v6391_v6 = vrot.slane %v5170_v57, 9  ;;  %v6379_v14 = vrot.slane %v5158_v9, 9  ;;  %v7422_v60 = vld [vmem:[#allocation3 + $0x70] sm:$0xf] }
 0x1ae   : > { %v9240_v56 = vsel %vm7980_vm2, %v5314_v16, %v5315_v26  ;;  %v9641_v26 = vld [vmem:[#allocation9_spill] sm:$0xff]  ;;  %v3118_v16 = vshll.u32 %v2898_v52, 16  ;;  %v9262_v45 = vsel %vm7980_vm2, %v6390_v41, %v5319_v53  ;;  %v5321_v22 = vrot.slane %v5319_v53, 4  ;;  %v7369_v52 = vld [vmem:[#allocation3 + $0x90] sm:$0xff]  }
 0x1af   : > { %v6406_v47 = vcombine.low %v9223_v12, %v9240_v56  ;;  %v5242_v30 = vrot.slane %v9641_v26, 5  ;;  %v5236_v42 = vsel %vm7980_vm2, %v6378_v13, %v5235_v19  ;;  %v5239_v29 = vsel %vm7980_vm2, %v5237_v44, %v5238_v62  ;;  %v7370_v9 = vld [vmem:[#allocation3 + $0x9c] sm:$0xff]   ;;  %v2904_v41 = vld [vmem:[#allocation3 + $0x84] sm:$0xf] }
 0x1b0   : > { %v5326_v25 = vrot.slane %v9148_v43, 5  ;;  %v3128_v19 = vshrl.u32 %v7422_v60, 16  ;;  %v5329_v51 = vrot.slane %v9182_v48, 5  ;;  %v6395_v8 = vcombine.low %v5236_v42, %v5239_v29  ;;  %v7423_v42 = vld [vmem:[#allocation3 + $0x74] sm:$0x1] }
 0x1b1   : > { %v5244_v15 = vrot.slane %v5242_v30, 4  ;;  %v3120_v44 = vrot.slane %v3118_v16, 5  ;;  %v5243_v26 = vsel %vm7980_vm2, %v6379_v14, %v5242_v30  ;;  %v3134_v29 = vshll.u32 %v7423_v42, 16  ;;  %v7371_v30 = vld [vmem:[#allocation3 + $0xa8] sm:$0xff]  }
 0x1b2   : > { %6875 = vmatmul.mubr.msk.bf16.gmra.mrb[12].mxu1 %vm1553_vm7, %v7365_v7  ;;  %v7368_v7 = vld [vmem:[#allocation3 + $0x84] sm:$0xff]   ;;  %v9277_v49 = vsel %vm7980_vm2, %v6391_v6, %v5326_v25  ;;  %v5328_v62 = vrot.slane %v5326_v25, 4  ;;  %v3130_v57 = vrot.slane %v3128_v19, 4  ;;  %v3166_v16 = vshll.u32 %v2904_v41, 16  ;;  %v7426_v42 = vld [vmem:[#allocation3 + $0x8c] sm:$0x1] }
 0x1b3   : > { %6878 = vmatprep.mubr.msk.bf16.mxu1 %vm1553_vm7, %v7366_v18  ;;  %v5322_v18 = vrot.slane %v9154_v33, 5  ;;  %v9642_v33 = vld [vmem:[#allocation11_spill] sm:$0xff]  ;;  %v3136_v3 = vrot.slane %v3134_v29, 5  ;;  %v3182_v29 = vshll.u32 %v7426_v42, 16 }
 0x1b4   : > { %7027 = vmatmul.mubr.msk.bf16.gmra.mrb[28].mxu0 %vm1553_vm7, %v6359_v32  ;;  %v5245_v17 = vrot.slane %v9642_v33, 5  ;;  %v3124_v32 = vshll.u32 %v7422_v60, 16  ;;  %v3168_v19 = vrot.slane %v3166_v16, 5  ;;  %v2916_v42 = vld [vmem:[#allocation3 + $0xb4] sm:$0xf] }
 0x1b5   : > { %7032 = vmatprep.mubr.msk.bf16.mxu0 %vm1553_vm7, %v6393_v1  ;;  %v3117_v1 = vrot.slane %v3115_v36, 4  ;;  %v9271_v13 = vsel %vm7980_vm2, %v5321_v22, %v5322_v18  ;;  %v7424_v22 = vld [vmem:[#allocation3 + $0x88] sm:$0xf] }
 0x1b6   : > { %v6407_v43 = vcombine.low %v9262_v45, %v9271_v13  ;;  %v3126_v48 = vrot.slane %v3124_v32, 5  ;;  %v5246_v36 = vsel %vm7980_vm2, %v5244_v15, %v5245_v17  ;;  %v3172_v25 = vshll.u32 %v7424_v22, 16  ;;  %v2907_v32 = vld [vmem:[#allocation3 + $0x90] sm:$0xf] }
 0x1b7   : > { %v3121_v53 = vor.u32 %v3120_v44, %v3117_v1  ;;  %v6396_v6 = vcombine.low %v5243_v26, %v5246_v36  ;;  %v3176_v33 = vshrl.u32 %v7424_v22, 16  ;;  %v3187_v44 = vshrl.u32 %v2907_v32, 16 }
 0x1b8   : > { %v3131_v18 = vor.u32 %v3130_v57, %v3126_v48  ;;  %v9294_v15 = vrot.slane %v3172_v25, 5 }
 0x1b9   : > { %v3122_v60 = vrot.slane %v3121_v53, 4  ;;  %v3178_v1 = vrot.slane %v3176_v33, 4 }
 0x1ba   : > { %6879 = vmatmul.mubr.msk.bf16.gmra.mrb[16].mxu1 %vm1553_vm7, %v7367_v20  ;;  %v9281_v20 = vsel %vm7980_vm2, %v5328_v62, %v5329_v51  ;;  %v3132_v14 = vrot.slane %v3131_v18, 4  ;;  %v2910_v51 = vld [vmem:[#allocation3 + $0x9c] sm:$0xf]  ;;  %v3190_v62 = vshll.u32 %v2907_v32, 16 }
 0x1bb   : > { %6882 = vmatprep.mubr.msk.bf16.mxu1 %vm1553_vm7, %v7368_v7  ;;  %v6408_v7 = vcombine.low %v9277_v49, %v9281_v20  ;;  %v3127_v57 = vsel %vm7583_vm6, %v3122_v60, %v3126_v48  ;;  %v3211_v36 = vshrl.u32 %v2910_v51, 16  ;;  %v3214_v53 = vshll.u32 %v2910_v51, 16 }
 0x1bc   : > { %7033 = vmatmul.mubr.msk.bf16.vlgmr.msra.gmra.mrb[0].mxu0 %vm1553_vm7, %v6394_v34  ;;  %v3163_v34 = vshrl.u32 %v2904_v41, 16  ;;  %v3137_v18 = vsel %vm7583_vm6, %v3132_v14, %v3136_v3  ;;  %v3179_v48 = vor.u32 %v3178_v1, %v9294_v15  ;;  %v3192_v22 = vrot.slane %v3190_v62, 5 }
 0x1bd   : > { %7036 = vmatprep.mubr.msk.bf16.mxu0 %vm1553_vm7, %v6395_v8  ;;  %v7372_v8 = vld [vmem:[#allocation3 + $0xb4] sm:$0xff]   ;;  %v3213_v60 = vrot.slane %v3211_v36, 4  ;;  %v3216_v32 = vrot.slane %v3214_v53, 5  ;;  %v6237_v51 = vcombine.low %v3127_v57, %v3137_v18  ;;  %v3184_v14 = vrot.slane %v3182_v29, 5  ;;  %v7429_v36 = vld [vmem:[#allocation3 + $0xa4] sm:$0x1] }
 0x1be   : > { %v3165_v17 = vrot.slane %v3163_v34, 4  ;;  %v7427_v34 = vld [vmem:[#allocation3 + $0xa0] sm:$0xf]  ;;  %v3230_v53 = vshll.u32 %v7429_v36, 16  ;;  %v7430_v29 = vld [vmem:[#allocation3 + $0xac] sm:$0xf] }
 0x1bf   : > { %v3220_v16 = vshll.u32 %v7427_v34, 16 }
 0x1c1   : > { %v9309_v3 = vrot.slane %v3220_v16, 5  ;;  %v3248_v16 = vshrl.u32 %v7430_v29, 16 }
 0x1c2   : > { %6883 = vmatmul.mubr.msk.bf16.gmra.mrb[20].mxu1 %vm1553_vm7, %v7369_v52  ;;  %v9643_v52 = vcombine.low %v8975_v35, %v8998_v10  ;;  %v3224_v35 = vshrl.u32 %v7427_v34, 16  ;;  %v3169_v10 = vor.u32 %v3168_v19, %v3165_v17  ;;  %v3180_v19 = vrot.slane %v3179_v48, 4 }
 0x1c3   : > { %6886 = vmatprep.mubr.msk.bf16.mxu1 %vm1553_vm7, %v7370_v9  ;;  %v7425_v9 = vld [vmem:[#allocation3 + $0x94] sm:$0xf]  ;;  %v3244_v34 = vshll.u32 %v7430_v29, 16  ;;  %v3259_v48 = vshrl.u32 %v2916_v42, 16 }
 0x1c4   : > { %7037 = vmatmul.mubr.msk.bf16.gmra.mrb[4].mxu0 %vm1553_vm7, %v6396_v6  ;;  %v3196_v41 = vshll.u32 %v7425_v9, 16  ;;  %v3200_v26 = vshrl.u32 %v7425_v9, 16  ;;  %v3189_v6 = vrot.slane %v3187_v44, 4  ;;  %v2913_v9 = vld [vmem:[#allocation3 + $0xa8] sm:$0xf]  ;;  %v3170_v17 = vrot.slane %v3169_v10, 4 }
 0x1c5   : > { %7040 = vmatprep.mubr.msk.bf16.mxu0 %vm1553_vm7, %v9643_v52  ;;  %v3226_v52 = vrot.slane %v3224_v35, 4  ;;  %v7428_v44 = vld [vmem:[#allocation3 + $0x98] sm:$0x1]  ;;  %v3235_v18 = vshrl.u32 %v2913_v9, 16 }
 0x1c6   : > { %v9307_v25 = vrot.slane %v3196_v41, 5  ;;  %v3202_v33 = vrot.slane %v3200_v26, 4  ;;  %v3193_v1 = vor.u32 %v3192_v22, %v3189_v6  ;;  %v3206_v62 = vshll.u32 %v7428_v44, 16  ;;  %v7431_v22 = vld [vmem:[#allocation3 + $0xb8] sm:$0xf] }
 0x1c7   : > { %v9645_v41 = vcombine.low %v9009_v5, %v9022_v2  ;;  %v3217_v26 = vor.u32 %v3216_v32, %v3213_v60  ;;  %v3175_v5 = vsel %vm7583_vm6, %v3170_v17, %v9294_v15  ;;  %v3185_v2 = vsel %vm7583_vm6, %v3180_v19, %v3184_v14 }
 0x1c8   : > { %v3203_v57 = vor.u32 %v3202_v33, %v9307_v25  ;;  %v3194_v35 = vrot.slane %v3193_v1, 4  ;;  %v3208_v10 = vrot.slane %v3206_v62, 5  ;;  %v3262_v6 = vshll.u32 %v2916_v42, 16  ;;  %v7433_v42 = vld [vmem:[#allocation3 + $0xc4] sm:$0xf] }
 0x1c9   : > { %v3268_v33 = vshll.u32 %v7431_v22, 16  ;;  %v3272_v60 = vshrl.u32 %v7431_v22, 16  ;;  %v3246_v44 = vrot.slane %v3244_v34, 5  ;;  %v9646_v15 = vcombine.low %v9035_v23, %v9045_v11  ;;  %v7432_v11 = vld [vmem:[#allocation3 + $0xb0] sm:$0x1] }
 0x1ca   : > { %6887 = vmatmul.mubr.msk.bf16.gmra.mrb[24].mxu1 %vm1553_vm7, %v7371_v30  ;;  %v7373_v30 = vld [vmem:[#allocation3 + $0xc0] sm:$0xff]   ;;  %v3204_v32 = vrot.slane %v3203_v57, 4  ;;  %v6239_v14 = vcombine.low %v3175_v5, %v3185_v2  ;;  %v3261_v17 = vrot.slane %v3259_v48, 4  ;;  %v3264_v19 = vrot.slane %v3262_v6, 5 }
 0x1cb   : > { %6890 = vmatprep.mubr.msk.bf16.mxu1 %vm1553_vm7, %v7372_v8  ;;  %v9644_v8 = vcombine.low %v8986_v46, %v9005_v40  ;;  %v3227_v46 = vor.u32 %v3226_v52, %v9309_v3  ;;  %v3238_v40 = vshll.u32 %v2913_v9, 16  ;;  %v3232_v52 = vrot.slane %v3230_v53, 5  ;;  %v2919_v57 = vld [vmem:[#allocation3 + $0xc0] sm:$0xf] }
 0x1cc   : > { %v3237_v9 = vrot.slane %v3235_v18, 4  ;;  %v3270_v1 = vrot.slane %v3268_v33, 5  ;;  %v3274_v62 = vrot.slane %v3272_v60, 4  ;;  %v3209_v23 = vsel %vm7583_vm6, %v3204_v32, %v3208_v10 }
 0x1cd   : > { %7041 = vmatmul.mubr.msk.bf16.gmra.mrb[8].mxu0 %vm1553_vm7, %v9644_v8  ;;  %v3228_v8 = vrot.slane %v3227_v46, 4  ;;  %v3254_v36 = vshll.u32 %v7432_v11, 16  ;;  %v3286_v18 = vshll.u32 %v2919_v57, 16  ;;  %v3292_v46 = vshll.u32 %v7433_v42, 16 }
 0x1ce   : > { %7044 = vmatprep.mubr.msk.bf16.mxu0 %vm1553_vm7, %v9645_v41  ;;  %v3250_v41 = vrot.slane %v3248_v16, 4  ;;  %v3265_v29 = vor.u32 %v3264_v19, %v3261_v17  ;;  %v3275_v34 = vor.u32 %v3274_v62, %v3270_v1  ;;  %v7434_v16 = vld [vmem:[#allocation3 + $0xbc] sm:$0x1] }
 0x1cf   : > { %v3233_v4 = vsel %vm7583_vm6, %v3228_v8, %v3232_v52  ;;  %v3256_v10 = vrot.slane %v3254_v36, 5  ;;  %v3288_v6 = vrot.slane %v3286_v18, 5  ;;  %v3294_v22 = vrot.slane %v3292_v46, 5 }
 0x1d0   : > { %v3251_v53 = vor.u32 %v3250_v41, %v3246_v44  ;;  %v3266_v60 = vrot.slane %v3265_v29, 4  ;;  %v3276_v32 = vrot.slane %v3275_v34, 4 }
 0x1d2   : > { %6891 = vmatmul.mubr.msk.bf16.gmra.mrb[28].mxu1 %vm1553_vm7, %v7373_v30  ;;  %v3218_v30 = vrot.slane %v3217_v26, 4  ;;  %v3199_v26 = vsel %vm7583_vm6, %v3194_v35, %v9307_v25  ;;  %v3283_v25 = vshrl.u32 %v2919_v57, 16  ;;  %v3271_v37 = vsel %vm7583_vm6, %v3266_v60, %v3270_v1 }
 0x1d3   : > { %6912 = vmatprep.mubr.msk.bf16.mxu1 %vm1553_vm7, %v6237_v51  ;;  %v3240_v51 = vrot.slane %v3238_v40, 5  ;;  %v3296_v40 = vshrl.u32 %v7433_v42, 16  ;;  %v6240_v5 = vcombine.low %v3199_v26, %v3209_v23 }
 0x1d4   : > { %v3223_v21 = vsel %vm7583_vm6, %v3218_v30, %v9309_v3  ;;  %v3252_v3 = vrot.slane %v3251_v53, 4  ;;  %v3285_v48 = vrot.slane %v3283_v25, 4 }
 0x1d5   : > { %7045 = vmatmul.mubr.msk.bf16.gmra.mrb[12].mxu0 %vm1553_vm7, %v9646_v15  ;;  %v6241_v2 = vcombine.low %v3223_v21, %v3233_v4  ;;  %v3298_v33 = vrot.slane %v3296_v40, 4 }
 0x1d6   : > { %7048 = vmatprep.mubr.msk.bf16.mxu0 %vm1553_vm7, %v6401_v0  ;;  %v3241_v0 = vor.u32 %v3240_v51, %v3237_v9  ;;  %v3257_v59 = vsel %vm7583_vm6, %v3252_v3, %v3256_v10  ;;  %v3289_v39 = vor.u32 %v3288_v6, %v3285_v48  ;;  %v7435_v9 = vld [vmem:[#allocation3 + $0xc8] sm:$0x1] }
 0x1d7   : > { %v3302_v8 = vshll.u32 %v7435_v9, 16 }
 0x1d8   : > { %v3242_v35 = vrot.slane %v3241_v0, 4 }
 0x1d9   : > { %v3304_v15 = vrot.slane %v3302_v8, 5 }
 0x1da   : > { %6913 = vmatmul.mubr.msk.bf16.vlgmr.msra.gmra.mrb[16].mxu1 %vm1553_vm7, %v9106_v38  ;;  %v3278_v38 = vshll.u32 %v7434_v16, 16  ;;  %v3247_v52 = vsel %vm7583_vm6, %v3242_v35, %v3246_v44  ;;  %v3290_v44 = vrot.slane %v3289_v39, 4 }
 0x1db   : > { %6916 = vmatprep.mubr.msk.bf16.mxu1 %vm1553_vm7, %v6239_v14 }
 0x1dc   : > { %v3280_v30 = vrot.slane %v3278_v38, 5  ;;  %v3295_v14 = vsel %vm7583_vm6, %v3290_v44, %v3294_v22 }
 0x1dd   : > { %7049 = vmatmul.mubr.msk.bf16.gmra.mrb[16].mxu0 %vm1553_vm7, %v6402_v27  ;;  %v3299_v27 = vor.u32 %v3298_v33, %v3294_v22 }
 0x1de   : > { %7052 = vmatprep.mubr.msk.bf16.mxu0 %vm1553_vm7, %v6403_v61  ;;  %v3281_v50 = vsel %vm7583_vm6, %v3276_v32, %v3280_v30  ;;  %v6242_v61 = vcombine.low %v3247_v52, %v3257_v59 }
 0x1df   : > { %v6243_v51 = vcombine.low %v3271_v37, %v3281_v50  ;;  %v3300_v41 = vrot.slane %v3299_v27, 4 }
 0x1e1   : > { %v3305_v24 = vsel %vm7583_vm6, %v3300_v41, %v3304_v15 }
 0x1e2   : > { %6917 = vmatmul.mubr.msk.bf16.gmra.mrb[20].mxu1 %vm1553_vm7, %v6240_v5  ;;  %v6244_v54 = vcombine.low %v3295_v14, %v3305_v24 }
 0x1e3   : > { %6920 = vmatprep.mubr.msk.bf16.mxu1 %vm1553_vm7, %v6241_v2 }
 0x1e5   : > { %7053 = vmatmul.mubr.msk.bf16.gmra.mrb[20].mxu0 %vm1553_vm7, %v6404_v58 }
 0x1e6   : > { %7056 = vmatprep.mubr.msk.bf16.mxu0 %vm1553_vm7, %v6405_v63 }
 0x1ea   : > { %6921 = vmatmul.mubr.msk.bf16.gmra.mrb[24].mxu1 %vm1553_vm7, %v6242_v61 }
 0x1eb   : > { %6924 = vmatprep.mubr.msk.bf16.mxu1 %vm1553_vm7, %v6243_v51 }
 0x1ed   : > { %7057 = vmatmul.mubr.msk.bf16.gmra.mrb[24].mxu0 %vm1553_vm7, %v6406_v47 }
 0x1ee   : > { %7060 = vmatprep.mubr.msk.bf16.mxu0 %vm1553_vm7, %v6407_v43 }
 0x1f2   : > { %6925 = vmatmul.mubr.msk.bf16.gmra.mrb[28].mxu1 %vm1553_vm7, %v6244_v54 }
 0x1f5   : > { %7061 = vmatmul.mubr.msk.bf16.gmra.mrb[28].mxu0 %vm1553_vm7, %v6408_v7 }
 0x26d   : > { %v6864_v28 = vpop.f32.mrb[0].mxu1 }
 0x26e   : > { %v2715_v58 = vpop.f32.mrb[1].mxu1 }
 0x26f   : > { %v6865_v31 = vpop.f32.mrb[2].mxu1 }
 0x270   : > { %v2718_v55 = vpop.f32.mrb[3].mxu1 }
 0x275   : > { %v6868_v63 = vpop.f32.mrb[4].mxu1 }
 0x276   : > { %v2731_v12 = vpop.f32.mrb[5].mxu1 }
 0x277   : > { %v6869_v56 = vpop.f32.mrb[6].mxu1 }
 0x278   : > { %v2734_v47 = vpop.f32.mrb[7].mxu1 }
 0x27d   : > { %v9394_v17 = vpop.f32.mrb[8].mxu1 }
 0x27e   : > { %v9396_v45 = vpop.f32.mrb[9].mxu1 }
 0x27f   : > { %v9398_v13 = vpop.f32.mrb[10].mxu1 }
 0x280   : > { %v9400_v43 = vpop.f32.mrb[11].mxu1 }
 0x285   : > { %v9402_v19 = vpop.f32.mrb[12].mxu1 }
 0x286   : > { %v9404_v49 = vpop.f32.mrb[13].mxu1 }
 0x287   : > { %v9406_v20 = vpop.f32.mrb[14].mxu1 }
 0x288   : > { %v9408_v7 = vpop.f32.mrb[15].mxu1 }
 0x28f   : > { %v7034_v1 = vpop.f32.mrb[0].mxu0 }
 0x290   : > { %v7066_v62 = vadd.f32 %v7034_v1, %v6864_v28  ;;  %v5466_v57 = vpop.f32.mrb[1].mxu0 }
 0x291   : > { %v7067_v26 = vadd.f32 %v5466_v57, %v2715_v58  ;;  %v7035_v23 = vpop.f32.mrb[2].mxu0 }
 0x292   : > { %v6496_v11 = vpack.c.bf16 %v7066_v62, %v7066_v62  ;;  %v7068_v36 = vadd.f32 %v7035_v23, %v6865_v31  ;;  %v5469_v21 = vpop.f32.mrb[3].mxu0  ;;  %v5701_v25 = vmul.f32 %v7066_v62, %v7066_v62  ;;  %v5629_v38 = vsel %vm1553_vm7, %v7066_v62, 0.0 }
 0x293   : > { %v5699_v4 = vmul.f32 %v7067_v26, %v7067_v26  ;;  %v6494_v0 = vpack.c.bf16 %v7067_v26, %v7067_v26  ;;  %v7069_v53 = vadd.f32 %v5469_v21, %v2718_v55  ;;  %v5626_v42 = vsel %vm1553_vm7, %v7067_v26, 0.0 }
 0x294   : > { %5932 = vst.msk [vmem:[%s7503_s30 + $0x8] sm:$0xf] %vm949_vm10, %v6496_v11  ;;  %v6497_v18 = vpack.c.bf16 %v7068_v36, %v7068_v36  ;;  %v5702_v34 = vmul.f32 %v7068_v36, %v7068_v36  ;;  %v5734_v22 = vsel %vm1553_vm7, %v5701_v25, 0.0  ;;  %v5631_v32 = vsel %vm1553_vm7, %v7068_v36, 0.0 }
 0x295   : > { %5930 = vst.msk [vmem:[%s7503_s30] sm:$0xf] %vm949_vm10, %v6494_v0  ;;  %v5627_v46 = vsel %vm1553_vm7, %v7069_v53, 0.0  ;;  %v5700_v40 = vmul.f32 %v7069_v53, %v7069_v53  ;;  %v6495_v29 = vpack.c.bf16 %v7069_v53, %v7069_v53  ;;  %v5731_v5 = vsel %vm1553_vm7, %v5699_v4, 0.0 }
 0x296   : > { %5933 = vst.msk [vmem:[%s7503_s30 + $0xc] sm:$0xf] %vm949_vm10, %v6497_v18  ;;  %v5628_v16 = vadd.f32 %v5627_v46, %v5626_v42  ;;  %v5736_v30 = vsel %vm1553_vm7, %v5702_v34, 0.0 }
 0x297   : > { %v5732_v2 = vsel %vm1553_vm7, %v5700_v40, 0.0  ;;  %5931 = vst.msk [vmem:[%s7503_s30 + $0x4] sm:$0xf] %vm949_vm10, %v6495_v29  ;;  %v7038_v35 = vpop.f32.mrb[4].mxu0 }
 0x298   : > { %v5630_v3 = vadd.f32 %v5629_v38, %v5628_v16  ;;  %v5733_v10 = vadd.f32 %v5732_v2, %v5731_v5  ;;  %v7070_v48 = vadd.f32 %v7038_v35, %v6868_v63  ;;  %v5482_v6 = vpop.f32.mrb[5].mxu0 }
 0x299   : > { %v7071_v33 = vadd.f32 %v5482_v6, %v2731_v12  ;;  %v7039_v60 = vpop.f32.mrb[6].mxu0 }
 0x29a   : > { %v5735_v52 = vadd.f32 %v5734_v22, %v5733_v10  ;;  %v6500_v59 = vpack.c.bf16 %v7070_v48, %v7070_v48  ;;  %v5485_v39 = vpop.f32.mrb[7].mxu0  ;;  %v5632_v27 = vadd.f32 %v5631_v32, %v5630_v3  ;;  %v7072_v61 = vadd.f32 %v7039_v60, %v6869_v56 }
 0x29b   : > { %v5633_v9 = vsel %vm1553_vm7, %v7071_v33, 0.0  ;;  %v5703_v8 = vmul.f32 %v7071_v33, %v7071_v33  ;;  %v6498_v37 = vpack.c.bf16 %v7071_v33, %v7071_v33  ;;  %v7073_v51 = vadd.f32 %v5485_v39, %v2734_v47 }
 0x29c   : > { %5936 = vst.msk [vmem:[%s7503_s30 + $0x18] sm:$0xf] %vm949_vm10, %v6500_v59  ;;  %v5737_v50 = vadd.f32 %v5736_v30, %v5735_v52  ;;  %v5634_v44 = vadd.f32 %v5633_v9, %v5632_v27  ;;  %v5705_v15 = vmul.f32 %v7070_v48, %v7070_v48  ;;  %v6501_v24 = vpack.c.bf16 %v7072_v61, %v7072_v61 }
 0x29d   : > { %v5738_v41 = vsel %vm1553_vm7, %v5703_v8, 0.0  ;;  %5934 = vst.msk [vmem:[%s7503_s30 + $0x10] sm:$0xf] %vm949_vm10, %v6498_v37  ;;  %v5635_v54 = vsel %vm1553_vm7, %v7073_v51, 0.0  ;;  %v5704_v28 = vmul.f32 %v7073_v51, %v7073_v51  ;;  %v6499_v58 = vpack.c.bf16 %v7073_v51, %v7073_v51 }
 0x29e   : > { %v5739_v14 = vadd.f32 %v5738_v41, %v5737_v50  ;;  %5937 = vst.msk [vmem:[%s7503_s30 + $0x1c] sm:$0xf] %vm949_vm10, %v6501_v24  ;;  %v5636_v55 = vadd.f32 %v5635_v54, %v5634_v44  ;;  %v5637_v56 = vsel %vm1553_vm7, %v7070_v48, 0.0  ;;  %v5706_v47 = vmul.f32 %v7072_v61, %v7072_v61 }
 0x29f   : > { %v5740_v1 = vsel %vm1553_vm7, %v5704_v28, 0.0  ;;  %5935 = vst.msk [vmem:[%s7503_s30 + $0x14] sm:$0xf] %vm949_vm10, %v6499_v58  ;;  %v5742_v26 = vsel %vm1553_vm7, %v5705_v15, 0.0  ;;  %v5639_v23 = vsel %vm1553_vm7, %v7072_v61, 0.0 }
 0x2a0   : > { %v7042_v31 = vpop.f32.mrb[8].mxu0  ;;  %v5638_v11 = vadd.f32 %v5637_v56, %v5636_v55  ;;  %v5741_v36 = vadd.f32 %v5740_v1, %v5739_v14 }
 0x2a1   : > { %v7074_v63 = vadd.f32 %v7042_v31, %v9394_v17  ;;  %v5498_v12 = vpop.f32.mrb[9].mxu0 }
 0x2a2   : > { %v7075_v62 = vadd.f32 %v5498_v12, %v9396_v45  ;;  %v7043_v57 = vpop.f32.mrb[10].mxu0  ;;  %v5743_v25 = vadd.f32 %v5742_v26, %v5741_v36  ;;  %v5640_v18 = vadd.f32 %v5639_v23, %v5638_v11  ;;  %v5744_v45 = vsel %vm1553_vm7, %v5706_v47, 0.0 }
 0x2a3   : > { %v5501_v17 = vpop.f32.mrb[11].mxu0  ;;  %v6504_v21 = vpack.c.bf16 %v7074_v63, %v7074_v63  ;;  %v7076_v42 = vadd.f32 %v7043_v57, %v9398_v13  ;;  %v5709_v29 = vmul.f32 %v7074_v63, %v7074_v63  ;;  %v5645_v22 = vsel %vm1553_vm7, %v7074_v63, 0.0 }
 0x2a4   : > { %v5641_v4 = vsel %vm1553_vm7, %v7075_v62, 0.0  ;;  %v5707_v0 = vmul.f32 %v7075_v62, %v7075_v62  ;;  %v6502_v53 = vpack.c.bf16 %v7075_v62, %v7075_v62  ;;  %v7077_v40 = vadd.f32 %v5501_v17, %v9400_v43 }
 0x2a5   : > { %5940 = vst.msk [vmem:[%s7503_s30 + $0x28] sm:$0xf] %vm949_vm10, %v6504_v21  ;;  %v5642_v34 = vadd.f32 %v5641_v4, %v5640_v18  ;;  %v5745_v16 = vadd.f32 %v5744_v45, %v5743_v25  ;;  %v6505_v38 = vpack.c.bf16 %v7076_v42, %v7076_v42  ;;  %v5710_v33 = vmul.f32 %v7076_v42, %v7076_v42 }
 0x2a6   : > { %v5746_v46 = vsel %vm1553_vm7, %v5707_v0, 0.0  ;;  %5938 = vst.msk [vmem:[%s7503_s30 + $0x20] sm:$0xf] %vm949_vm10, %v6502_v53  ;;  %v5643_v5 = vsel %vm1553_vm7, %v7077_v40, 0.0  ;;  %v5708_v2 = vmul.f32 %v7077_v40, %v7077_v40  ;;  %v6503_v13 = vpack.c.bf16 %v7077_v40, %v7077_v40 }
 0x2a7   : > { %v5747_v3 = vadd.f32 %v5746_v46, %v5745_v16  ;;  %v5644_v10 = vadd.f32 %v5643_v5, %v5642_v34  ;;  %5941 = vst.msk [vmem:[%s7503_s30 + $0x2c] sm:$0xf] %vm949_vm10, %v6505_v38  ;;  %v5750_v30 = vsel %vm1553_vm7, %v5709_v29, 0.0  ;;  %v5647_v52 = vsel %vm1553_vm7, %v7076_v42, 0.0 }
 0x2a8   : > { %v7046_v35 = vpop.f32.mrb[12].mxu0  ;;  %v5748_v43 = vsel %vm1553_vm7, %v5708_v2, 0.0  ;;  %5939 = vst.msk [vmem:[%s7503_s30 + $0x24] sm:$0xf] %vm949_vm10, %v6503_v13  ;;  %v5752_v15 = vsel %vm1553_vm7, %v5710_v33, 0.0 }
 0x2a9   : > { %v7078_v48 = vadd.f32 %v7046_v35, %v9402_v19  ;;  %v5514_v6 = vpop.f32.mrb[13].mxu0  ;;  %v5646_v59 = vadd.f32 %v5645_v22, %v5644_v10  ;;  %v5749_v19 = vadd.f32 %v5748_v43, %v5747_v3 }
 0x2aa   : > { %v7079_v60 = vadd.f32 %v5514_v6, %v9404_v49  ;;  %v7047_v32 = vpop.f32.mrb[14].mxu0 }
 0x2ab   : > { %v5517_v39 = vpop.f32.mrb[15].mxu0  ;;  %v6508_v9 = vpack.c.bf16 %v7078_v48, %v7078_v48  ;;  %v5751_v51 = vadd.f32 %v5750_v30, %v5749_v19  ;;  %v5648_v44 = vadd.f32 %v5647_v52, %v5646_v59  ;;  %v7080_v49 = vadd.f32 %v7047_v32, %v9406_v20 }
 0x2ac   : > { %v5649_v8 = vsel %vm1553_vm7, %v7079_v60, 0.0  ;;  %v5711_v37 = vmul.f32 %v7079_v60, %v7079_v60  ;;  %v6506_v50 = vpack.c.bf16 %v7079_v60, %v7079_v60  ;;  %v7081_v24 = vadd.f32 %v5517_v39, %v9408_v7 }
 0x2ad   : > { %v6914_v27 = vpop.f32.mrb[16].mxu1  ;;  %5944 = vst.msk [vmem:[%s7503_s30 + $0x38] sm:$0xf] %vm949_vm10, %v6508_v9  ;;  %v5713_v28 = vmul.f32 %v7078_v48, %v7078_v48  ;;  %v5650_v58 = vadd.f32 %v5649_v8, %v5648_v44  ;;  %v5753_v31 = vadd.f32 %v5752_v15, %v5751_v51  ;;  %v6509_v55 = vpack.c.bf16 %v7080_v49, %v7080_v49 }
 0x2ae   : > { %v3505_v61 = vpop.f32.mrb[17].mxu1  ;;  %v5754_v14 = vsel %vm1553_vm7, %v5711_v37, 0.0  ;;  %5942 = vst.msk [vmem:[%s7503_s30 + $0x30] sm:$0xf] %vm949_vm10, %v6506_v50  ;;  %v5651_v20 = vsel %vm1553_vm7, %v7081_v24, 0.0  ;;  %v5712_v63 = vmul.f32 %v7081_v24, %v7081_v24  ;;  %v6507_v12 = vpack.c.bf16 %v7081_v24, %v7081_v24 }
 0x2af   : > { %v6915_v41 = vpop.f32.mrb[18].mxu1  ;;  %v5755_v47 = vadd.f32 %v5754_v14, %v5753_v31  ;;  %v5652_v1 = vadd.f32 %v5651_v20, %v5650_v58  ;;  %v5653_v26 = vsel %vm1553_vm7, %v7078_v48, 0.0  ;;  %v5714_v23 = vmul.f32 %v7080_v49, %v7080_v49  ;;  %5945 = vst.msk [vmem:[%s7503_s30 + $0x3c] sm:$0xf] %vm949_vm10, %v6509_v55 }
 0x2b0   : > { %v3508_v54 = vpop.f32.mrb[19].mxu1  ;;  %v7050_v56 = vpop.f32.mrb[16].mxu0  ;;  %v5756_v7 = vsel %vm1553_vm7, %v5712_v63, 0.0  ;;  %5943 = vst.msk [vmem:[%s7503_s30 + $0x34] sm:$0xf] %vm949_vm10, %v6507_v12  ;;  %v5758_v17 = vsel %vm1553_vm7, %v5713_v28, 0.0 }
 0x2b1   : > { %v7082_v62 = vadd.f32 %v7050_v56, %v6914_v27  ;;  %v5530_v57 = vpop.f32.mrb[17].mxu0  ;;  %v5655_v21 = vsel %vm1553_vm7, %v7080_v49, 0.0  ;;  %v5654_v4 = vadd.f32 %v5653_v26, %v5652_v1  ;;  %v5757_v0 = vadd.f32 %v5756_v7, %v5755_v47 }
 0x2b2   : > { %v7083_v11 = vadd.f32 %v5530_v57, %v3505_v61  ;;  %v7051_v36 = vpop.f32.mrb[18].mxu0  ;;  %v5760_v5 = vsel %vm1553_vm7, %v5714_v23, 0.0 }
 0x2b3   : > { %v5533_v53 = vpop.f32.mrb[19].mxu0  ;;  %v6512_v18 = vpack.c.bf16 %v7082_v62, %v7082_v62  ;;  %v5759_v29 = vadd.f32 %v5758_v17, %v5757_v0  ;;  %v5656_v34 = vadd.f32 %v5655_v21, %v5654_v4  ;;  %v7084_v16 = vadd.f32 %v7051_v36, %v6915_v41 }
 0x2b4   : > { %v5657_v42 = vsel %vm1553_vm7, %v7083_v11, 0.0  ;;  %v5715_v45 = vmul.f32 %v7083_v11, %v7083_v11  ;;  %v6510_v46 = vpack.c.bf16 %v7083_v11, %v7083_v11  ;;  %v7085_v13 = vadd.f32 %v5533_v53, %v3508_v54 }
 0x2b5   : > { %v6918_v25 = vpop.f32.mrb[20].mxu1  ;;  %5948 = vst.msk [vmem:[%s7503_s30 + $0x48] sm:$0xf] %vm949_vm10, %v6512_v18  ;;  %v5717_v3 = vmul.f32 %v7082_v62, %v7082_v62  ;;  %v5658_v10 = vadd.f32 %v5657_v42, %v5656_v34  ;;  %v5761_v48 = vadd.f32 %v5760_v5, %v5759_v29  ;;  %v6513_v6 = vpack.c.bf16 %v7084_v16, %v7084_v16 }
 0x2b6   : > { %v3521_v40 = vpop.f32.mrb[21].mxu1  ;;  %v5762_v2 = vsel %vm1553_vm7, %v5715_v45, 0.0  ;;  %5946 = vst.msk [vmem:[%s7503_s30 + $0x40] sm:$0xf] %vm949_vm10, %v6510_v46  ;;  %v5659_v22 = vsel %vm1553_vm7, %v7085_v13, 0.0  ;;  %v5716_v33 = vmul.f32 %v7085_v13, %v7085_v13  ;;  %v6511_v43 = vpack.c.bf16 %v7085_v13, %v7085_v13 }
 0x2b7   : > { %v6919_v38 = vpop.f32.mrb[22].mxu1  ;;  %v5763_v32 = vadd.f32 %v5762_v2, %v5761_v48  ;;  %v5660_v30 = vadd.f32 %v5659_v22, %v5658_v10  ;;  %v5661_v19 = vsel %vm1553_vm7, %v7082_v62, 0.0  ;;  %v5718_v39 = vmul.f32 %v7084_v16, %v7084_v16  ;;  %5949 = vst.msk [vmem:[%s7503_s30 + $0x4c] sm:$0xf] %vm949_vm10, %v6513_v6 }
 0x2b8   : > { %v3524_v35 = vpop.f32.mrb[23].mxu1  ;;  %v7054_v60 = vpop.f32.mrb[20].mxu0  ;;  %v5764_v27 = vsel %vm1553_vm7, %v5716_v33, 0.0  ;;  %5947 = vst.msk [vmem:[%s7503_s30 + $0x44] sm:$0xf] %vm949_vm10, %v6511_v43  ;;  %v5766_v37 = vsel %vm1553_vm7, %v5717_v3, 0.0 }
 0x2b9   : > { %v7086_v52 = vadd.f32 %v7054_v60, %v6918_v25  ;;  %v5546_v59 = vpop.f32.mrb[21].mxu0  ;;  %v5663_v50 = vsel %vm1553_vm7, %v7084_v16, 0.0  ;;  %v5662_v61 = vadd.f32 %v5661_v19, %v5660_v30  ;;  %v5765_v51 = vadd.f32 %v5764_v27, %v5763_v32 }
 0x2ba   : > { %v7087_v9 = vadd.f32 %v5546_v59, %v3521_v40  ;;  %v7055_v8 = vpop.f32.mrb[22].mxu0  ;;  %v5768_v20 = vsel %vm1553_vm7, %v5718_v39, 0.0 }
 0x2bb   : > { %v5549_v44 = vpop.f32.mrb[23].mxu0  ;;  %v6516_v41 = vpack.c.bf16 %v7086_v52, %v7086_v52  ;;  %v5767_v28 = vadd.f32 %v5766_v37, %v5765_v51  ;;  %v5664_v58 = vadd.f32 %v5663_v50, %v5662_v61  ;;  %v7088_v31 = vadd.f32 %v7055_v8, %v6919_v38 }
 0x2bc   : > { %v5665_v15 = vsel %vm1553_vm7, %v7087_v9, 0.0  ;;  %v5719_v14 = vmul.f32 %v7087_v9, %v7087_v9  ;;  %v6514_v24 = vpack.c.bf16 %v7087_v9, %v7087_v9  ;;  %v7089_v12 = vadd.f32 %v5549_v44, %v3524_v35 }
 0x2bd   : > { %v6922_v49 = vpop.f32.mrb[24].mxu1  ;;  %5952 = vst.msk [vmem:[%s7503_s30 + $0x58] sm:$0xf] %vm949_vm10, %v6516_v41  ;;  %v5721_v47 = vmul.f32 %v7086_v52, %v7086_v52  ;;  %v5666_v1 = vadd.f32 %v5665_v15, %v5664_v58  ;;  %v5769_v62 = vadd.f32 %v5768_v20, %v5767_v28  ;;  %v6517_v57 = vpack.c.bf16 %v7088_v31, %v7088_v31 }
 0x2be   : > { %v3537_v54 = vpop.f32.mrb[25].mxu1  ;;  %v5770_v63 = vsel %vm1553_vm7, %v5719_v14, 0.0  ;;  %5950 = vst.msk [vmem:[%s7503_s30 + $0x50] sm:$0xf] %vm949_vm10, %v6514_v24  ;;  %v5667_v26 = vsel %vm1553_vm7, %v7089_v12, 0.0  ;;  %v5720_v23 = vmul.f32 %v7089_v12, %v7089_v12  ;;  %v6515_v7 = vpack.c.bf16 %v7089_v12, %v7089_v12 }
 0x2bf   : > { %v6923_v55 = vpop.f32.mrb[26].mxu1  ;;  %v5771_v36 = vadd.f32 %v5770_v63, %v5769_v62  ;;  %v5668_v17 = vadd.f32 %v5667_v26, %v5666_v1  ;;  %v5669_v0 = vsel %vm1553_vm7, %v7086_v52, 0.0  ;;  %v5722_v53 = vmul.f32 %v7088_v31, %v7088_v31  ;;  %5953 = vst.msk [vmem:[%s7503_s30 + $0x5c] sm:$0xf] %vm949_vm10, %v6517_v57 }
 0x2c0   : > { %v3540_v56 = vpop.f32.mrb[27].mxu1  ;;  %v7058_v11 = vpop.f32.mrb[24].mxu0  ;;  %v5772_v25 = vsel %vm1553_vm7, %v5720_v23, 0.0  ;;  %5951 = vst.msk [vmem:[%s7503_s30 + $0x54] sm:$0xf] %vm949_vm10, %v6515_v7  ;;  %v5774_v45 = vsel %vm1553_vm7, %v5721_v47, 0.0 }
 0x2c1   : > { %v7090_v21 = vadd.f32 %v7058_v11, %v6922_v49  ;;  %v5562_v4 = vpop.f32.mrb[25].mxu0  ;;  %v5671_v46 = vsel %vm1553_vm7, %v7088_v31, 0.0  ;;  %v5670_v40 = vadd.f32 %v5669_v0, %v5668_v17  ;;  %v5773_v29 = vadd.f32 %v5772_v25, %v5771_v36 }
 0x2c2   : > { %v7091_v18 = vadd.f32 %v5562_v4, %v3537_v54  ;;  %v7059_v42 = vpop.f32.mrb[26].mxu0  ;;  %v5776_v22 = vsel %vm1553_vm7, %v5722_v53, 0.0 }
 0x2c3   : > { %v5565_v34 = vpop.f32.mrb[27].mxu0  ;;  %v6520_v38 = vpack.c.bf16 %v7090_v21, %v7090_v21  ;;  %v5775_v3 = vadd.f32 %v5774_v45, %v5773_v29  ;;  %v5672_v10 = vadd.f32 %v5671_v46, %v5670_v40  ;;  %v7092_v48 = vadd.f32 %v7059_v42, %v6923_v55 }
 0x2c4   : > { %v5673_v5 = vsel %vm1553_vm7, %v7091_v18, 0.0  ;;  %v5723_v2 = vmul.f32 %v7091_v18, %v7091_v18  ;;  %v6518_v13 = vpack.c.bf16 %v7091_v18, %v7091_v18  ;;  %v7093_v43 = vadd.f32 %v5565_v34, %v3540_v56 }
 0x2c5   : > { %v6926_v16 = vpop.f32.mrb[28].mxu1  ;;  %5956 = vst.msk [vmem:[%s7503_s30 + $0x68] sm:$0xf] %vm949_vm10, %v6520_v38  ;;  %v5725_v32 = vmul.f32 %v7090_v21, %v7090_v21  ;;  %v5674_v30 = vadd.f32 %v5673_v5, %v5672_v10  ;;  %v5777_v52 = vadd.f32 %v5776_v22, %v5775_v3  ;;  %v6521_v59 = vpack.c.bf16 %v7092_v48, %v7092_v48 }
 0x2c6   : > { %v3553_v35 = vpop.f32.mrb[29].mxu1  ;;  %v5778_v33 = vsel %vm1553_vm7, %v5723_v2, 0.0  ;;  %5954 = vst.msk [vmem:[%s7503_s30 + $0x60] sm:$0xf] %vm949_vm10, %v6518_v13  ;;  %v5675_v19 = vsel %vm1553_vm7, %v7093_v43, 0.0  ;;  %v5724_v39 = vmul.f32 %v7093_v43, %v7093_v43  ;;  %v6519_v27 = vpack.c.bf16 %v7093_v43, %v7093_v43 }
 0x2c7   : > { %v6927_v6 = vpop.f32.mrb[30].mxu1  ;;  %v5779_v8 = vadd.f32 %v5778_v33, %v5777_v52  ;;  %v5676_v37 = vadd.f32 %v5675_v19, %v5674_v30  ;;  %v5677_v51 = vsel %vm1553_vm7, %v7090_v21, 0.0  ;;  %v5726_v44 = vmul.f32 %v7092_v48, %v7092_v48  ;;  %5957 = vst.msk [vmem:[%s7503_s30 + $0x6c] sm:$0xf] %vm949_vm10, %v6521_v59  ;;  %v5625_v33 = vld [vmem:[#allocation2] sm:$0x1] }
 0x2c8   : > { %v3556_v60 = vpop.f32.mrb[31].mxu1  ;;  %v7062_v9 = vpop.f32.mrb[28].mxu0  ;;  %v5780_v49 = vsel %vm1553_vm7, %v5724_v39, 0.0  ;;  %5955 = vst.msk [vmem:[%s7503_s30 + $0x64] sm:$0xf] %vm949_vm10, %v6519_v27  ;;  %v5782_v14 = vsel %vm1553_vm7, %v5725_v32, 0.0 }
 0x2c9   : > { %v7094_v50 = vadd.f32 %v7062_v9, %v6926_v16  ;;  %v5578_v61 = vpop.f32.mrb[29].mxu0  ;;  %v5679_v24 = vsel %vm1553_vm7, %v7092_v48, 0.0  ;;  %v5678_v54 = vadd.f32 %v5677_v51, %v5676_v37  ;;  %v5781_v28 = vadd.f32 %v5780_v49, %v5779_v8  ;;  %v5698_v32 = vld [vmem:[#allocation2 + $0x1] sm:$0x1] }
 0x2ca   : > { %v7095_v41 = vadd.f32 %v5578_v61, %v3553_v35  ;;  %v7063_v15 = vpop.f32.mrb[30].mxu0  ;;  %v5784_v1 = vsel %vm1553_vm7, %v5726_v44, 0.0 }
 0x2cb   : > { %v5581_v58 = vpop.f32.mrb[31].mxu0  ;;  %v6524_v31 = vpack.c.bf16 %v7094_v50, %v7094_v50  ;;  %v5783_v12 = vadd.f32 %v5782_v14, %v5781_v28  ;;  %v5680_v56 = vadd.f32 %v5679_v24, %v5678_v54  ;;  %v7096_v47 = vadd.f32 %v7063_v15, %v6927_v6 }
 0x2cc   : > { %v5681_v55 = vsel %vm1553_vm7, %v7095_v41, 0.0  ;;  %v5727_v20 = vmul.f32 %v7095_v41, %v7095_v41  ;;  %v6522_v63 = vpack.c.bf16 %v7095_v41, %v7095_v41  ;;  %v7097_v57 = vadd.f32 %v5581_v58, %v3556_v60 }
 0x2cd   : > { %5960 = vst.msk [vmem:[%s7503_s30 + $0x78] sm:$0xf] %vm949_vm10, %v6524_v31  ;;  %v5729_v26 = vmul.f32 %v7094_v50, %v7094_v50  ;;  %v5682_v23 = vadd.f32 %v5681_v55, %v5680_v56  ;;  %v5785_v7 = vadd.f32 %v5784_v1, %v5783_v12  ;;  %v6525_v11 = vpack.c.bf16 %v7096_v47, %v7096_v47 }
 0x2ce   : > { %v5786_v62 = vsel %vm1553_vm7, %v5727_v20, 0.0  ;;  %5958 = vst.msk [vmem:[%s7503_s30 + $0x70] sm:$0xf] %vm949_vm10, %v6522_v63  ;;  %v5683_v36 = vsel %vm1553_vm7, %v7097_v57, 0.0  ;;  %v5728_v17 = vmul.f32 %v7097_v57, %v7097_v57  ;;  %v6523_v21 = vpack.c.bf16 %v7097_v57, %v7097_v57 }
 0x2cf   : > { %v5787_v4 = vadd.f32 %v5786_v62, %v5785_v7  ;;  %v5684_v0 = vadd.f32 %v5683_v36, %v5682_v23  ;;  %v5685_v53 = vsel %vm1553_vm7, %v7094_v50, 0.0  ;;  %v5730_v25 = vmul.f32 %v7096_v47, %v7096_v47  ;;  %5961 = vst.msk [vmem:[%s7503_s30 + $0x7c] sm:$0xf] %vm949_vm10, %v6525_v11 }
 0x2d0   : > { %v5788_v18 = vsel %vm1553_vm7, %v5728_v17, 0.0  ;;  %5959 = vst.msk [vmem:[%s7503_s30 + $0x74] sm:$0xf] %vm949_vm10, %v6523_v21  ;;  %v5790_v46 = vsel %vm1553_vm7, %v5729_v26, 0.0  ;;  %v5687_v40 = vsel %vm1553_vm7, %v7096_v47, 0.0 }
 0x2d1   : > { %v5686_v42 = vadd.f32 %v5685_v53, %v5684_v0  ;;  %v5789_v45 = vadd.f32 %v5788_v18, %v5787_v4  ;;  %v5792_v16 = vsel %vm1553_vm7, %v5730_v25, 0.0 }
 0x2d3   : > { %v5688_v29 = vadd.f32 %v5687_v40, %v5686_v42  ;;  %v5791_v34 = vadd.f32 %v5790_v46, %v5789_v45 }
 0x2d5   : > { %v5689_v38 = vrot.slane %v5688_v29, 4  ;;  %v5793_v5 = vadd.f32 %v5792_v16, %v5791_v34 }
 0x2d7   : > { %v5690_v2 = vadd.f32 %v5689_v38, %v5688_v29  ;;  %v5794_v13 = vrot.slane %v5793_v5, 4 }
 0x2d9   : > { %v5691_v35 = vrot.slane %v5690_v2, 2  ;;  %v5795_v3 = vadd.f32 %v5794_v13, %v5793_v5 }
 0x2db   : > { %v5692_v10 = vadd.f32 %v5691_v35, %v5690_v2  ;;  %v5796_v48 = vrot.slane %v5795_v3, 2 }
 0x2dd   : > { %v5693_v6 = vrot.slane %v5692_v10, 1  ;;  %v5797_v22 = vadd.f32 %v5796_v48, %v5795_v3 }
 0x2df   : > { %v5694_v43 = vadd.f32 %v5693_v6, %v5692_v10  ;;  %v5798_v60 = vrot.slane %v5797_v22, 1  ;;  %5965 = sbr.rel (%p6457_p5) target bundleno = 767 (0x2ff), region = 48 }
 0x2e1   : > { %v5695_v30 = vadd.f32 %v5694_v43, %v5625_v33  ;;  %v5799_v52 = vadd.f32 %v5798_v60, %v5797_v22 }
 0x2e3   : > { %5697 = vst.msk [vmem:[#allocation2] sm:$0x1] %vm957_vm12, %v5695_v30  ;;  %v5800_v59 = vadd.f32 %v5799_v52, %v5698_v32 }
 0x2e5   : > { %5801 = vst.msk [vmem:[#allocation2 + $0x1] sm:$0x1] %vm957_vm12, %v5800_v59 }
 0x2ea   : > { %v5966_v19 = vld [vmem:[#allocation2] sm:$0x1] }
 0x2eb   : > { %v5967_v27 = vmul.f32 0.001953125, %v5966_v19 }
 0x2ec   : > { %v5968_v39 = vld [vmem:[#allocation2 + $0x1] sm:$0x1] }
 0x2ed   : > { %v5969_v9 = vmul.f32 0.001953125, %v5968_v39  ;;  %v5970_v8 = vmul.f32 %v5967_v27, %v5967_v27  ;;  %5972 = vst.msk [vmem:[%s9566_s6] sm:$0x1] %vm957_vm12, %v5967_v27 }
 0x2ef   : > { %v5971_v37 = vsub.f32 %v5969_v9, %v5970_v8 }
 0x2f1   : > { %v5973_v50 = vadd.f32 1e-05, %v5971_v37 }
 0x2f3   : > { %7436 = vrsqrt.f32 %v5973_v50 }
 0x2fd   : > { %v7437_v61 = vpop.eup %7436 }
 0x2fe   : > { %5975 = vst.msk [vmem:[%s9566_s6 + $0x1] sm:$0x1] %vm957_vm12, %v7437_v61 }
 0x2ff PF: > { %s17_s21 = sadd.s32 1, %s7444_s21  }
 0x300   : > { %p14_p6 = scmp.ge.s32.totalorder %s17_s21, 4  }
 0x302   :  { %16 = sbr.rel (!%p14_p6) target bundleno = 1 (0x1), region = 96 }

</bundles_post_ra>
